<compile_context>
chip_gen: v5e
topology: v5e:2x2
jax: 0.10.0
libtpu: 0.0.40
codegen_flags: <defaults>
</compile_context>

<pallas_src>
import jax
import jax.numpy as jnp
from jax import lax
from jax.experimental import pallas as pl
from jax.experimental.pallas import tpu as pltpu

HIDDEN = 32                # LSTM hidden size (fixed by the module)
CAT_LEN = 105              # fc1 expects 64 * 105 input features
N_SENT = 70                # sentence length
N_SHORT = 35               # shortest-path length (70 + 35 = 105)


# ----------------------------------------------------------------------------
# Fused bidirectional LSTM kernel.  One grid program = one of the two BiLSTMs
# (weights selected by the BlockSpec index_map along the stacked leading dim).
# ----------------------------------------------------------------------------
def _bilstm_pair_kernel(x_ref, wxf_ref, wxb_ref, whh_ref, b_ref, out_ref):
    T, N, _ = x_ref.shape
    H = HIDDEN
    G = 2 * H                      # fused fwd+bwd gate-block width (64)

    # ---- Hoisted input projection (outside the serial recurrence). --------
    # wxf/wxb hold the fwd/bwd input weights placed in their interleaved gate
    # columns (zeros elsewhere), so combining fwd(time s) with bwd(time T-1-s)
    # is a plain add -- no lane shuffles inside the recurrence.
    bias = b_ref[...]                                              # (1, 8H)
    gxf = [jnp.dot(x_ref[t], wxf_ref[...],
                   preferred_element_type=jnp.float32) for t in range(T)]
    gxb = [jnp.dot(x_ref[t], wxb_ref[...],
                   preferred_element_type=jnp.float32) for t in range(T)]
    gx = [gxf[s] + gxb[T - 1 - s] + bias for s in range(T)]        # (N, 8H)

    def sig(v):                     # sigmoid via EUP exp + approx reciprocal
        return pl.reciprocal(1.0 + jnp.exp(-v), approx=True)

    h = jnp.zeros((N, G), jnp.float32)       # [h_fwd | h_bwd]
    c = jnp.zeros((N, G), jnp.float32)       # [c_fwd | c_bwd]
    hs = []
    # ---- Recurrence: ONE 256-wide MXU push per step (fwd+bwd fused). ------
    # T is static -> fully unrolled; store indices below are static too.
    for s in range(T):
        gates = gx[s] + jnp.dot(h, whh_ref[...],
                                preferred_element_type=jnp.float32)  # (N, 8H)
        i_g = sig(gates[:, 0 * G:1 * G])
        f_g = sig(gates[:, 1 * G:2 * G])
        g_g = jnp.tanh(gates[:, 2 * G:3 * G])
        o_g = sig(gates[:, 3 * G:4 * G])
        c = f_g * c + i_g * g_g
        h = o_g * jnp.tanh(c)
        hs.append(h)

    # ---- Lane-dense 64-wide stores: out[t] = [fwd(t) | bwd(t)]. -----------
    for t in range(T):
        out_ref[t] = jnp.concatenate([hs[t][:, :H], hs[T - 1 - t][:, H:]],
                                     axis=1)


def bilstm_pair(x_stack, fused):
    """x_stack: (2, T, N, E) -> (2, T, N, 2H).  One launch for both BiLSTMs."""
    _, T, N, E = x_stack.shape
    H = HIDDEN
    return pl.pallas_call(
        _bilstm_pair_kernel,
        out_shape=jax.ShapeDtypeStruct((2, T, N, 2 * H), jnp.float32),
        grid=(2,),
        in_specs=[
            pl.BlockSpec((None, T, N, E), lambda i: (i, 0, 0, 0)),
            pl.BlockSpec((None, E, 8 * H), lambda i: (i, 0, 0)),
            pl.BlockSpec((None, E, 8 * H), lambda i: (i, 0, 0)),
            pl.BlockSpec((None, 2 * H, 8 * H), lambda i: (i, 0, 0)),
            pl.BlockSpec((None, 1, 8 * H), lambda i: (i, 0, 0)),
        ],
        out_specs=pl.BlockSpec((None, T, N, 2 * H), lambda i: (i, 0, 0, 0)),
        compiler_params=pltpu.CompilerParams(
            dimension_semantics=("parallel",)),
    )(x_stack, fused["wxf"], fused["wxb"], fused["whh"], fused["bg"])


# ----------------------------------------------------------------------------
# Fused MLP head: fc1 (bf16, padded) -> relu -> fc2 -> relu -> fc3 -> sigmoid
# ----------------------------------------------------------------------------
def _mlp_kernel(x_ref, w1, b1, w2, b2, w3, b3, out_ref):
    x16 = x_ref[...].astype(jnp.bfloat16)
    h1 = jnp.dot(x16, w1[...], preferred_element_type=jnp.float32) + b1[...]
    h1 = jnp.maximum(h1, 0.0)
    h2 = jnp.dot(h1, w2[...], preferred_element_type=jnp.float32) + b2[...]
    h2 = jnp.maximum(h2, 0.0)
    h3 = jnp.dot(h2, w3[...], preferred_element_type=jnp.float32) + b3[...]
    out_ref[...] = pl.reciprocal(1.0 + jnp.exp(-h3), approx=True)


def mlp_head(flat, fused):
    """flat: (T, 64*105) -> (T, 1)."""
    T = flat.shape[0]
    return pl.pallas_call(
        _mlp_kernel,
        out_shape=jax.ShapeDtypeStruct((T, 1), jnp.float32),
    )(flat, fused["w1"], fused["b1"], fused["w2"], fused["b2"],
      fused["w3"], fused["b3"])


# ----------------------------------------------------------------------------
# Parameter construction (deterministic, synthetic) in the torch-like layout,
# plus a one-time transformation into the fused kernel layout.
# ----------------------------------------------------------------------------
def init_params(key, vocab_size, embedding_size):
    ks = jax.random.split(key, 16)
    H = HIDDEN

    def u(k, shape, scale=0.1):
        return jax.random.uniform(k, shape, jnp.float32, -1.0, 1.0) * scale

    def lstm_params(k0, k1, k2, k3, k4, k5):
        return {
            "wih_f": u(k0, (embedding_size, 4 * H)),
            "whh_f": u(k1, (H, 4 * H)),
            "b_f":   u(k2, (1, 4 * H)),          # (b_ih + b_hh) combined
            "wih_b": u(k3, (embedding_size, 4 * H)),
            "whh_b": u(k4, (H, 4 * H)),
            "b_b":   u(k5, (1, 4 * H)),
        }

    return {
        "emb": u(ks[0], (vocab_size, embedding_size), 1.0),
        "lstm1": lstm_params(*ks[1:7]),
        "lstm2": lstm_params(*ks[7:13]),
        "mlp": {
            "w1": u(ks[13], (64 * CAT_LEN, 100), 0.02),
            "b1": jnp.zeros((1, 100), jnp.float32),
            "w2": u(ks[14], (100, 64)),
            "b2": jnp.zeros((1, 64), jnp.float32),
            "w3": u(ks[15], (64, 1)),
            "b3": jnp.zeros((1, 1), jnp.float32),
        },
    }


def build_fused_params(params):
    """One-time re-layout of the base weights for the optimized kernels."""
    H = HIDDEN

    # Gate-interleaved column layout, blocks of width 2H: [i_f|i_b, f_f|f_b,
    # g_f|g_b, o_f|o_b] so the cell math runs once on (N, 2H)-wide arrays.
    def expand_x(w, half):                       # (E,4H) -> (E,8H), zero-padded
        out = jnp.zeros((w.shape[0], 8 * H), jnp.float32)
        for g in range(4):
            lo = g * 2 * H + half * H
            out = out.at[:, lo:lo + H].set(w[:, g * H:(g + 1) * H])
        return out

    def expand_h(wf, wb):                        # block-diag (2H, 8H)
        out = jnp.zeros((2 * H, 8 * H), jnp.float32)
        for g in range(4):
            lo = g * 2 * H
            out = out.at[:H, lo:lo + H].set(wf[:, g * H:(g + 1) * H])
            out = out.at[H:, lo + H:lo + 2 * H].set(wb[:, g * H:(g + 1) * H])
        return out

    def expand_b(bf, bb):                        # (1, 8H)
        out = jnp.zeros((1, 8 * H), jnp.float32)
        for g in range(4):
            lo = g * 2 * H
            out = out.at[:, lo:lo + H].set(bf[:, g * H:(g + 1) * H])
            out = out.at[:, lo + H:lo + 2 * H].set(bb[:, g * H:(g + 1) * H])
        return out

    l1, l2 = params["lstm1"], params["lstm2"]
    wxf = jnp.stack([expand_x(l1["wih_f"], 0), expand_x(l2["wih_f"], 0)])
    wxb = jnp.stack([expand_x(l1["wih_b"], 1), expand_x(l2["wih_b"], 1)])
    whh = jnp.stack([expand_h(l1["whh_f"], l1["whh_b"]),
                     expand_h(l2["whh_f"], l2["whh_b"])])
    bg = jnp.stack([expand_b(l1["b_f"], l1["b_b"]),
                    expand_b(l2["b_f"], l2["b_b"])])

    m = params["mlp"]
    # Permute fc1 rows from torch (channel-major, position-minor) order to the
    # (position-major, channel-minor) order of the flattened un-transposed
    # LSTM outputs.  This absorbs permute(0,2,1)+cat into the weight.
    w1_3d = m["w1"].reshape(2 * H, CAT_LEN, 100)                 # [ch, pos, j]
    w1_sent = jnp.transpose(w1_3d[:, :N_SENT, :], (1, 0, 2)).reshape(
        N_SENT * 2 * H, 100)
    w1_short = jnp.transpose(w1_3d[:, N_SENT:, :], (1, 0, 2)).reshape(
        N_SHORT * 2 * H, 100)
    w1p = jnp.concatenate([w1_sent, w1_short], axis=0)           # (6720, 100)
    w1p = jnp.pad(w1p, ((0, 0), (0, 28))).astype(jnp.bfloat16)   # (6720, 128)

    w2p = jnp.zeros((128, 128), jnp.float32).at[:100, :64].set(m["w2"])
    w3p = jnp.zeros((128, 1), jnp.float32).at[:64, :].set(m["w3"])
    b1p = jnp.zeros((1, 128), jnp.float32).at[:, :100].set(m["b1"])
    b2p = jnp.zeros((1, 128), jnp.float32).at[:, :64].set(m["b2"])

    return {"emb": params["emb"],
            "wxf": wxf, "wxb": wxb, "whh": whh, "bg": bg,
            "w1": w1p, "b1": b1p, "w2": w2p, "b2": b2p,
            "w3": w3p, "b3": m["b3"]}


# ----------------------------------------------------------------------------
# Full forward pass (mirrors BiLSTMShort.forward, eval mode).
# ----------------------------------------------------------------------------
def bilstm_short_forward(fused, sentence, features, shortest):
    del features  # unused in the reference forward as well
    T, n_sent = sentence.shape
    n_short = shortest.shape[1]

    # Pad the shortest-path ids to the sentence width so both BiLSTMs share
    # one grid; the padded batch columns evolve independently and their
    # outputs are discarded below.
    shortest_p = jnp.pad(shortest, ((0, 0), (0, n_sent - n_short)))
    ids = jnp.stack([sentence, shortest_p], axis=0)              # (2, T, 70)
    emb = jnp.take(fused["emb"], ids, axis=0)                    # (2, T, 70, E)

    outs = bilstm_pair(emb, fused)                               # (2, T, 70, 64)

    # Equivalent of permute(0,2,1)+cat+view: the channel/position transpose is
    # already folded into the permuted fc1 weight, so only a cheap
    # reshape+concat of ~54 KB remains.
    flat = jnp.concatenate(
        [outs[0].reshape(T, n_sent * 2 * HIDDEN),
         outs[1, :, :n_short, :].reshape(T, n_short * 2 * HIDDEN)], axis=1)

    return mlp_head(flat, fused)                                 # (T, 1)


# ----------------------------------------------------------------------------
# Pure-JAX reference (f32, torch-layout weights) for a numerical sanity check.
# ----------------------------------------------------------------------------
def _ref_lstm_dir(x, wih, whh, b, reverse):
    H = HIDDEN
    xs = x[::-1] if reverse else x

    def step(carry, x_t):
        h, c = carry
        gates = x_t @ wih + h @ whh + b
        i = jax.nn.sigmoid(gates[:, 0 * H:1 * H])
        f = jax.nn.sigmoid(gates[:, 1 * H:2 * H])
        g = jnp.tanh(gates[:, 2 * H:3 * H])
        o = jax.nn.sigmoid(gates[:, 3 * H:4 * H])
        c = f * c + i * g
        h = o * jnp.tanh(c)
        return (h, c), h

    h0 = jnp.zeros((x.shape[1], H), jnp.float32)
    _, outs = lax.scan(step, (h0, h0), xs)
    return outs[::-1] if reverse else outs


def _ref_forward(params, sentence, features, shortest):
    def bilstm_ref(x, p):
        f = _ref_lstm_dir(x, p["wih_f"], p["whh_f"], p["b_f"][0], False)
        b = _ref_lstm_dir(x, p["wih_b"], p["whh_b"], p["b_b"][0], True)
        return jnp.concatenate([f, b], axis=-1)

    emb_sent = jnp.take(params["emb"], sentence, axis=0)
    emb_short = jnp.take(params["emb"], shortest, axis=0)
    o1 = bilstm_ref(emb_sent, params["lstm1"])
    o2 = bilstm_ref(emb_short, params["lstm2"])
    cat = jnp.concatenate(
        [jnp.transpose(o1, (0, 2, 1)), jnp.transpose(o2, (0, 2, 1))], axis=2)
    flat = cat.reshape(sentence.shape[0], -1)
    m = params["mlp"]
    h1 = jax.nn.relu(flat @ m["w1"] + m["b1"])
    h2 = jax.nn.relu(h1 @ m["w2"] + m["b2"])
    return jax.nn.sigmoid(h2 @ m["w3"] + m["b3"])


if __name__ == "__main__":
    key = jax.random.PRNGKey(0)
    k_par, k_sent, k_short, k_feat = jax.random.split(key, 4)

    vocab_size = 50
    embedding_size = 16
    batch = 2                 # len(sentence); this is the LSTM "time" axis
    n_sent = N_SENT           # 70
    n_short = N_SHORT         # 35 ; 70 + 35 = 105

    params = init_params(k_par, vocab_size, embedding_size)
    fused = build_fused_params(params)

    sentence = jax.random.randint(k_sent, (batch, n_sent), 0, vocab_size,
                                  dtype=jnp.int32)
    shortest = jax.random.randint(k_short, (batch, n_short), 0, vocab_size,
                                  dtype=jnp.int32)
    features = jax.random.normal(k_feat, (batch, 8), jnp.float32)  # unused

    fwd = jax.jit(bilstm_short_forward)
    out = jax.block_until_ready(fwd(fused, sentence, features, shortest))
    assert out.shape == (batch, 1), out.shape

    ref = jax.block_until_ready(
        _ref_forward(params, sentence, features, shortest))
    # bf16 fc1 weights + approx-reciprocal sigmoids introduce small drift vs
    # the pure-f32 reference; the tiny weight scales attenuate it well below
    # this tolerance, while structural bugs would show up as O(0.1) errors.
    assert jnp.allclose(out, ref, atol=5e-3, rtol=5e-3), (out, ref)

    print("KERNEL_OK")
</pallas_src>

<mosaic_0001>
module attributes {stable_mosaic.version = 11 : i64} {
  func.func @_bilstm_pair_kernel(%arg0: i32, %arg1: memref<1x2x70x16xf32, #tpu.memory_space<vmem>>, %arg2: memref<1x16x256xf32, #tpu.memory_space<vmem>>, %arg3: memref<1x16x256xf32, #tpu.memory_space<vmem>>, %arg4: memref<1x64x256xf32, #tpu.memory_space<vmem>>, %arg5: memref<1x1x256xf32, #tpu.memory_space<vmem>>, %arg6: memref<1x2x70x64xf32, #tpu.memory_space<vmem>>) attributes {dimension_semantics = [#tpu.dimension_semantics<parallel>], iteration_bounds = array<i64: 2>, scalar_prefetch = 0 : i64, scratch_operands = 0 : i64, tpu.core_type = #tpu.core_type<tc>, window_params = [{transform_indices = @transform_0, window_bounds = array<i64: 1, 2, 70, 16>}, {transform_indices = @transform_1, window_bounds = array<i64: 1, 16, 256>}, {transform_indices = @transform_2, window_bounds = array<i64: 1, 16, 256>}, {transform_indices = @transform_3, window_bounds = array<i64: 1, 64, 256>}, {transform_indices = @transform_4, window_bounds = array<i64: 1, 1, 256>}, {transform_indices = @transform_5, window_bounds = array<i64: 1, 2, 70, 64>}]} {
    %c0 = arith.constant 0 : index
    %c0_0 = arith.constant 0 : index
    %c0_1 = arith.constant 0 : index
    %0 = vector.load %arg5[%c0, %c0_0, %c0_1] : memref<1x1x256xf32, #tpu.memory_space<vmem>>, vector<1x1x256xf32>
    %1 = vector.shape_cast %0 : vector<1x1x256xf32> to vector<1x256xf32>
    %c0_2 = arith.constant 0 : index
    %c0_3 = arith.constant 0 : index
    %c0_4 = arith.constant 0 : index
    %c0_5 = arith.constant 0 : index
    %2 = vector.load %arg1[%c0_2, %c0_3, %c0_4, %c0_5] : memref<1x2x70x16xf32, #tpu.memory_space<vmem>>, vector<1x1x70x16xf32>
    %3 = vector.shape_cast %2 : vector<1x1x70x16xf32> to vector<70x16xf32>
    %c0_6 = arith.constant 0 : index
    %c0_7 = arith.constant 0 : index
    %c0_8 = arith.constant 0 : index
    %4 = vector.load %arg2[%c0_6, %c0_7, %c0_8] : memref<1x16x256xf32, #tpu.memory_space<vmem>>, vector<1x16x256xf32>
    %5 = vector.shape_cast %4 : vector<1x16x256xf32> to vector<16x256xf32>
    %cst = arith.constant dense<0.000000e+00> : vector<70x256xf32>
    %6 = tpu.matmul %3, %5, %cst {dimension_numbers = #tpu.dot_dimension_numbers<[1], [0], [0], [1], [0, 0, 1, 1], [], []>} : vector<70x16xf32>, vector<16x256xf32>, vector<70x256xf32> -> vector<70x256xf32>
    %c0_9 = arith.constant 0 : index
    %c1 = arith.constant 1 : index
    %c0_10 = arith.constant 0 : index
    %c0_11 = arith.constant 0 : index
    %7 = vector.load %arg1[%c0_9, %c1, %c0_10, %c0_11] : memref<1x2x70x16xf32, #tpu.memory_space<vmem>>, vector<1x1x70x16xf32>
    %8 = vector.shape_cast %7 : vector<1x1x70x16xf32> to vector<70x16xf32>
    %c0_12 = arith.constant 0 : index
    %c0_13 = arith.constant 0 : index
    %c0_14 = arith.constant 0 : index
    %9 = vector.load %arg2[%c0_12, %c0_13, %c0_14] : memref<1x16x256xf32, #tpu.memory_space<vmem>>, vector<1x16x256xf32>
    %10 = vector.shape_cast %9 : vector<1x16x256xf32> to vector<16x256xf32>
    %cst_15 = arith.constant dense<0.000000e+00> : vector<70x256xf32>
    %11 = tpu.matmul %8, %10, %cst_15 {dimension_numbers = #tpu.dot_dimension_numbers<[1], [0], [0], [1], [0, 0, 1, 1], [], []>} : vector<70x16xf32>, vector<16x256xf32>, vector<70x256xf32> -> vector<70x256xf32>
    %c0_16 = arith.constant 0 : index
    %c0_17 = arith.constant 0 : index
    %c0_18 = arith.constant 0 : index
    %c0_19 = arith.constant 0 : index
    %12 = vector.load %arg1[%c0_16, %c0_17, %c0_18, %c0_19] : memref<1x2x70x16xf32, #tpu.memory_space<vmem>>, vector<1x1x70x16xf32>
    %13 = vector.shape_cast %12 : vector<1x1x70x16xf32> to vector<70x16xf32>
    %c0_20 = arith.constant 0 : index
    %c0_21 = arith.constant 0 : index
    %c0_22 = arith.constant 0 : index
    %14 = vector.load %arg3[%c0_20, %c0_21, %c0_22] : memref<1x16x256xf32, #tpu.memory_space<vmem>>, vector<1x16x256xf32>
    %15 = vector.shape_cast %14 : vector<1x16x256xf32> to vector<16x256xf32>
    %cst_23 = arith.constant dense<0.000000e+00> : vector<70x256xf32>
    %16 = tpu.matmul %13, %15, %cst_23 {dimension_numbers = #tpu.dot_dimension_numbers<[1], [0], [0], [1], [0, 0, 1, 1], [], []>} : vector<70x16xf32>, vector<16x256xf32>, vector<70x256xf32> -> vector<70x256xf32>
    %c0_24 = arith.constant 0 : index
    %c1_25 = arith.constant 1 : index
    %c0_26 = arith.constant 0 : index
    %c0_27 = arith.constant 0 : index
    %17 = vector.load %arg1[%c0_24, %c1_25, %c0_26, %c0_27] : memref<1x2x70x16xf32, #tpu.memory_space<vmem>>, vector<1x1x70x16xf32>
    %18 = vector.shape_cast %17 : vector<1x1x70x16xf32> to vector<70x16xf32>
    %c0_28 = arith.constant 0 : index
    %c0_29 = arith.constant 0 : index
    %c0_30 = arith.constant 0 : index
    %19 = vector.load %arg3[%c0_28, %c0_29, %c0_30] : memref<1x16x256xf32, #tpu.memory_space<vmem>>, vector<1x16x256xf32>
    %20 = vector.shape_cast %19 : vector<1x16x256xf32> to vector<16x256xf32>
    %cst_31 = arith.constant dense<0.000000e+00> : vector<70x256xf32>
    %21 = tpu.matmul %18, %20, %cst_31 {dimension_numbers = #tpu.dot_dimension_numbers<[1], [0], [0], [1], [0, 0, 1, 1], [], []>} : vector<70x16xf32>, vector<16x256xf32>, vector<70x256xf32> -> vector<70x256xf32>
    %22 = arith.addf %6, %21 : vector<70x256xf32>
    %23 = vector.broadcast %1 : vector<1x256xf32> to vector<70x256xf32>
    %24 = arith.addf %22, %23 : vector<70x256xf32>
    %25 = arith.addf %11, %16 : vector<70x256xf32>
    %26 = vector.broadcast %1 : vector<1x256xf32> to vector<70x256xf32>
    %27 = arith.addf %25, %26 : vector<70x256xf32>
    %cst_32 = arith.constant 0.000000e+00 : f32
    %28 = vector.broadcast %cst_32 : f32 to vector<70x64xf32>
    %cst_33 = arith.constant 0.000000e+00 : f32
    %29 = vector.broadcast %cst_33 : f32 to vector<70x64xf32>
    %c0_34 = arith.constant 0 : index
    %c0_35 = arith.constant 0 : index
    %c0_36 = arith.constant 0 : index
    %30 = vector.load %arg4[%c0_34, %c0_35, %c0_36] : memref<1x64x256xf32, #tpu.memory_space<vmem>>, vector<1x64x256xf32>
    %31 = vector.shape_cast %30 : vector<1x64x256xf32> to vector<64x256xf32>
    %cst_37 = arith.constant dense<0.000000e+00> : vector<70x256xf32>
    %32 = tpu.matmul %28, %31, %cst_37 {dimension_numbers = #tpu.dot_dimension_numbers<[1], [0], [0], [1], [0, 0, 1, 1], [], []>} : vector<70x64xf32>, vector<64x256xf32>, vector<70x256xf32> -> vector<70x256xf32>
    %33 = arith.addf %24, %32 : vector<70x256xf32>
    %34 = vector.extract_strided_slice %33 {offsets = [0, 0], sizes = [70, 64], strides = [1, 1]} : vector<70x256xf32> to vector<70x64xf32>
    %cst_38 = arith.constant 0.000000e+00 : f32
    %35 = vector.broadcast %cst_38 : f32 to vector<70x64xf32>
    %36 = arith.subf %35, %34 : vector<70x64xf32>
    %37 = math.exp %36 : vector<70x64xf32>
    %cst_39 = arith.constant 1.000000e+00 : f32
    %38 = vector.broadcast %cst_39 : f32 to vector<70x64xf32>
    %39 = arith.addf %38, %37 : vector<70x64xf32>
    %40 = tpu.reciprocal %39 {approx = true} : vector<70x64xf32> -> vector<70x64xf32>
    %41 = vector.extract_strided_slice %33 {offsets = [0, 64], sizes = [70, 64], strides = [1, 1]} : vector<70x256xf32> to vector<70x64xf32>
    %cst_40 = arith.constant 0.000000e+00 : f32
    %42 = vector.broadcast %cst_40 : f32 to vector<70x64xf32>
    %43 = arith.subf %42, %41 : vector<70x64xf32>
    %44 = math.exp %43 : vector<70x64xf32>
    %cst_41 = arith.constant 1.000000e+00 : f32
    %45 = vector.broadcast %cst_41 : f32 to vector<70x64xf32>
    %46 = arith.addf %45, %44 : vector<70x64xf32>
    %47 = tpu.reciprocal %46 {approx = true} : vector<70x64xf32> -> vector<70x64xf32>
    %48 = vector.extract_strided_slice %33 {offsets = [0, 128], sizes = [70, 64], strides = [1, 1]} : vector<70x256xf32> to vector<70x64xf32>
    %49 = math.tanh %48 : vector<70x64xf32>
    %50 = vector.extract_strided_slice %33 {offsets = [0, 192], sizes = [70, 64], strides = [1, 1]} : vector<70x256xf32> to vector<70x64xf32>
    %cst_42 = arith.constant 0.000000e+00 : f32
    %51 = vector.broadcast %cst_42 : f32 to vector<70x64xf32>
    %52 = arith.subf %51, %50 : vector<70x64xf32>
    %53 = math.exp %52 : vector<70x64xf32>
    %cst_43 = arith.constant 1.000000e+00 : f32
    %54 = vector.broadcast %cst_43 : f32 to vector<70x64xf32>
    %55 = arith.addf %54, %53 : vector<70x64xf32>
    %56 = tpu.reciprocal %55 {approx = true} : vector<70x64xf32> -> vector<70x64xf32>
    %57 = arith.mulf %47, %29 : vector<70x64xf32>
    %58 = arith.mulf %40, %49 : vector<70x64xf32>
    %59 = arith.addf %57, %58 : vector<70x64xf32>
    %60 = math.tanh %59 : vector<70x64xf32>
    %61 = arith.mulf %56, %60 : vector<70x64xf32>
    %c0_44 = arith.constant 0 : index
    %c0_45 = arith.constant 0 : index
    %c0_46 = arith.constant 0 : index
    %62 = vector.load %arg4[%c0_44, %c0_45, %c0_46] : memref<1x64x256xf32, #tpu.memory_space<vmem>>, vector<1x64x256xf32>
    %63 = vector.shape_cast %62 : vector<1x64x256xf32> to vector<64x256xf32>
    %cst_47 = arith.constant dense<0.000000e+00> : vector<70x256xf32>
    %64 = tpu.matmul %61, %63, %cst_47 {dimension_numbers = #tpu.dot_dimension_numbers<[1], [0], [0], [1], [0, 0, 1, 1], [], []>} : vector<70x64xf32>, vector<64x256xf32>, vector<70x256xf32> -> vector<70x256xf32>
    %65 = arith.addf %27, %64 : vector<70x256xf32>
    %66 = vector.extract_strided_slice %65 {offsets = [0, 0], sizes = [70, 64], strides = [1, 1]} : vector<70x256xf32> to vector<70x64xf32>
    %cst_48 = arith.constant 0.000000e+00 : f32
    %67 = vector.broadcast %cst_48 : f32 to vector<70x64xf32>
    %68 = arith.subf %67, %66 : vector<70x64xf32>
    %69 = math.exp %68 : vector<70x64xf32>
    %cst_49 = arith.constant 1.000000e+00 : f32
    %70 = vector.broadcast %cst_49 : f32 to vector<70x64xf32>
    %71 = arith.addf %70, %69 : vector<70x64xf32>
    %72 = tpu.reciprocal %71 {approx = true} : vector<70x64xf32> -> vector<70x64xf32>
    %73 = vector.extract_strided_slice %65 {offsets = [0, 64], sizes = [70, 64], strides = [1, 1]} : vector<70x256xf32> to vector<70x64xf32>
    %cst_50 = arith.constant 0.000000e+00 : f32
    %74 = vector.broadcast %cst_50 : f32 to vector<70x64xf32>
    %75 = arith.subf %74, %73 : vector<70x64xf32>
    %76 = math.exp %75 : vector<70x64xf32>
    %cst_51 = arith.constant 1.000000e+00 : f32
    %77 = vector.broadcast %cst_51 : f32 to vector<70x64xf32>
    %78 = arith.addf %77, %76 : vector<70x64xf32>
    %79 = tpu.reciprocal %78 {approx = true} : vector<70x64xf32> -> vector<70x64xf32>
    %80 = vector.extract_strided_slice %65 {offsets = [0, 128], sizes = [70, 64], strides = [1, 1]} : vector<70x256xf32> to vector<70x64xf32>
    %81 = math.tanh %80 : vector<70x64xf32>
    %82 = vector.extract_strided_slice %65 {offsets = [0, 192], sizes = [70, 64], strides = [1, 1]} : vector<70x256xf32> to vector<70x64xf32>
    %cst_52 = arith.constant 0.000000e+00 : f32
    %83 = vector.broadcast %cst_52 : f32 to vector<70x64xf32>
    %84 = arith.subf %83, %82 : vector<70x64xf32>
    %85 = math.exp %84 : vector<70x64xf32>
    %cst_53 = arith.constant 1.000000e+00 : f32
    %86 = vector.broadcast %cst_53 : f32 to vector<70x64xf32>
    %87 = arith.addf %86, %85 : vector<70x64xf32>
    %88 = tpu.reciprocal %87 {approx = true} : vector<70x64xf32> -> vector<70x64xf32>
    %89 = arith.mulf %79, %59 : vector<70x64xf32>
    %90 = arith.mulf %72, %81 : vector<70x64xf32>
    %91 = arith.addf %89, %90 : vector<70x64xf32>
    %92 = math.tanh %91 : vector<70x64xf32>
    %93 = arith.mulf %88, %92 : vector<70x64xf32>
    %94 = vector.extract_strided_slice %61 {offsets = [0, 0], sizes = [70, 32], strides = [1, 1]} : vector<70x64xf32> to vector<70x32xf32>
    %95 = vector.extract_strided_slice %93 {offsets = [0, 32], sizes = [70, 32], strides = [1, 1]} : vector<70x64xf32> to vector<70x32xf32>
    %96 = tpu.concatenate %94, %95 in 1 : vector<70x32xf32>, vector<70x32xf32> -> vector<70x64xf32>
    %c0_54 = arith.constant 0 : index
    %c0_55 = arith.constant 0 : index
    %c0_56 = arith.constant 0 : index
    %c0_57 = arith.constant 0 : index
    %97 = vector.load %arg6[%c0_54, %c0_55, %c0_56, %c0_57] : memref<1x2x70x64xf32, #tpu.memory_space<vmem>>, vector<1x1x70x64xf32>
    %98 = vector.shape_cast %97 : vector<1x1x70x64xf32> to vector<70x64xf32>
    %99 = vector.shape_cast %96 : vector<70x64xf32> to vector<1x1x70x64xf32>
    tpu.vector_store %arg6[%c0_54, %c0_55, %c0_56, %c0_57], %99 {strides = array<i32>} : memref<1x2x70x64xf32, #tpu.memory_space<vmem>>, vector<1x1x70x64xf32>,
    %100 = vector.extract_strided_slice %93 {offsets = [0, 0], sizes = [70, 32], strides = [1, 1]} : vector<70x64xf32> to vector<70x32xf32>
    %101 = vector.extract_strided_slice %61 {offsets = [0, 32], sizes = [70, 32], strides = [1, 1]} : vector<70x64xf32> to vector<70x32xf32>
    %102 = tpu.concatenate %100, %101 in 1 : vector<70x32xf32>, vector<70x32xf32> -> vector<70x64xf32>
    %c0_58 = arith.constant 0 : index
    %c1_59 = arith.constant 1 : index
    %c0_60 = arith.constant 0 : index
    %c0_61 = arith.constant 0 : index
    %103 = vector.load %arg6[%c0_58, %c1_59, %c0_60, %c0_61] : memref<1x2x70x64xf32, #tpu.memory_space<vmem>>, vector<1x1x70x64xf32>
    %104 = vector.shape_cast %103 : vector<1x1x70x64xf32> to vector<70x64xf32>
    %105 = vector.shape_cast %102 : vector<70x64xf32> to vector<1x1x70x64xf32>
    tpu.vector_store %arg6[%c0_58, %c1_59, %c0_60, %c0_61], %105 {strides = array<i32>} : memref<1x2x70x64xf32, #tpu.memory_space<vmem>>, vector<1x1x70x64xf32>,
    return
  }
  func.func @transform_0(%arg0: i32) -> (i32, i32, i32, i32) {
    %c0_i32 = arith.constant 0 : i32
    %c0_i32_0 = arith.constant 0 : i32
    %c0_i32_1 = arith.constant 0 : i32
    %c0_i32_2 = arith.constant 0 : i32
    return %arg0, %c0_i32, %c0_i32_0, %c0_i32_1 : i32, i32, i32, i32
  }
  func.func @transform_1(%arg0: i32) -> (i32, i32, i32) {
    %c0_i32 = arith.constant 0 : i32
    %c0_i32_0 = arith.constant 0 : i32
    %c0_i32_1 = arith.constant 0 : i32
    return %arg0, %c0_i32, %c0_i32_0 : i32, i32, i32
  }
  func.func @transform_2(%arg0: i32) -> (i32, i32, i32) {
    %c0_i32 = arith.constant 0 : i32
    %c0_i32_0 = arith.constant 0 : i32
    %c0_i32_1 = arith.constant 0 : i32
    return %arg0, %c0_i32, %c0_i32_0 : i32, i32, i32
  }
  func.func @transform_3(%arg0: i32) -> (i32, i32, i32) {
    %c0_i32 = arith.constant 0 : i32
    %c0_i32_0 = arith.constant 0 : i32
    %c0_i32_1 = arith.constant 0 : i32
    return %arg0, %c0_i32, %c0_i32_0 : i32, i32, i32
  }
  func.func @transform_4(%arg0: i32) -> (i32, i32, i32) {
    %c0_i32 = arith.constant 0 : i32
    %c0_i32_0 = arith.constant 0 : i32
    %c0_i32_1 = arith.constant 0 : i32
    return %arg0, %c0_i32, %c0_i32_0 : i32, i32, i32
  }
  func.func @transform_5(%arg0: i32) -> (i32, i32, i32, i32) {
    %c0_i32 = arith.constant 0 : i32
    %c0_i32_0 = arith.constant 0 : i32
    %c0_i32_1 = arith.constant 0 : i32
    %c0_i32_2 = arith.constant 0 : i32
    return %arg0, %c0_i32, %c0_i32_0, %c0_i32_1 : i32, i32, i32, i32
  }
}

module attributes {stable_mosaic.version = 11 : i64} {
  func.func @_mlp_kernel(%arg0: memref<2x6720xf32, #tpu.memory_space<vmem>>, %arg1: memref<6720x128xbf16, #tpu.memory_space<vmem>>, %arg2: memref<1x128xf32, #tpu.memory_space<vmem>>, %arg3: memref<128x128xf32, #tpu.memory_space<vmem>>, %arg4: memref<1x128xf32, #tpu.memory_space<vmem>>, %arg5: memref<128x1xf32, #tpu.memory_space<vmem>>, %arg6: memref<1x1xf32, #tpu.memory_space<vmem>>, %arg7: memref<2x1xf32, #tpu.memory_space<vmem>>) attributes {dimension_semantics = [], scalar_prefetch = 0 : i64, scratch_operands = 0 : i64, tpu.core_type = #tpu.core_type<tc>} {
    %c0 = arith.constant 0 : index
    %c0_0 = arith.constant 0 : index
    %0 = vector.load %arg0[%c0, %c0_0] : memref<2x6720xf32, #tpu.memory_space<vmem>>, vector<2x6720xf32>
    %1 = arith.truncf %0 : vector<2x6720xf32> to vector<2x6720xbf16>
    %c0_1 = arith.constant 0 : index
    %c0_2 = arith.constant 0 : index
    %2 = vector.load %arg1[%c0_1, %c0_2] : memref<6720x128xbf16, #tpu.memory_space<vmem>>, vector<6720x128xbf16>
    %cst = arith.constant dense<0.000000e+00> : vector<2x128xf32>
    %3 = tpu.matmul %1, %2, %cst {dimension_numbers = #tpu.dot_dimension_numbers<[1], [0], [0], [1], [0, 0, 1, 1], [], []>} : vector<2x6720xbf16>, vector<6720x128xbf16>, vector<2x128xf32> -> vector<2x128xf32>
    %c0_3 = arith.constant 0 : index
    %c0_4 = arith.constant 0 : index
    %4 = vector.load %arg2[%c0_3, %c0_4] : memref<1x128xf32, #tpu.memory_space<vmem>>, vector<1x128xf32>
    %5 = vector.broadcast %4 : vector<1x128xf32> to vector<2x128xf32>
    %6 = arith.addf %3, %5 : vector<2x128xf32>
    %cst_5 = arith.constant 0.000000e+00 : f32
    %7 = vector.broadcast %cst_5 : f32 to vector<2x128xf32>
    %8 = arith.maximumf %6, %7 : vector<2x128xf32>
    %c0_6 = arith.constant 0 : index
    %c0_7 = arith.constant 0 : index
    %9 = vector.load %arg3[%c0_6, %c0_7] : memref<128x128xf32, #tpu.memory_space<vmem>>, vector<128x128xf32>
    %cst_8 = arith.constant dense<0.000000e+00> : vector<2x128xf32>
    %10 = tpu.matmul %8, %9, %cst_8 {dimension_numbers = #tpu.dot_dimension_numbers<[1], [0], [0], [1], [0, 0, 1, 1], [], []>} : vector<2x128xf32>, vector<128x128xf32>, vector<2x128xf32> -> vector<2x128xf32>
    %c0_9 = arith.constant 0 : index
    %c0_10 = arith.constant 0 : index
    %11 = vector.load %arg4[%c0_9, %c0_10] : memref<1x128xf32, #tpu.memory_space<vmem>>, vector<1x128xf32>
    %12 = vector.broadcast %11 : vector<1x128xf32> to vector<2x128xf32>
    %13 = arith.addf %10, %12 : vector<2x128xf32>
    %cst_11 = arith.constant 0.000000e+00 : f32
    %14 = vector.broadcast %cst_11 : f32 to vector<2x128xf32>
    %15 = arith.maximumf %13, %14 : vector<2x128xf32>
    %c0_12 = arith.constant 0 : index
    %c0_13 = arith.constant 0 : index
    %16 = vector.load %arg5[%c0_12, %c0_13] : memref<128x1xf32, #tpu.memory_space<vmem>>, vector<128x1xf32>
    %cst_14 = arith.constant dense<0.000000e+00> : vector<2x1xf32>
    %17 = tpu.matmul %15, %16, %cst_14 {dimension_numbers = #tpu.dot_dimension_numbers<[1], [0], [0], [1], [0, 0, 1, 1], [], []>} : vector<2x128xf32>, vector<128x1xf32>, vector<2x1xf32> -> vector<2x1xf32>
    %c0_15 = arith.constant 0 : index
    %c0_16 = arith.constant 0 : index
    %18 = vector.load %arg6[%c0_15, %c0_16] : memref<1x1xf32, #tpu.memory_space<vmem>>, vector<1x1xf32>
    %19 = vector.broadcast %18 : vector<1x1xf32> to vector<2x1xf32>
    %20 = arith.addf %17, %19 : vector<2x1xf32>
    %cst_17 = arith.constant 0.000000e+00 : f32
    %21 = vector.broadcast %cst_17 : f32 to vector<2x1xf32>
    %22 = arith.subf %21, %20 : vector<2x1xf32>
    %23 = math.exp %22 : vector<2x1xf32>
    %cst_18 = arith.constant 1.000000e+00 : f32
    %24 = vector.broadcast %cst_18 : f32 to vector<2x1xf32>
    %25 = arith.addf %24, %23 : vector<2x1xf32>
    %26 = tpu.reciprocal %25 {approx = true} : vector<2x1xf32> -> vector<2x1xf32>
    %c0_19 = arith.constant 0 : index
    %c0_20 = arith.constant 0 : index
    %27 = vector.load %arg7[%c0_19, %c0_20] : memref<2x1xf32, #tpu.memory_space<vmem>>, vector<2x1xf32>
    tpu.vector_store %arg7[%c0_19, %c0_20], %26 {strides = array<i32>} : memref<2x1xf32, #tpu.memory_space<vmem>>, vector<2x1xf32>,
    return
  }
}

</mosaic_0001>

<bundles_post_ra>
// kernel: squeeze.2
= control target key start
LH: loop header
LB: loop body
LE: loop exit
PB: predicated region body
PF: predicated region fallthrough
CT: control target
= control target key end

     0   :  { %vm71_vm0 = vcmask 1043458   ;;  %s123_s6 = smov 3  ;;  %vm76_vm1 = vcmask 1045508   ;;  %vm81_vm2 = vcmask 1047558   ;;  %s126_s9 = smov 12  ;;  %vm3_vm3 = vcmask 523264   ;;  %s946_s0 = inlined_call_operand.vmem [shape: f32[1,2,70,64], index: 0, kind: input, shape index: {}]   ;;  %s947_s1 = inlined_call_operand.vmem [shape: f32[2,4480], index: 1, kind: output, shape index: {}]  }
   0x1   :  { %v545_v0 = vld [vmem:[%s946_s0 + $0x11] ss:$72 sm:%s123_s6]   ;;  %s131_s10 = smov 48  ;;  %v546_v1 = vld [vmem:[%s946_s0 - $0x7d] ss:$72 sm:%s126_s9]   ;;  %s136_s15 = smov 192 }
   0x2   :  { %v547_v2 = vld [vmem:[%s946_s0 - $0x10b] ss:$72 sm:%s131_s10]   ;;  %s66_s16 = smov 3  ;;  %v129_v3 = vsel %vm71_vm0, %v546_v1, %v545_v0  ;;  %v548_v4 = vld [vmem:[%s946_s0 - $0x199] ss:$72 sm:%s136_s15]   ;;  %s69_s21 = smov 12 }
   0x3   :  { %v537_v5 = vld [vmem:[%s946_s0 + $0x1] ss:$72 sm:%s66_s16]   ;;  %s74_s22 = smov 48  ;;  %v134_v6 = vsel %vm76_vm1, %v547_v2, %v129_v3  ;;  %v538_v7 = vld [vmem:[%s946_s0 - $0x8d] ss:$72 sm:%s69_s21]   ;;  %s79_s27 = smov 192 }
   0x4   :  { %v539_v8 = vld [vmem:[%s946_s0 - $0x11b] ss:$72 sm:%s74_s22]   ;;  %s152_s28 = smov 3  ;;  %v139_v9 = vsel %vm81_vm2, %v548_v4, %v134_v6  ;;  %v72_v10 = vsel %vm71_vm0, %v538_v7, %v537_v5  ;;  %v540_v11 = vld [vmem:[%s946_s0 - $0x1a9] ss:$72 sm:%s79_s27]   ;;  %s155_s4 = smov 12 }
   0x5   :  { %v549_v12 = vld [vmem:[%s946_s0 + $0x19] ss:$72 sm:%s152_s28]   ;;  %s160_s5 = smov 48  ;;  %s607_s6 = smov 64   ;;  %v77_v13 = vsel %vm76_vm1, %v539_v8, %v72_v10  ;;  %v550_v14 = vld [vmem:[%s946_s0 - $0x75] ss:$72 sm:%s155_s4]  }
   0x6   :  { %140 = vrot.lane.b32.xlu1 %v139_v9, %s607_s6  ;;  %s165_s9 = smov 192  ;;  %s94_s10 = smov 3  ;;  %v82_v15 = vsel %vm81_vm2, %v540_v11, %v77_v13  ;;  %v158_v16 = vsel %vm71_vm0, %v550_v14, %v549_v12  ;;  %v551_v17 = vld [vmem:[%s946_s0 - $0x103] ss:$72 sm:%s160_s5]   ;;  %v529_v61 = vld [vmem:[%s946_s0 + $0x20] ss:$2 sm:$0xff]  }
   0x7   :  { %v552_v18 = vld [vmem:[%s946_s0 - $0x191] ss:$72 sm:%s165_s9]   ;;  %s97_s15 = smov 12  ;;  %s102_s16 = smov 48  ;;  %83 = vrot.lane.b32.xlu0 %v82_v15, %s607_s6  ;;  %v163_v19 = vsel %vm76_vm1, %v551_v17, %v158_v16  ;;  %v534_v62 = vld [vmem:[%s946_s0 + $0x68] ss:$2 sm:$0xff]  }
   0x8   :  { %v541_v20 = vld [vmem:[%s946_s0 + $0x9] ss:$72 sm:%s94_s10]   ;;  %s107_s19 = smov 192  ;;  %s268_s20 = smov 3  ;;  %v542_v21 = vld [vmem:[%s946_s0 - $0x85] ss:$72 sm:%s97_s15]   ;;  %v168_v26 = vsel %vm81_vm2, %v552_v18, %v163_v19 }
   0x9   :  { %v543_v22 = vld [vmem:[%s946_s0 - $0x113] ss:$72 sm:%s102_s16]   ;;  %s271_s25 = smov 12  ;;  %s276_s26 = smov 48  ;;  %v100_v23 = vsel %vm71_vm0, %v542_v21, %v541_v20  ;;  %v544_v24 = vld [vmem:[%s946_s0 - $0x1a1] ss:$72 sm:%s107_s19]  }
   0xa   :  { %v565_v25 = vld [vmem:[%s946_s0 + $0x39] ss:$72 sm:%s268_s20]   ;;  %s281_s2 = smov 192  ;;  %s239_s3 = smov 3  ;;  %v105_v27 = vsel %vm76_vm1, %v543_v22, %v100_v23  ;;  %v566_v28 = vld [vmem:[%s946_s0 - $0x55] ss:$72 sm:%s271_s25]  }
   0xb   :  { %s242_s7 = smov 12  ;;  %s247_s8 = smov 48  ;;  %v561_v29 = vld [vmem:[%s946_s0 + $0x31] ss:$72 sm:%s239_s3]   ;;  %v110_v30 = vsel %vm81_vm2, %v544_v24, %v105_v27  ;;  %v274_v31 = vsel %vm71_vm0, %v566_v28, %v565_v25  ;;  %v567_v32 = vld [vmem:[%s946_s0 - $0xe3] ss:$72 sm:%s276_s26]  }
   0xc   :  { %s252_s11 = smov 192  ;;  %s181_s12 = smov 3  ;;  %v562_v33 = vld [vmem:[%s946_s0 - $0x5d] ss:$72 sm:%s242_s7]   ;;  %v568_v34 = vld [vmem:[%s946_s0 - $0x171] ss:$72 sm:%s281_s2]   ;;  %v279_v39 = vsel %vm76_vm1, %v567_v32, %v274_v31 }
   0xd   :  { %s184_s17 = smov 12  ;;  %s189_s18 = smov 48  ;;  %v563_v35 = vld [vmem:[%s946_s0 - $0xeb] ss:$72 sm:%s247_s8]   ;;  %v245_v36 = vsel %vm71_vm0, %v562_v33, %v561_v29  ;;  %v553_v37 = vld [vmem:[%s946_s0 + $0x21] ss:$72 sm:%s181_s12]   ;;  %v284_v50 = vsel %vm81_vm2, %v568_v34, %v279_v39 }
   0xe   :  { %169 = vrot.lane.b32.xlu1 %v168_v26, %s607_s6  ;;  %s194_s23 = smov 192  ;;  %s210_s24 = smov 3  ;;  %v554_v38 = vld [vmem:[%s946_s0 - $0x6d] ss:$72 sm:%s184_s17]   ;;  %v250_v46 = vsel %vm76_vm1, %v563_v35, %v245_v36  ;;  %v528_v63 = vld [vmem:[%s946_s0 + $0x10] ss:$2 sm:$0xff]  }
   0xf   :  { %s213_s29 = smov 12  ;;  %s218_s30 = smov 48  ;;  %111 = vrot.lane.b32.xlu0 %v110_v30, %s607_s6  ;;  %v564_v40 = vld [vmem:[%s946_s0 - $0x179] ss:$72 sm:%s252_s11]   ;;  %v187_v41 = vsel %vm71_vm0, %v554_v38, %v553_v37  ;;  %v533_v0 = vld [vmem:[%s946_s0 + $0x58] ss:$2 sm:$0xff]  }
  0x10   :  { %v555_v42 = vld [vmem:[%s946_s0 - $0xfb] ss:$72 sm:%s189_s18]   ;;  %v556_v44 = vld [vmem:[%s946_s0 - $0x189] ss:$72 sm:%s194_s23]   ;;  %s223_s15 = smov 192  ;;  %v255_v52 = vsel %vm81_vm2, %v564_v40, %v250_v46  ;;  %s297_s18 = smov 3 }
  0x11   :  { %v192_v43 = vsel %vm76_vm1, %v555_v42, %v187_v41  ;;  %v557_v45 = vld [vmem:[%s946_s0 + $0x29] ss:$72 sm:%s210_s24]   ;;  %v558_v48 = vld [vmem:[%s946_s0 - $0x65] ss:$72 sm:%s213_s29]   ;;  %s300_s19 = smov 12  ;;  %s305_s24 = smov 48 }
  0x12   :  { %v197_v47 = vsel %vm81_vm2, %v556_v44, %v192_v43  ;;  %v559_v49 = vld [vmem:[%s946_s0 - $0xf3] ss:$72 sm:%s218_s30]   ;;  %v216_v51 = vsel %vm71_vm0, %v558_v48, %v557_v45  ;;  %v560_v54 = vld [vmem:[%s946_s0 - $0x181] ss:$72 sm:%s223_s15]   ;;  %vm85_vm4 = vcmask 1048064  }
  0x13   :  { %198 = vrot.lane.b32.xlu2 %v197_v47, %s607_s6  ;;  %v221_v53 = vsel %vm76_vm1, %v559_v49, %v216_v51  ;;  %v569_v56 = vld [vmem:[%s946_s0 + $0x41] ss:$72 sm:%s297_s18]   ;;  %17 = vst.msk [vmem:[#allocation0 + $0x80] ss:$8 sm:$0xf] %vm3_vm3, %v529_v61  }
  0x14   :  { %v226_v55 = vsel %vm81_vm2, %v560_v54, %v221_v53  ;;  %v570_v57 = vld [vmem:[%s946_s0 - $0x4d] ss:$72 sm:%s300_s19]   ;;  %v571_v59 = vld [vmem:[%s946_s0 - $0xdb] ss:$72 sm:%s305_s24]  }
  0x15   :  { %v303_v58 = vsel %vm71_vm0, %v570_v57, %v569_v56  ;;  %50 = vst.msk [vmem:[#allocation0 + $0x81] ss:$8 sm:$0xf] %vm3_vm3, %v534_v62   ;;  %v2_v1 = vld [vmem:[%s946_s0] ss:$2 sm:$0xff]  }
  0x16   :  { %285 = vrot.lane.b32.xlu1 %v284_v50, %s607_s6  ;;  %v308_v60 = vsel %vm76_vm1, %v571_v59, %v303_v58  ;;  %19 = vst.msk [vmem:[#allocation0 + $0x80] ss:$8 sm:$0xf0] %vm3_vm3, %v529_v61   ;;  %v532_v2 = vld [vmem:[%s946_s0 + $0x48] ss:$2 sm:$0xff]  }
  0x17   :  { %256 = vrot.lane.b32.xlu0 %v255_v52, %s607_s6  ;;  %52 = vst.msk [vmem:[#allocation0 + $0x81] ss:$8 sm:$0xf0] %vm3_vm3, %v534_v62   ;;  %v531_v32 = vld [vmem:[%s946_s0 + $0x40] ss:$2 sm:$0x7]  }
  0x18   :  { %10 = vst.msk [vmem:[#allocation0 + $0x40] ss:$8 sm:$0xf] %vm3_vm3, %v528_v63   ;;  %v536_v33 = vld [vmem:[%s946_s0 + $0x88] ss:$2 sm:$0x7]  }
  0x19   :  { %43 = vst.msk [vmem:[#allocation0 + $0x41] ss:$8 sm:$0xf] %vm3_vm3, %v533_v0   ;;  %v530_v38 = vld [vmem:[%s946_s0 + $0x30] ss:$2 sm:$0xff]  }
  0x1a   :  { %12 = vst.msk [vmem:[#allocation0 + $0x40] ss:$8 sm:$0xf0] %vm3_vm3, %v528_v63   ;;  %v535_v39 = vld [vmem:[%s946_s0 + $0x78] ss:$2 sm:$0xff]  }
  0x1b   :  { %227 = vrot.lane.b32.xlu2 %v226_v55, %s607_s6  ;;  %45 = vst.msk [vmem:[#allocation0 + $0x41] ss:$8 sm:$0xf0] %vm3_vm3, %v533_v0  }
  0x1c   :  { %4 = vst.msk [vmem:[#allocation0] ss:$8 sm:$0xf] %vm3_vm3, %v2_v1  }
  0x1d   :  { %36 = vst.msk [vmem:[#allocation0 + $0x1] ss:$8 sm:$0xf] %vm3_vm3, %v532_v2  }
  0x1e   :  { %5 = vst.msk [vmem:[#allocation0] ss:$8 sm:$0xf0] %vm3_vm3, %v2_v1  }
  0x1f   :  { %38 = vst.msk [vmem:[#allocation0 + $0x1] ss:$8 sm:$0xf0] %vm3_vm3, %v532_v2  }
  0x20   :  { %31 = vst.msk [vmem:[#allocation0 + $0x100] ss:$8 sm:$0x7] %vm3_vm3, %v531_v32  }
  0x21   :  { %64 = vst.msk [vmem:[#allocation0 + $0x101] ss:$8 sm:$0x7] %vm3_vm3, %v536_v33  }
  0x22   :  { %26 = vst.msk [vmem:[#allocation0 + $0xc0] ss:$8 sm:$0xf0] %vm3_vm3, %v530_v38  }
  0x23   :  { %309 = vrot.lane.b32.xlu2 %v308_v60, %s607_s6  ;;  %59 = vst.msk [vmem:[#allocation0 + $0xc1] ss:$8 sm:$0xf0] %vm3_vm3, %v535_v39  }
  0x24   :  { %24 = vst.msk [vmem:[#allocation0 + $0xc0] ss:$8 sm:$0xf] %vm3_vm3, %v530_v38  }
  0x25   :  { %57 = vst.msk [vmem:[#allocation0 + $0xc1] ss:$8 sm:$0xf] %vm3_vm3, %v535_v39  }
  0x6d   :  { %v199_v3 = vpop.permute.xlu2 %198  }
  0x6e   :  { %202 = vst.msk [vmem:[#allocation0 + $0x80] sm:$0x3] %vm85_vm4, %v199_v3  }
  0x6f   :  { %204 = vst.msk [vmem:[#allocation0 + $0x86] sm:$0xc] %vm85_vm4, %v199_v3  }
  0x70   :  { %206 = vst.msk [vmem:[#allocation0 + $0x8c] sm:$0x30] %vm85_vm4, %v199_v3  }
  0x71   :  { %208 = vst.msk [vmem:[#allocation0 + $0x92] sm:$0xc0] %vm85_vm4, %v199_v3  }
  0x75   :  { %v415_v4 = vld [vmem:[#allocation0 + $0x80] sm:$0x3]  ;;  %v228_v5 = vpop.permute.xlu2 %227  }
  0x76   :  { %587 = vst [vmem:[%s947_s1 + $0x20] sm:$0x3] %v415_v4  ;;  %v421_v6 = vld [vmem:[#allocation0 + $0x88] sm:$0x3] }
  0x77   :  { %588 = vst [vmem:[%s947_s1 + $0x22] sm:$0x3] %v421_v6  ;;  %v427_v7 = vld [vmem:[#allocation0 + $0x90] sm:$0x3] }
  0x78   :  { %589 = vst [vmem:[%s947_s1 + $0x24] sm:$0x3] %v427_v7  ;;  %v433_v8 = vld [vmem:[#allocation0 + $0x98] sm:$0x3]  ;;  %v141_v9 = vpop.permute.xlu1 %140  }
  0x79   :  { %590 = vst [vmem:[%s947_s1 + $0x26] sm:$0x3] %v433_v8  ;;  %v84_v10 = vpop.permute.xlu0 %83  }
  0x7a   :  { %144 = vst.msk [vmem:[#allocation0 + $0x40] sm:$0x3] %vm85_vm4, %v141_v9  }
  0x7b   :  { %146 = vst.msk [vmem:[#allocation0 + $0x46] sm:$0xc] %vm85_vm4, %v141_v9  }
  0x7c   :  { %148 = vst.msk [vmem:[#allocation0 + $0x4c] sm:$0x30] %vm85_vm4, %v141_v9  }
  0x7d   :  { %150 = vst.msk [vmem:[#allocation0 + $0x52] sm:$0xc0] %vm85_vm4, %v141_v9   ;;  %v310_v17 = vpop.permute.xlu2 %309  }
  0x7e   :  { %86 = vst.msk [vmem:[#allocation0] sm:$0x3] %vm85_vm4, %v84_v10  }
  0x7f   :  { %88 = vst.msk [vmem:[#allocation0 + $0x6] sm:$0xc] %vm85_vm4, %v84_v10  }
  0x80   :  { %90 = vst.msk [vmem:[#allocation0 + $0xc] sm:$0x30] %vm85_vm4, %v84_v10   ;;  %v170_v11 = vpop.permute.xlu1 %169  }
  0x81   :  { %v367_v12 = vld [vmem:[#allocation0 + $0x40] sm:$0x3]  ;;  %92 = vst.msk [vmem:[#allocation0 + $0x12] sm:$0xc0] %vm85_vm4, %v84_v10   ;;  %v112_v14 = vpop.permute.xlu0 %111  }
  0x82   :  { %579 = vst [vmem:[%s947_s1 + $0x10] sm:$0x3] %v367_v12  ;;  %v373_v13 = vld [vmem:[#allocation0 + $0x48] sm:$0x3] }
  0x83   :  { %580 = vst [vmem:[%s947_s1 + $0x12] sm:$0x3] %v373_v13  ;;  %v379_v15 = vld [vmem:[#allocation0 + $0x50] sm:$0x3] }
  0x84   :  { %581 = vst [vmem:[%s947_s1 + $0x14] sm:$0x3] %v379_v15  ;;  %v385_v16 = vld [vmem:[#allocation0 + $0x58] sm:$0x3] }
  0x85   :  { %582 = vst [vmem:[%s947_s1 + $0x16] sm:$0x3] %v385_v16  ;;  %v320_v18 = vld [vmem:[#allocation0] sm:$0x3] }
  0x86   :  { %323 = vst [vmem:[%s947_s1] sm:$0x3] %v320_v18  ;;  %v325_v19 = vld [vmem:[#allocation0 + $0x8] sm:$0x3] }
  0x87   :  { %572 = vst [vmem:[%s947_s1 + $0x2] sm:$0x3] %v325_v19  ;;  %v331_v20 = vld [vmem:[#allocation0 + $0x10] sm:$0x3] }
  0x88   :  { %573 = vst [vmem:[%s947_s1 + $0x4] sm:$0x3] %v331_v20  ;;  %v337_v21 = vld [vmem:[#allocation0 + $0x18] sm:$0x3]  ;;  %v286_v22 = vpop.permute.xlu1 %285  }
  0x89   :  { %574 = vst [vmem:[%s947_s1 + $0x6] sm:$0x3] %v337_v21  ;;  %v257_v24 = vpop.permute.xlu0 %256  }
  0x8a   :  { %231 = vst.msk [vmem:[#allocation0 + $0xa0] sm:$0x3] %vm85_vm4, %v228_v5  }
  0x8b   :  { %233 = vst.msk [vmem:[#allocation0 + $0xa6] sm:$0xc] %vm85_vm4, %v228_v5  }
  0x8c   :  { %235 = vst.msk [vmem:[#allocation0 + $0xac] sm:$0x30] %vm85_vm4, %v228_v5  }
  0x8d   :  { %237 = vst.msk [vmem:[#allocation0 + $0xb2] sm:$0xc0] %vm85_vm4, %v228_v5  }
  0x8e   :  { %173 = vst.msk [vmem:[#allocation0 + $0x60] sm:$0x3] %vm85_vm4, %v170_v11  }
  0x8f   :  { %175 = vst.msk [vmem:[#allocation0 + $0x66] sm:$0xc] %vm85_vm4, %v170_v11  }
  0x90   :  { %177 = vst.msk [vmem:[#allocation0 + $0x6c] sm:$0x30] %vm85_vm4, %v170_v11  }
  0x91   :  { %v439_v23 = vld [vmem:[#allocation0 + $0xa0] sm:$0x3]  ;;  %179 = vst.msk [vmem:[#allocation0 + $0x72] sm:$0xc0] %vm85_vm4, %v170_v11  }
  0x92   :  { %591 = vst [vmem:[%s947_s1 + $0x28] sm:$0x3] %v439_v23  ;;  %v445_v25 = vld [vmem:[#allocation0 + $0xa8] sm:$0x3] }
  0x93   :  { %592 = vst [vmem:[%s947_s1 + $0x2a] sm:$0x3] %v445_v25  ;;  %v451_v26 = vld [vmem:[#allocation0 + $0xb0] sm:$0x3] }
  0x94   :  { %593 = vst [vmem:[%s947_s1 + $0x2c] sm:$0x3] %v451_v26  ;;  %v457_v27 = vld [vmem:[#allocation0 + $0xb8] sm:$0x3] }
  0x95   :  { %594 = vst [vmem:[%s947_s1 + $0x2e] sm:$0x3] %v457_v27  ;;  %v391_v28 = vld [vmem:[#allocation0 + $0x60] sm:$0x3] }
  0x96   :  { %583 = vst [vmem:[%s947_s1 + $0x18] sm:$0x3] %v391_v28  ;;  %v397_v29 = vld [vmem:[#allocation0 + $0x68] sm:$0x3] }
  0x97   :  { %584 = vst [vmem:[%s947_s1 + $0x1a] sm:$0x3] %v397_v29  ;;  %v403_v30 = vld [vmem:[#allocation0 + $0x70] sm:$0x3] }
  0x98   :  { %585 = vst [vmem:[%s947_s1 + $0x1c] sm:$0x3] %v403_v30  ;;  %v409_v31 = vld [vmem:[#allocation0 + $0x78] sm:$0x3] }
  0x99   :  { %586 = vst [vmem:[%s947_s1 + $0x1e] sm:$0x3] %v409_v31 }
  0x9a   :  { %115 = vst.msk [vmem:[#allocation0 + $0x20] sm:$0x3] %vm85_vm4, %v112_v14  }
  0x9b   :  { %117 = vst.msk [vmem:[#allocation0 + $0x26] sm:$0xc] %vm85_vm4, %v112_v14  }
  0x9c   :  { %119 = vst.msk [vmem:[#allocation0 + $0x2c] sm:$0x30] %vm85_vm4, %v112_v14  }
  0x9d   :  { %121 = vst.msk [vmem:[#allocation0 + $0x32] sm:$0xc0] %vm85_vm4, %v112_v14  }
  0x9e   :  { %313 = vst.msk [vmem:[#allocation0 + $0x100] sm:$0x3] %vm85_vm4, %v310_v17  }
  0x9f   :  { %315 = vst.msk [vmem:[#allocation0 + $0x106] sm:$0xc] %vm85_vm4, %v310_v17  }
  0xa0   :  { %317 = vst.msk [vmem:[#allocation0 + $0x10c] sm:$0x30] %vm85_vm4, %v310_v17  }
  0xa1   :  { %v343_v34 = vld [vmem:[#allocation0 + $0x20] sm:$0x3]  ;;  %289 = vst.msk [vmem:[#allocation0 + $0xe0] sm:$0x3] %vm85_vm4, %v286_v22  }
  0xa2   :  { %575 = vst [vmem:[%s947_s1 + $0x8] sm:$0x3] %v343_v34  ;;  %v349_v35 = vld [vmem:[#allocation0 + $0x28] sm:$0x3] }
  0xa3   :  { %576 = vst [vmem:[%s947_s1 + $0xa] sm:$0x3] %v349_v35  ;;  %v355_v36 = vld [vmem:[#allocation0 + $0x30] sm:$0x3] }
  0xa4   :  { %577 = vst [vmem:[%s947_s1 + $0xc] sm:$0x3] %v355_v36  ;;  %v361_v37 = vld [vmem:[#allocation0 + $0x38] sm:$0x3] }
  0xa5   :  { %578 = vst [vmem:[%s947_s1 + $0xe] sm:$0x3] %v361_v37  ;;  %v511_v40 = vld [vmem:[#allocation0 + $0x100] sm:$0x3] }
  0xa6   :  { %603 = vst [vmem:[%s947_s1 + $0x40] sm:$0x3] %v511_v40  ;;  %v517_v41 = vld [vmem:[#allocation0 + $0x108] sm:$0x3] }
  0xa7   :  { %604 = vst [vmem:[%s947_s1 + $0x42] sm:$0x3] %v517_v41  ;;  %v523_v42 = vld [vmem:[#allocation0 + $0x110] sm:$0x3] }
  0xa8   :  { %291 = vst.msk [vmem:[#allocation0 + $0xe6] sm:$0xc] %vm85_vm4, %v286_v22   ;;  %v487_v43 = vld [vmem:[#allocation0 + $0xe0] sm:$0x3] }
  0xa9   :  { %293 = vst.msk [vmem:[#allocation0 + $0xec] sm:$0x30] %vm85_vm4, %v286_v22  }
  0xaa   :  { %605 = vst [vmem:[%s947_s1 + $0x44] sm:$0x3] %v523_v42 }
  0xab   :  { %295 = vst.msk [vmem:[#allocation0 + $0xf2] sm:$0xc0] %vm85_vm4, %v286_v22  }
  0xac   :  { %260 = vst.msk [vmem:[#allocation0 + $0xc0] sm:$0x3] %vm85_vm4, %v257_v24  }
  0xad   :  { %599 = vst [vmem:[%s947_s1 + $0x38] sm:$0x3] %v487_v43 }
  0xae   :  { %262 = vst.msk [vmem:[#allocation0 + $0xc6] sm:$0xc] %vm85_vm4, %v257_v24  }
  0xaf   :  { %v493_v44 = vld [vmem:[#allocation0 + $0xe8] sm:$0x3]  ;;  %264 = vst.msk [vmem:[#allocation0 + $0xcc] sm:$0x30] %vm85_vm4, %v257_v24  }
  0xb0   :  { %600 = vst [vmem:[%s947_s1 + $0x3a] sm:$0x3] %v493_v44  ;;  %v499_v45 = vld [vmem:[#allocation0 + $0xf0] sm:$0x3] }
  0xb1   :  { %601 = vst [vmem:[%s947_s1 + $0x3c] sm:$0x3] %v499_v45 }
  0xb2   :  { %v505_v46 = vld [vmem:[#allocation0 + $0xf8] sm:$0x3]  ;;  %266 = vst.msk [vmem:[#allocation0 + $0xd2] sm:$0xc0] %vm85_vm4, %v257_v24  }
  0xb3   :  { %602 = vst [vmem:[%s947_s1 + $0x3e] sm:$0x3] %v505_v46  ;;  %v463_v47 = vld [vmem:[#allocation0 + $0xc0] sm:$0x3] }
  0xb4   :  { %595 = vst [vmem:[%s947_s1 + $0x30] sm:$0x3] %v463_v47 }
  0xb5   :  { %v469_v48 = vld [vmem:[#allocation0 + $0xc8] sm:$0x3] }
  0xb6   :  { %596 = vst [vmem:[%s947_s1 + $0x32] sm:$0x3] %v469_v48  ;;  %v475_v49 = vld [vmem:[#allocation0 + $0xd0] sm:$0x3] }
  0xb7   :  { %597 = vst [vmem:[%s947_s1 + $0x34] sm:$0x3] %v475_v49 }
  0xb9   :  { %v481_v50 = vld [vmem:[#allocation0 + $0xd8] sm:$0x3] }
  0xba   :  { %598 = vst [vmem:[%s947_s1 + $0x36] sm:$0x3] %v481_v50 }

// kernel: squeeze.3
= control target key start
LH: loop header
LB: loop body
LE: loop exit
PB: predicated region body
PF: predicated region fallthrough
CT: control target
= control target key end

     0   :  { %vm45_vm0 = vcmask 1043458   ;;  %s97_s6 = smov 3  ;;  %vm50_vm1 = vcmask 1045508   ;;  %vm55_vm2 = vcmask 1047558   ;;  %s100_s9 = smov 12  ;;  %vm3_vm3 = vcmask 523264   ;;  %s483_s0 = inlined_call_operand.vmem [shape: f32[1,2,35,64], index: 0, kind: input, shape index: {}]   ;;  %s484_s1 = inlined_call_operand.vmem [shape: f32[2,2240], index: 1, kind: output, shape index: {}]  }
   0x1   :  { %v283_v0 = vld [vmem:[%s483_s0 + $0x11] ss:$40 sm:%s97_s6]   ;;  %s105_s10 = smov 48  ;;  %v284_v1 = vld [vmem:[%s483_s0 - $0x3d] ss:$40 sm:%s100_s9]   ;;  %s110_s15 = smov 192 }
   0x2   :  { %v285_v2 = vld [vmem:[%s483_s0 - $0x8b] ss:$40 sm:%s105_s10]   ;;  %s40_s16 = smov 3  ;;  %v103_v3 = vsel %vm45_vm0, %v284_v1, %v283_v0  ;;  %v286_v4 = vld [vmem:[%s483_s0 - $0xd9] ss:$40 sm:%s110_s15]   ;;  %s43_s21 = smov 12 }
   0x3   :  { %v275_v5 = vld [vmem:[%s483_s0 + $0x1] ss:$40 sm:%s40_s16]   ;;  %s48_s22 = smov 48  ;;  %v108_v6 = vsel %vm50_vm1, %v285_v2, %v103_v3  ;;  %v276_v7 = vld [vmem:[%s483_s0 - $0x4d] ss:$40 sm:%s43_s21]   ;;  %s53_s27 = smov 192 }
   0x4   :  { %v277_v8 = vld [vmem:[%s483_s0 - $0x9b] ss:$40 sm:%s48_s22]   ;;  %s126_s28 = smov 3  ;;  %v113_v9 = vsel %vm55_vm2, %v286_v4, %v108_v6  ;;  %v46_v10 = vsel %vm45_vm0, %v276_v7, %v275_v5  ;;  %v278_v11 = vld [vmem:[%s483_s0 - $0xe9] ss:$40 sm:%s53_s27]   ;;  %s129_s4 = smov 12 }
   0x5   :  { %v287_v12 = vld [vmem:[%s483_s0 + $0x19] ss:$40 sm:%s126_s28]   ;;  %s134_s5 = smov 48  ;;  %s310_s6 = smov 64   ;;  %v51_v13 = vsel %vm50_vm1, %v277_v8, %v46_v10  ;;  %v288_v14 = vld [vmem:[%s483_s0 - $0x35] ss:$40 sm:%s129_s4]  }
   0x6   :  { %114 = vrot.lane.b32.xlu1 %v113_v9, %s310_s6  ;;  %s139_s9 = smov 192  ;;  %s68_s10 = smov 3  ;;  %v56_v15 = vsel %vm55_vm2, %v278_v11, %v51_v13  ;;  %v132_v16 = vsel %vm45_vm0, %v288_v14, %v287_v12  ;;  %v289_v17 = vld [vmem:[%s483_s0 - $0x83] ss:$40 sm:%s134_s5]   ;;  %v270_v29 = vld [vmem:[%s483_s0 + $0x10] ss:$2 sm:$0xff]  }
   0x7   :  { %v290_v18 = vld [vmem:[%s483_s0 - $0xd1] ss:$40 sm:%s139_s9]   ;;  %s71_s15 = smov 12  ;;  %s76_s16 = smov 48  ;;  %57 = vrot.lane.b32.xlu0 %v56_v15, %s310_s6  ;;  %v137_v19 = vsel %vm50_vm1, %v289_v17, %v132_v16  ;;  %v273_v30 = vld [vmem:[%s483_s0 + $0x38] ss:$2 sm:$0xff]  }
   0x8   :  { %v279_v20 = vld [vmem:[%s483_s0 + $0x9] ss:$40 sm:%s68_s10]   ;;  %s81_s19 = smov 192  ;;  %s155_s20 = smov 3  ;;  %v280_v21 = vld [vmem:[%s483_s0 - $0x45] ss:$40 sm:%s71_s15]   ;;  %v142_v26 = vsel %vm55_vm2, %v290_v18, %v137_v19 }
   0x9   :  { %v281_v22 = vld [vmem:[%s483_s0 - $0x93] ss:$40 sm:%s76_s16]   ;;  %v74_v23 = vsel %vm45_vm0, %v280_v21, %v279_v20  ;;  %v282_v24 = vld [vmem:[%s483_s0 - $0xe1] ss:$40 sm:%s81_s19]   ;;  %s14_s8 = smov 3  ;;  %s34_s9 = smov 3 }
   0xa   :  { %v291_v25 = vld [vmem:[%s483_s0 + $0x21] ss:$40 sm:%s155_s20]   ;;  %v79_v27 = vsel %vm50_vm1, %v281_v22, %v74_v23  ;;  %10 = vst.msk [vmem:[#allocation0 + $0x40] ss:$8 sm:$0xf] %vm3_vm3, %v270_v29   ;;  %vm59_vm4 = vcmask 1048064  }
   0xb   :  { %157 = vrot.lane.b32.xlu2 %v291_v25, %s310_s6  ;;  %v84_v28 = vsel %vm55_vm2, %v282_v24, %v79_v27  ;;  %30 = vst.msk [vmem:[#allocation0 + $0x41] ss:$8 sm:$0xf] %vm3_vm3, %v273_v30   ;;  %v2_v31 = vld [vmem:[%s483_s0] ss:$2 sm:$0xff]  }
   0xc   :  { %12 = vst.msk [vmem:[#allocation0 + $0x40] ss:$8 sm:$0xf0] %vm3_vm3, %v270_v29   ;;  %v272_v32 = vld [vmem:[%s483_s0 + $0x28] ss:$2 sm:$0xff]  }
   0xd   :  { %32 = vst.msk [vmem:[#allocation0 + $0x41] ss:$8 sm:$0xf0] %vm3_vm3, %v273_v30   ;;  %v271_v33 = vld [vmem:[%s483_s0 + $0x20] ss:$2 sm:%s14_s8]  }
   0xe   :  { %143 = vrot.lane.b32.xlu1 %v142_v26, %s310_s6  ;;  %4 = vst.msk [vmem:[#allocation0] ss:$8 sm:$0xf] %vm3_vm3, %v2_v31   ;;  %v274_v34 = vld [vmem:[%s483_s0 + $0x48] ss:$2 sm:%s34_s9]  }
   0xf   :  { %85 = vrot.lane.b32.xlu0 %v84_v28, %s310_s6  ;;  %23 = vst.msk [vmem:[#allocation0 + $0x1] ss:$8 sm:$0xf] %vm3_vm3, %v272_v32  }
  0x10   :  { %5 = vst.msk [vmem:[#allocation0] ss:$8 sm:$0xf0] %vm3_vm3, %v2_v31  }
  0x11   :  { %25 = vst.msk [vmem:[#allocation0 + $0x1] ss:$8 sm:$0xf0] %vm3_vm3, %v272_v32  }
  0x12   :  { %18 = vst.msk [vmem:[#allocation0 + $0x80] ss:$8 sm:$0x3] %vm3_vm3, %v271_v33  }
  0x13   :  { %38 = vst.msk [vmem:[#allocation0 + $0x81] ss:$8 sm:$0x3] %vm3_vm3, %v274_v34  }
  0x1a   :  { %v265_v36 = vld [vmem:[#allocation0 + $0x88] sm:$0x3] }
  0x1b   :  { %308 = vst [vmem:[%s484_s1 + $0x22] sm:$0x3] %v265_v36 }
  0x65   :  { %v158_v35 = vpop.permute.xlu2 %157  }
  0x66   :  { %161 = vst.msk [vmem:[#allocation0 + $0x80] sm:$0x3] %vm59_vm4, %v158_v35  }
  0x6d   :  { %v259_v37 = vld [vmem:[#allocation0 + $0x80] sm:$0x3] }
  0x6e   :  { %307 = vst [vmem:[%s484_s1 + $0x20] sm:$0x3] %v259_v37 }
  0x78   :  { %v115_v38 = vpop.permute.xlu1 %114  }
  0x79   :  { %118 = vst.msk [vmem:[#allocation0 + $0x40] sm:$0x3] %vm59_vm4, %v115_v38   ;;  %v58_v39 = vpop.permute.xlu0 %57  }
  0x7a   :  { %120 = vst.msk [vmem:[#allocation0 + $0x46] sm:$0xc] %vm59_vm4, %v115_v38  }
  0x7b   :  { %122 = vst.msk [vmem:[#allocation0 + $0x4c] sm:$0x30] %vm59_vm4, %v115_v38  }
  0x7c   :  { %124 = vst.msk [vmem:[#allocation0 + $0x52] sm:$0xc0] %vm59_vm4, %v115_v38  }
  0x7d   :  { %60 = vst.msk [vmem:[#allocation0] sm:$0x3] %vm59_vm4, %v58_v39  }
  0x7e   :  { %62 = vst.msk [vmem:[#allocation0 + $0x6] sm:$0xc] %vm59_vm4, %v58_v39  }
  0x7f   :  { %64 = vst.msk [vmem:[#allocation0 + $0xc] sm:$0x30] %vm59_vm4, %v58_v39  }
  0x80   :  { %v211_v40 = vld [vmem:[#allocation0 + $0x40] sm:$0x3]  ;;  %66 = vst.msk [vmem:[#allocation0 + $0x12] sm:$0xc0] %vm59_vm4, %v58_v39   ;;  %v144_v41 = vpop.permute.xlu1 %143  }
  0x81   :  { %299 = vst [vmem:[%s484_s1 + $0x10] sm:$0x3] %v211_v40  ;;  %v217_v42 = vld [vmem:[#allocation0 + $0x48] sm:$0x3]  ;;  %v86_v44 = vpop.permute.xlu0 %85  }
  0x82   :  { %300 = vst [vmem:[%s484_s1 + $0x12] sm:$0x3] %v217_v42  ;;  %v223_v43 = vld [vmem:[#allocation0 + $0x50] sm:$0x3] }
  0x83   :  { %301 = vst [vmem:[%s484_s1 + $0x14] sm:$0x3] %v223_v43  ;;  %v229_v45 = vld [vmem:[#allocation0 + $0x58] sm:$0x3] }
  0x84   :  { %302 = vst [vmem:[%s484_s1 + $0x16] sm:$0x3] %v229_v45  ;;  %v164_v46 = vld [vmem:[#allocation0] sm:$0x3] }
  0x85   :  { %167 = vst [vmem:[%s484_s1] sm:$0x3] %v164_v46  ;;  %v169_v47 = vld [vmem:[#allocation0 + $0x8] sm:$0x3] }
  0x86   :  { %292 = vst [vmem:[%s484_s1 + $0x2] sm:$0x3] %v169_v47  ;;  %v175_v48 = vld [vmem:[#allocation0 + $0x10] sm:$0x3] }
  0x87   :  { %293 = vst [vmem:[%s484_s1 + $0x4] sm:$0x3] %v175_v48  ;;  %v181_v49 = vld [vmem:[#allocation0 + $0x18] sm:$0x3] }
  0x88   :  { %294 = vst [vmem:[%s484_s1 + $0x6] sm:$0x3] %v181_v49 }
  0x89   :  { %147 = vst.msk [vmem:[#allocation0 + $0x60] sm:$0x3] %vm59_vm4, %v144_v41  }
  0x8a   :  { %149 = vst.msk [vmem:[#allocation0 + $0x66] sm:$0xc] %vm59_vm4, %v144_v41  }
  0x8b   :  { %151 = vst.msk [vmem:[#allocation0 + $0x6c] sm:$0x30] %vm59_vm4, %v144_v41  }
  0x8c   :  { %153 = vst.msk [vmem:[#allocation0 + $0x72] sm:$0xc0] %vm59_vm4, %v144_v41  }
  0x8d   :  { %89 = vst.msk [vmem:[#allocation0 + $0x20] sm:$0x3] %vm59_vm4, %v86_v44  }
  0x8e   :  { %91 = vst.msk [vmem:[#allocation0 + $0x26] sm:$0xc] %vm59_vm4, %v86_v44  }
  0x8f   :  { %93 = vst.msk [vmem:[#allocation0 + $0x2c] sm:$0x30] %vm59_vm4, %v86_v44  }
  0x90   :  { %v235_v50 = vld [vmem:[#allocation0 + $0x60] sm:$0x3]  ;;  %95 = vst.msk [vmem:[#allocation0 + $0x32] sm:$0xc0] %vm59_vm4, %v86_v44  }
  0x91   :  { %303 = vst [vmem:[%s484_s1 + $0x18] sm:$0x3] %v235_v50  ;;  %v241_v51 = vld [vmem:[#allocation0 + $0x68] sm:$0x3] }
  0x92   :  { %304 = vst [vmem:[%s484_s1 + $0x1a] sm:$0x3] %v241_v51  ;;  %v247_v52 = vld [vmem:[#allocation0 + $0x70] sm:$0x3] }
  0x93   :  { %305 = vst [vmem:[%s484_s1 + $0x1c] sm:$0x3] %v247_v52  ;;  %v253_v53 = vld [vmem:[#allocation0 + $0x78] sm:$0x3] }
  0x94   :  { %306 = vst [vmem:[%s484_s1 + $0x1e] sm:$0x3] %v253_v53  ;;  %v187_v54 = vld [vmem:[#allocation0 + $0x20] sm:$0x3] }
  0x95   :  { %295 = vst [vmem:[%s484_s1 + $0x8] sm:$0x3] %v187_v54  ;;  %v193_v55 = vld [vmem:[#allocation0 + $0x28] sm:$0x3] }
  0x96   :  { %296 = vst [vmem:[%s484_s1 + $0xa] sm:$0x3] %v193_v55  ;;  %v199_v56 = vld [vmem:[#allocation0 + $0x30] sm:$0x3] }
  0x97   :  { %297 = vst [vmem:[%s484_s1 + $0xc] sm:$0x3] %v199_v56  ;;  %v205_v57 = vld [vmem:[#allocation0 + $0x38] sm:$0x3] }
  0x98   :  { %298 = vst [vmem:[%s484_s1 + $0xe] sm:$0x3] %v205_v57 }

// kernel: bilstm_short_forward.2
= control target key start
LH: loop header
LB: loop body
LE: loop exit
PB: predicated region body
PF: predicated region fallthrough
CT: control target
= control target key end

     0   :  { %s1996_s18 = smov 0   ;;  %s2761_s0 = inlined_call_operand.vmem [shape: f32[2,2,70,16], index: 0, kind: input, shape index: {}]   ;;  %s2762_s1 = inlined_call_operand.vmem [shape: f32[2,16,256], index: 1, kind: input, shape index: {}]   ;;  %s2763_s2 = inlined_call_operand.vmem [shape: f32[2,16,256], index: 2, kind: input, shape index: {}]   ;;  %s2764_s3 = inlined_call_operand.vmem [shape: f32[2,64,256], index: 3, kind: input, shape index: {}]   ;;  %s2765_s4 = inlined_call_operand.vmem [shape: f32[2,1,256], index: 4, kind: input, shape index: {}]   ;;  %s2766_s5 = inlined_call_operand.vmem [shape: f32[2,2,70,64], index: 5, kind: output, shape index: {}]  }
   0x1 LB: > { %s1602_s19 = sadd.s32 4294967295, %s1962_s18   ;;  %p1606_p0 = scmp.ge.s32.totalorder %s1962_s18, 1  ;;  %s1962_s18 = sphi %s1996_s18, %s15_s18  }
   0x2   : > { %p226_p1 = scmp.lt.s32.totalorder %s1962_s18, 3 }
   0x4   : > { %p227_p2 = pnand %p1606_p0, %p226_p1 }
   0x6   : > { %230 = sbr.rel (%p227_p2) target bundleno = 1018 (0x3fa), region = 40 }
   0xb   : > { %p273_p3 = scmp.lt.s32.totalorder %s1602_s19, 1  ;;  %vm330_vm0 = vcmask 130048   ;;  %v1964_v48 = vmov 0.0   ;;  %s1965_s14 = smov 64   ;;  %vm794_vm1 = vcmask 523264   ;;  %vm1460_vm2 = vcmask 261120  }
   0xc   : > { %vm1478_vm3 = vcmask 521216  }
   0xd   : > { %s2792_s19 = smov (!%p273_p3, %s1602_s19), 1 }
   0xe   : > { %s1729_s20 = smul.u32 144, %s2792_s19  ;;  %s1726_s21 = sshll.u32 %s2792_s19, 5 }
   0xf   : > { %s287_s24 = scalar_lea.vmem %s2763_s2, %s1726_s21  ;;  %s2024_s30 = scalar_lea.vmem %s2762_s1, %s1726_s21 }
  0x10   : > { %s2016_s27 = scalar_lea.vmem %s2761_s0, %s1729_s20  ;;  %v328_v0 = vld [vmem:[%s287_s24 + $0x10] sm:$0xff]  ;;  %v329_v1 = vld [vmem:[%s287_s24 + $0x18] sm:$0xff]  ;;  %v326_v2 = vld [vmem:[%s287_s24] sm:$0xff]  ;;  %s1728_s6 = sshll.u32 %s2792_s19, 7 }
  0x11   : > { %372 = vmatpush.msra.mxu0 %v328_v0  ;;  %416 = vmatpush.msra.mxu1 %v329_v1  ;;  %v327_v3 = vld [vmem:[%s287_s24 + $0x8] sm:$0xff]  ;;  %v2019_v4 = vld [vmem:[%s2016_s27] sm:$0xff]  ;;  %v314_v6 = vld [vmem:[%s2024_s30 + $0x10] sm:$0xff]  ;;  %s2104_s9 = scalar_lea.vmem %s2764_s3, %s1728_s6  ;;  %s1614_s10 = sshll.u32 %s2792_s19, 1 }
  0x12   : > { %487 = vmatpush.msra.mxu2 %v328_v0  ;;  %531 = vmatpush.msra.mxu3 %v329_v1  ;;  %v2027_v5 = vld [vmem:[%s2016_s27 + $0x48] sm:$0xff]  ;;  %v315_v7 = vld [vmem:[%s2024_s30 + $0x18] sm:$0xff]  ;;  %v312_v8 = vld [vmem:[%s2024_s30] sm:$0xff]  ;;  %s296_s13 = scalar_lea.vmem %s2765_s4, %s1614_s10  ;;  %s2685_s17 = scalar_lea.vmem %s2766_s5, %s1729_s20 }
  0x13   : > { %373 = vmatpush.msra.mxu0 %v326_v2  ;;  %417 = vmatpush.msra.mxu1 %v327_v3  ;;  %v2041_v9 = vld [vmem:[%s2016_s27 + $0x8] sm:$0xff]  ;;  %v2044_v10 = vld [vmem:[%s2016_s27 + $0x50] sm:$0xff]  ;;  %v2058_v12 = vld [vmem:[%s2016_s27 + $0x58] sm:$0xff] }
  0x14   : > { %488 = vmatpush.msra.mxu2 %v326_v2  ;;  %532 = vmatpush.msra.mxu3 %v327_v3  ;;  %v2055_v11 = vld [vmem:[%s2016_s27 + $0x10] sm:$0xff]  ;;  %v313_v13 = vld [vmem:[%s2024_s30 + $0x8] sm:$0xff]  ;;  %v2070_v14 = vld [vmem:[%s2016_s27 + $0x18] sm:$0xff] }
  0x15   : > { %1625 = vmatmul.msk.f32.vlgmr.msra.gmra.mxu0 %vm330_vm0, %v2019_v4  ;;  %1634 = vmatmul.msk.f32.vlgmr.msra.gmra.mxu1 %vm330_vm0, %v2019_v4  ;;  %v2073_v15 = vld [vmem:[%s2016_s27 + $0x60] sm:$0xff]  ;;  %v2087_v17 = vld [vmem:[%s2016_s27 + $0x68] sm:$0xff]  ;;  %v2107_v19 = vld [vmem:[%s2016_s27 + $0x70] sm:$0xff] }
  0x16   : > { %1643 = vmatmul.msk.f32.vlgmr.msra.gmra.mxu2 %vm330_vm0, %v2027_v5  ;;  %1652 = vmatmul.msk.f32.vlgmr.msra.gmra.mxu3 %vm330_vm0, %v2027_v5  ;;  %v2084_v16 = vld [vmem:[%s2016_s27 + $0x20] sm:$0xff]  ;;  %v2099_v18 = vld [vmem:[%s2016_s27 + $0x28] sm:$0xff]  ;;  %v792_v20 = vld [vmem:[%s2104_s9 + $0x70] sm:$0xff] }
  0x17   : > { %575 = vmatpush.msrb.mxu0 %v314_v6  ;;  %619 = vmatpush.msrb.mxu1 %v315_v7  ;;  %v2119_v21 = vld [vmem:[%s2016_s27 + $0x30] sm:$0xff]  ;;  %v2122_v22 = vld [vmem:[%s2016_s27 + $0x78] sm:$0xff]  ;;  %v790_v23 = vld [vmem:[%s2104_s9 + $0x60] sm:$0xff] }
  0x18   : > { %686 = vmatpush.msrb.mxu2 %v314_v6  ;;  %730 = vmatpush.msrb.mxu3 %v315_v7  ;;  %v793_v24 = vld [vmem:[%s2104_s9 + $0x78] sm:$0xff]  ;;  %v2138_v26 = vld [vmem:[%s2016_s27 + $0x80] sm:$0xff]  ;;  %v788_v27 = vld [vmem:[%s2104_s9 + $0x50] sm:$0xff] }
  0x19   : > { %576 = vmatpush.msrb.mxu0 %v312_v8  ;;  %620 = vmatpush.msrb.mxu1 %v313_v13  ;;  %v2135_v25 = vld [vmem:[%s2016_s27 + $0x38] sm:$0xff]  ;;  %v791_v28 = vld [vmem:[%s2104_s9 + $0x68] sm:$0xff]  ;;  %v2151_v29 = vld [vmem:[%s2016_s27 + $0x40] sm:$0x3f] }
  0x1a   : > { %687 = vmatpush.msrb.mxu2 %v312_v8  ;;  %731 = vmatpush.msrb.mxu3 %v313_v13  ;;  %v2154_v30 = vld [vmem:[%s2016_s27 + $0x88] sm:$0x3f]  ;;  %v786_v31 = vld [vmem:[%s2104_s9 + $0x40] sm:$0xff]  ;;  %v789_v32 = vld [vmem:[%s2104_s9 + $0x58] sm:$0xff] }
  0x1b   : > { %806 = vmatpush.msra.mxu0 %v792_v20  ;;  %850 = vmatpush.msra.mxu1 %v793_v24  ;;  %v784_v33 = vld [vmem:[%s2104_s9 + $0x30] sm:$0xff]  ;;  %v787_v34 = vld [vmem:[%s2104_s9 + $0x48] sm:$0xff]  ;;  %v782_v35 = vld [vmem:[%s2104_s9 + $0x20] sm:$0xff] }
  0x1c   : > { %1137 = vmatpush.msra.mxu2 %v792_v20  ;;  %1181 = vmatpush.msra.mxu3 %v793_v24  ;;  %v785_v36 = vld [vmem:[%s2104_s9 + $0x38] sm:$0xff]  ;;  %v780_v37 = vld [vmem:[%s2104_s9 + $0x10] sm:$0xff]  ;;  %v783_v38 = vld [vmem:[%s2104_s9 + $0x28] sm:$0xff] }
  0x1d   : > { %1626 = vmatmul.msk.f32.gmra.mxu0 %vm330_vm0, %v2041_v9  ;;  %1635 = vmatmul.msk.f32.gmra.mxu1 %vm330_vm0, %v2041_v9  ;;  %v778_v39 = vld [vmem:[%s2104_s9] sm:$0xff]  ;;  %v781_v40 = vld [vmem:[%s2104_s9 + $0x18] sm:$0xff]  ;;  %v779_v41 = vld [vmem:[%s2104_s9 + $0x8] sm:$0xff] }
  0x1e   : > { %1644 = vmatmul.msk.f32.gmra.mxu2 %vm330_vm0, %v2044_v10  ;;  %1653 = vmatmul.msk.f32.gmra.mxu3 %vm330_vm0, %v2044_v10 }
  0x1f   : > { %807 = vmatpush.msra.mxu0 %v790_v23  ;;  %1138 = vmatpush.msra.mxu2 %v790_v23 }
  0x20   : > { %851 = vmatpush.msra.mxu1 %v791_v28  ;;  %1182 = vmatpush.msra.mxu3 %v791_v28 }
  0x21   : > { %808 = vmatpush.msra.mxu0 %v788_v27  ;;  %1139 = vmatpush.msra.mxu2 %v788_v27 }
  0x22   : > { %852 = vmatpush.msra.mxu1 %v789_v32  ;;  %1183 = vmatpush.msra.mxu3 %v789_v32 }
  0x23   : > { %809 = vmatpush.msra.mxu0 %v786_v31  ;;  %1140 = vmatpush.msra.mxu2 %v786_v31 }
  0x24   : > { %853 = vmatpush.msra.mxu1 %v787_v34  ;;  %1184 = vmatpush.msra.mxu3 %v787_v34 }
  0x25   : > { %1627 = vmatmul.msk.f32.gmra.mxu0 %vm330_vm0, %v2055_v11  ;;  %1636 = vmatmul.msk.f32.gmra.mxu1 %vm330_vm0, %v2055_v11 }
  0x26   : > { %1645 = vmatmul.msk.f32.gmra.mxu2 %vm330_vm0, %v2058_v12  ;;  %1654 = vmatmul.msk.f32.gmra.mxu3 %vm330_vm0, %v2058_v12 }
  0x27   : > { %810 = vmatpush.msra.mxu0 %v784_v33  ;;  %1141 = vmatpush.msra.mxu2 %v784_v33 }
  0x28   : > { %854 = vmatpush.msra.mxu1 %v785_v36  ;;  %1185 = vmatpush.msra.mxu3 %v785_v36 }
  0x29   : > { %811 = vmatpush.msra.mxu0 %v782_v35  ;;  %1142 = vmatpush.msra.mxu2 %v782_v35 }
  0x2a   : > { %855 = vmatpush.msra.mxu1 %v783_v38  ;;  %1186 = vmatpush.msra.mxu3 %v783_v38 }
  0x2b   : > { %812 = vmatpush.msra.mxu0 %v780_v37  ;;  %1143 = vmatpush.msra.mxu2 %v780_v37 }
  0x2c   : > { %856 = vmatpush.msra.mxu1 %v781_v40  ;;  %1187 = vmatpush.msra.mxu3 %v781_v40 }
  0x2d   : > { %1628 = vmatmul.msk.f32.gmra.mxu0 %vm330_vm0, %v2070_v14  ;;  %1637 = vmatmul.msk.f32.gmra.mxu1 %vm330_vm0, %v2070_v14 }
  0x2e   : > { %1646 = vmatmul.msk.f32.gmra.mxu2 %vm330_vm0, %v2073_v15  ;;  %1655 = vmatmul.msk.f32.gmra.mxu3 %vm330_vm0, %v2073_v15 }
  0x2f   : > { %813 = vmatpush.msra.mxu0 %v778_v39  ;;  %1144 = vmatpush.msra.mxu2 %v778_v39 }
  0x30   : > { %857 = vmatpush.msra.mxu1 %v779_v41  ;;  %1188 = vmatpush.msra.mxu3 %v779_v41 }
  0x35   : > { %1629 = vmatmul.msk.f32.gmra.mxu0 %vm330_vm0, %v2084_v16  ;;  %1638 = vmatmul.msk.f32.gmra.mxu1 %vm330_vm0, %v2084_v16 }
  0x36   : > { %1647 = vmatmul.msk.f32.gmra.mxu2 %vm330_vm0, %v2087_v17  ;;  %1656 = vmatmul.msk.f32.gmra.mxu3 %vm330_vm0, %v2087_v17 }
  0x3d   : > { %1630 = vmatmul.msk.f32.gmra.mxu0 %vm330_vm0, %v2099_v18  ;;  %1639 = vmatmul.msk.f32.gmra.mxu1 %vm330_vm0, %v2099_v18 }
  0x3e   : > { %1648 = vmatmul.msk.f32.gmra.mxu2 %vm330_vm0, %v2107_v19  ;;  %1657 = vmatmul.msk.f32.gmra.mxu3 %vm330_vm0, %v2107_v19 }
  0x45   : > { %1631 = vmatmul.msk.f32.gmra.mxu0 %vm330_vm0, %v2119_v21  ;;  %1640 = vmatmul.msk.f32.gmra.mxu1 %vm330_vm0, %v2119_v21 }
  0x46   : > { %1649 = vmatmul.msk.f32.gmra.mxu2 %vm330_vm0, %v2122_v22  ;;  %1658 = vmatmul.msk.f32.gmra.mxu3 %vm330_vm0, %v2122_v22 }
  0x4d   : > { %1632 = vmatmul.msk.f32.gmra.mxu0 %vm330_vm0, %v2135_v25  ;;  %1641 = vmatmul.msk.f32.gmra.mxu1 %vm330_vm0, %v2135_v25 }
  0x4e   : > { %1650 = vmatmul.msk.f32.gmra.mxu2 %vm330_vm0, %v2138_v26  ;;  %1659 = vmatmul.msk.f32.gmra.mxu3 %vm330_vm0, %v2138_v26 }
  0x55   : > { %1633 = vmatmul.msk.f32.gmra.mxu0 %vm330_vm0, %v2151_v29  ;;  %1642 = vmatmul.msk.f32.gmra.mxu1 %vm330_vm0, %v2151_v29 }
  0x56   : > { %1651 = vmatmul.msk.f32.gmra.mxu2 %vm330_vm0, %v2154_v30  ;;  %1660 = vmatmul.msk.f32.gmra.mxu3 %vm330_vm0, %v2154_v30 }
  0x5d   : > { %1661 = vmatmul.msk.f32.vlgmr.msrb.gmra.mxu0 %vm330_vm0, %v2019_v4  ;;  %1670 = vmatmul.msk.f32.vlgmr.msrb.gmra.mxu1 %vm330_vm0, %v2019_v4 }
  0x5e   : > { %1679 = vmatmul.msk.f32.vlgmr.msrb.gmra.mxu2 %vm330_vm0, %v2027_v5  ;;  %1688 = vmatmul.msk.f32.vlgmr.msrb.gmra.mxu3 %vm330_vm0, %v2027_v5 }
  0x65   : > { %1662 = vmatmul.msk.f32.gmra.mxu0 %vm330_vm0, %v2041_v9  ;;  %1671 = vmatmul.msk.f32.gmra.mxu1 %vm330_vm0, %v2041_v9 }
  0x66   : > { %1680 = vmatmul.msk.f32.gmra.mxu2 %vm330_vm0, %v2044_v10  ;;  %1689 = vmatmul.msk.f32.gmra.mxu3 %vm330_vm0, %v2044_v10 }
  0x6d   : > { %1663 = vmatmul.msk.f32.gmra.mxu0 %vm330_vm0, %v2055_v11  ;;  %1672 = vmatmul.msk.f32.gmra.mxu1 %vm330_vm0, %v2055_v11 }
  0x6e   : > { %1681 = vmatmul.msk.f32.gmra.mxu2 %vm330_vm0, %v2058_v12  ;;  %1690 = vmatmul.msk.f32.gmra.mxu3 %vm330_vm0, %v2058_v12 }
  0x75   : > { %1664 = vmatmul.msk.f32.gmra.mxu0 %vm330_vm0, %v2070_v14  ;;  %1673 = vmatmul.msk.f32.gmra.mxu1 %vm330_vm0, %v2070_v14 }
  0x76   : > { %1682 = vmatmul.msk.f32.gmra.mxu2 %vm330_vm0, %v2073_v15  ;;  %1691 = vmatmul.msk.f32.gmra.mxu3 %vm330_vm0, %v2073_v15 }
  0x7d   : > { %1665 = vmatmul.msk.f32.gmra.mxu0 %vm330_vm0, %v2084_v16  ;;  %1674 = vmatmul.msk.f32.gmra.mxu1 %vm330_vm0, %v2084_v16  ;;  %v302_v16 = vld [vmem:[%s296_s13] sm:$0x3] }
  0x7e   : > { %1683 = vmatmul.msk.f32.gmra.mxu2 %vm330_vm0, %v2087_v17  ;;  %1692 = vmatmul.msk.f32.gmra.mxu3 %vm330_vm0, %v2087_v17  ;;  %v2312_v31 = vperm.slane %v302_v16, 1 }
  0x85   : > { %1666 = vmatmul.msk.f32.gmra.mxu0 %vm330_vm0, %v2099_v18  ;;  %1675 = vmatmul.msk.f32.gmra.mxu1 %vm330_vm0, %v2099_v18 }
  0x86   : > { %1684 = vmatmul.msk.f32.gmra.mxu2 %vm330_vm0, %v2107_v19  ;;  %1693 = vmatmul.msk.f32.gmra.mxu3 %vm330_vm0, %v2107_v19  ;;  %v2309_v19 = vperm.slane %v302_v16, 0 }
  0x8d   : > { %1667 = vmatmul.msk.f32.gmra.mxu0 %vm330_vm0, %v2119_v21  ;;  %1676 = vmatmul.msk.f32.gmra.mxu1 %vm330_vm0, %v2119_v21 }
  0x8e   : > { %1685 = vmatmul.msk.f32.gmra.mxu2 %vm330_vm0, %v2122_v22  ;;  %1694 = vmatmul.msk.f32.gmra.mxu3 %vm330_vm0, %v2122_v22 }
  0x92   : > { %v2231_v42 = vpop.f32.mrf.mxu0  ;;  %v2233_v43 = vpop.f32.mrf.mxu1 }
  0x95   : > { %1668 = vmatmul.msk.f32.gmra.mxu0 %vm330_vm0, %v2135_v25  ;;  %1677 = vmatmul.msk.f32.gmra.mxu1 %vm330_vm0, %v2135_v25 }
  0x96   : > { %1686 = vmatmul.msk.f32.gmra.mxu2 %vm330_vm0, %v2138_v26  ;;  %1695 = vmatmul.msk.f32.gmra.mxu3 %vm330_vm0, %v2138_v26 }
  0x99   : > { %v490_v11 = vpop.f32.mrf.mxu2  ;;  %v534_v14 = vpop.f32.mrf.mxu3 }
  0x9a   : > { %v2243_v44 = vpop.f32.mrf.mxu0  ;;  %v2245_v45 = vpop.f32.mrf.mxu1 }
  0x9d   : > { %1669 = vmatmul.msk.f32.gmra.mxu0 %vm330_vm0, %v2151_v29  ;;  %1678 = vmatmul.msk.f32.gmra.mxu1 %vm330_vm0, %v2151_v29 }
  0x9e   : > { %1687 = vmatmul.msk.f32.gmra.mxu2 %vm330_vm0, %v2154_v30  ;;  %1696 = vmatmul.msk.f32.gmra.mxu3 %vm330_vm0, %v2154_v30 }
  0xa1   : > { %v493_v15 = vpop.f32.mrf.mxu2  ;;  %v537_v21 = vpop.f32.mrf.mxu3 }
  0xa2   : > { %v2255_v46 = vpop.f32.mrf.mxu0  ;;  %v2257_v47 = vpop.f32.mrf.mxu1 }
  0xa5   : > { %814 = vmatmul.f32.vlgmr.msra.gmra.mxu0 %v1964_v48  ;;  %858 = vmatmul.f32.vlgmr.msra.gmra.mxu1 %v1964_v48 }
  0xa9   : > { %v496_v22 = vpop.f32.mrf.mxu2  ;;  %v540_v32 = vpop.f32.mrf.mxu3 }
  0xaa   : > { %v2259_v49 = vpop.f32.mrf.mxu0  ;;  %v2261_v50 = vpop.f32.mrf.mxu1 }
  0xad   : > { %817 = vmatmul.f32.gmra.mxu0 %v1964_v48  ;;  %861 = vmatmul.f32.gmra.mxu1 %v1964_v48 }
  0xb1   : > { %v499_v33 = vpop.f32.mrf.mxu2 }
  0xb2   : > { %v2263_v51 = vpop.f32.mrf.mxu0  ;;  %v2265_v52 = vpop.f32.mrf.mxu1 }
  0xb5   : > { %820 = vmatmul.f32.gmra.mxu0 %v1964_v48  ;;  %864 = vmatmul.f32.gmra.mxu1 %v1964_v48 }
  0xba   : > { %v2267_v53 = vpop.f32.mrf.mxu0  ;;  %v2269_v54 = vpop.f32.mrf.mxu1 }
  0xbd   : > { %823 = vmatmul.f32.gmra.mxu0 %v1964_v48  ;;  %867 = vmatmul.f32.gmra.mxu1 %v1964_v48 }
  0xc2   : > { %v2271_v55 = vpop.f32.mrf.mxu0  ;;  %v2273_v56 = vpop.f32.mrf.mxu1 }
  0xc5   : > { %826 = vmatmul.f32.gmra.mxu0 %v1964_v48  ;;  %870 = vmatmul.f32.gmra.mxu1 %v1964_v48 }
  0xca   : > { %v2275_v57 = vpop.f32.mrf.mxu0  ;;  %v2277_v58 = vpop.f32.mrf.mxu1 }
  0xcd   : > { %829 = vmatmul.f32.gmra.mxu0 %v1964_v48  ;;  %873 = vmatmul.f32.gmra.mxu1 %v1964_v48 }
  0xd2   : > { %v2279_v59 = vpop.f32.mrf.mxu0  ;;  %v2281_v60 = vpop.f32.mrf.mxu1 }
  0xd5   : > { %832 = vmatmul.f32.gmra.mxu0 %v1964_v48  ;;  %876 = vmatmul.f32.gmra.mxu1 %v1964_v48 }
  0xda   : > { %v578_v61 = vpop.f32.mrf.mxu0  ;;  %v622_v62 = vpop.f32.mrf.mxu1 }
  0xdb   : > { %v579_v20 = vadd.f32 %v578_v61, %v490_v11  ;;  %v623_v29 = vadd.f32 %v622_v62, %v534_v14 }
  0xdd   : > { %835 = vmatmul.f32.gmra.mxu0 %v1964_v48  ;;  %879 = vmatmul.f32.gmra.mxu1 %v1964_v48  ;;  %v654_v23 = vadd.f32 %v2309_v19, %v579_v20  ;;  %v655_v35 = vadd.f32 %v2312_v31, %v623_v29  ;;  %v543_v20 = vpop.f32.mrf.mxu3 }
  0xe2   : > { %v581_v63 = vpop.f32.mrf.mxu0  ;;  %v625_v0 = vpop.f32.mrf.mxu1 }
  0xe3   : > { %v582_v27 = vadd.f32 %v581_v63, %v493_v15 }
  0xe5   : > { %838 = vmatmul.f32.gmra.mxu0 %v1964_v48  ;;  %882 = vmatmul.f32.gmra.mxu1 %v1964_v48  ;;  %v656_v34 = vadd.f32 %v2309_v19, %v582_v27  ;;  %v626_v48 = vadd.f32 %v625_v0, %v537_v21 }
  0xe7   : > { %v657_v14 = vadd.f32 %v2312_v31, %v626_v48 }
  0xea   : > { %v584_v1 = vpop.f32.mrf.mxu0  ;;  %v628_v2 = vpop.f32.mrf.mxu1 }
  0xeb   : > { %v585_v40 = vadd.f32 %v584_v1, %v496_v22  ;;  %v629_v22 = vadd.f32 %v628_v2, %v540_v32  ;;  %v546_v32 = vpop.f32.mrf.mxu3 }
  0xed   : > { %v658_v11 = vadd.f32 %v2309_v19, %v585_v40 }
  0xf2   : > { %v587_v3 = vpop.f32.mrf.mxu0  ;;  %v2283_v4 = vpop.f32.mrf.mxu1 }
  0xf3   : > { %v588_v1 = vadd.f32 %v587_v3, %v499_v33  ;;  %v632_v48 = vadd.f32 %v2283_v4, %v543_v20 }
  0xfa   : > { %v2285_v5 = vpop.f32.mrf.mxu0  ;;  %v2287_v6 = vpop.f32.mrf.mxu1 }
 0x102   : > { %v2289_v7 = vpop.f32.mrf.mxu0  ;;  %v2291_v8 = vpop.f32.mrf.mxu1 }
 0x10a   : > { %v2293_v9 = vpop.f32.mrf.mxu0  ;;  %v2295_v10 = vpop.f32.mrf.mxu1 }
 0x112   : > { %v2297_v12 = vpop.f32.mrf.mxu0  ;;  %v2299_v13 = vpop.f32.mrf.mxu1 }
 0x11a   : > { %v2305_v17 = vpop.f32.mrf.mxu0  ;;  %v2307_v18 = vpop.f32.mrf.mxu1 }
 0x122   : > { %v815_v24 = vpop.f32.mrf.mxu0  ;;  %v859_v25 = vpop.f32.mrf.mxu1 }
 0x123   : > { %v886_v26 = vadd.f32 %v815_v24, %v654_v23  ;;  %v2316_v39 = vadd.f32 %v859_v25, %v655_v35  ;;  %v502_v24 = vpop.f32.mrf.mxu2  ;;  %v659_v35 = vadd.f32 %v2312_v31, %v629_v22 }
 0x125   : > { %v904_v28 = vsub.f32 0.0, %v886_v26 }
 0x127   : > { %v913_v30 = vmul.f32 1.442695, %v904_v28 }
 0x129   : > { %1740 = vpow2.f32 %v913_v30  ;;  %v660_v30 = vadd.f32 %v2309_v19, %v588_v1 }
 0x12a   : > { %v818_v36 = vpop.f32.mrf.mxu0  ;;  %v862_v37 = vpop.f32.mrf.mxu1  ;;  %1742 = vtanh.f32 %v2316_v39 }
 0x12b   : > { %v888_v38 = vadd.f32 %v818_v36, %v656_v34  ;;  %v2321_v25 = vadd.f32 %v862_v37, %v657_v14  ;;  %v591_v37 = vadd.f32 %v2285_v5, %v502_v24  ;;  %v661_v5 = vadd.f32 %v2312_v31, %v632_v48 }
 0x12d   : > { %v905_v41 = vsub.f32 0.0, %v888_v38  ;;  %v662_v14 = vadd.f32 %v2309_v19, %v591_v37 }
 0x12f   : > { %v1741_v61 = vpop.eup %1740  ;;  %v915_v62 = vmul.f32 1.442695, %v905_v41  ;;  %v505_v41 = vpop.f32.mrf.mxu2 }
 0x130   : > { %v931_v63 = vadd.f32 1.0, %v1741_v61  ;;  %v1743_v21 = vpop.eup %1742  ;;  %v594_v20 = vadd.f32 %v2289_v7, %v505_v41 }
 0x131   : > { %1744 = vpow2.f32 %v915_v62 }
 0x132   : > { %1746 = vrcp.f32 %v931_v63  ;;  %v821_v15 = vpop.f32.mrf.mxu0  ;;  %v865_v16 = vpop.f32.mrf.mxu1 }
 0x133   : > { %v890_v23 = vadd.f32 %v821_v15, %v658_v11  ;;  %1748 = vtanh.f32 %v2321_v25  ;;  %v2330_v2 = vadd.f32 %v865_v16, %v659_v35  ;;  %v664_v35 = vadd.f32 %v2309_v19, %v594_v20 }
 0x135   : > { %v906_v0 = vsub.f32 0.0, %v890_v23 }
 0x137   : > { %v1745_v26 = vpop.eup %1744  ;;  %v917_v27 = vmul.f32 1.442695, %v906_v0 }
 0x138   : > { %v2323_v28 = vpop.eup %1746  ;;  %v932_v29 = vadd.f32 1.0, %v1745_v26  ;;  %v549_v26 = vpop.f32.mrf.mxu3 }
 0x139   : > { %1750 = vpow2.f32 %v917_v27  ;;  %v1012_v34 = vmul.f32 %v2323_v28, %v1743_v21  ;;  %v1749_v40 = vpop.eup %1748  ;;  %v635_v21 = vadd.f32 %v2287_v6, %v546_v32  ;;  %v638_v41 = vadd.f32 %v2291_v8, %v549_v26 }
 0x13a   : > { %1752 = vrcp.f32 %v932_v29  ;;  %v824_v36 = vpop.f32.mrf.mxu0  ;;  %v868_v3 = vpop.f32.mrf.mxu1 }
 0x13b   : > { %v892_v33 = vadd.f32 %v824_v36, %v660_v30  ;;  %1030 = vrot.lane.b32.xlu0 %v1012_v34, %s1965_s14  ;;  %1754 = vtanh.f32 %v2330_v2  ;;  %v2341_v4 = vadd.f32 %v868_v3, %v661_v5  ;;  %v508_v30 = vpop.f32.mrf.mxu2  ;;  %v663_v7 = vadd.f32 %v2312_v31, %v635_v21 }
 0x13c   : > { %v597_v37 = vadd.f32 %v2293_v9, %v508_v30  ;;  %v665_v9 = vadd.f32 %v2312_v31, %v638_v41 }
 0x13d   : > { %v907_v38 = vsub.f32 0.0, %v892_v33 }
 0x13f   : > { %v1751_v61 = vpop.eup %1750  ;;  %v919_v62 = vmul.f32 1.442695, %v907_v38 }
 0x140   : > { %v2334_v63 = vpop.eup %1752  ;;  %v933_v11 = vadd.f32 1.0, %v1751_v61 }
 0x141   : > { %1756 = vpow2.f32 %v919_v62  ;;  %v1013_v15 = vmul.f32 %v2334_v63, %v1749_v40  ;;  %v1755_v0 = vpop.eup %1754 }
 0x142   : > { %1758 = vrcp.f32 %v933_v11  ;;  %v827_v16 = vpop.f32.mrf.mxu0  ;;  %v871_v23 = vpop.f32.mrf.mxu1 }
 0x143   : > { %v894_v24 = vadd.f32 %v827_v16, %v662_v14  ;;  %1032 = vrot.lane.b32.xlu0 %v1013_v15, %s1965_s14  ;;  %1760 = vtanh.f32 %v2341_v4  ;;  %v2352_v6 = vadd.f32 %v871_v23, %v663_v7  ;;  %v552_v14 = vpop.f32.mrf.mxu3  ;;  %v666_v15 = vadd.f32 %v2309_v19, %v597_v37  ;;  %v511_v16 = vpop.f32.mrf.mxu2 }
 0x144   : > { %v600_v20 = vadd.f32 %v2297_v12, %v511_v16  ;;  %v641_v21 = vadd.f32 %v2295_v10, %v552_v14 }
 0x145   : > { %v908_v1 = vsub.f32 0.0, %v894_v24 }
 0x146   : > { %v667_v12 = vadd.f32 %v2312_v31, %v641_v21 }
 0x147   : > { %v1757_v22 = vpop.eup %1756  ;;  %v921_v27 = vmul.f32 1.442695, %v908_v1 }
 0x148   : > { %v2345_v29 = vpop.eup %1758  ;;  %v934_v34 = vadd.f32 1.0, %v1757_v22 }
 0x149   : > { %1762 = vpow2.f32 %v921_v27  ;;  %v1014_v36 = vmul.f32 %v2345_v29, %v1755_v0  ;;  %v1761_v40 = vpop.eup %1760 }
 0x14a   : > { %1764 = vrcp.f32 %v934_v34  ;;  %v830_v3 = vpop.f32.mrf.mxu0  ;;  %v874_v32 = vpop.f32.mrf.mxu1 }
 0x14b   : > { %v896_v33 = vadd.f32 %v830_v3, %v664_v35  ;;  %1034 = vrot.lane.b32.xlu1 %v1014_v36, %s1965_s14  ;;  %1766 = vtanh.f32 %v2352_v6  ;;  %v2363_v8 = vadd.f32 %v874_v32, %v665_v9  ;;  %v668_v35 = vadd.f32 %v2309_v19, %v600_v20  ;;  %v555_v10 = vpop.f32.mrf.mxu3 }
 0x14c   : > { %v644_v41 = vadd.f32 %v2299_v13, %v555_v10 }
 0x14d   : > { %v909_v38 = vsub.f32 0.0, %v896_v33  ;;  %v514_v33 = vpop.f32.mrf.mxu2 }
 0x14e   : > { %v603_v37 = vadd.f32 %v2305_v17, %v514_v33  ;;  %v669_v17 = vadd.f32 %v2312_v31, %v644_v41  ;;  %v958_v41 = vsub.f32 0.0, %v2316_v39 }
 0x14f   : > { %v1763_v48 = vpop.eup %1762  ;;  %v923_v61 = vmul.f32 1.442695, %v909_v38 }
 0x150   : > { %v2356_v62 = vpop.eup %1764  ;;  %v935_v11 = vadd.f32 1.0, %v1763_v48 }
 0x151   : > { %1768 = vpow2.f32 %v923_v61  ;;  %v1015_v5 = vmul.f32 %v2356_v62, %v1761_v40  ;;  %v1767_v0 = vpop.eup %1766 }
 0x152   : > { %1770 = vrcp.f32 %v935_v11  ;;  %v833_v23 = vpop.f32.mrf.mxu0  ;;  %v877_v22 = vpop.f32.mrf.mxu1 }
 0x153   : > { %v898_v24 = vadd.f32 %v833_v23, %v666_v15  ;;  %1036 = vrot.lane.b32.xlu1 %v1015_v5, %s1965_s14  ;;  %1772 = vtanh.f32 %v2363_v8  ;;  %v2374_v32 = vadd.f32 %v877_v22, %v667_v12  ;;  %v670_v5 = vadd.f32 %v2309_v19, %v603_v37 }
 0x155   : > { %v910_v1 = vsub.f32 0.0, %v898_v24 }
 0x157   : > { %v1769_v26 = vpop.eup %1768  ;;  %v925_v27 = vmul.f32 1.442695, %v910_v1  ;;  %v558_v1 = vpop.f32.mrf.mxu3 }
 0x158   : > { %v2367_v30 = vpop.eup %1770  ;;  %v936_v34 = vadd.f32 1.0, %v1769_v26  ;;  %v647_v21 = vadd.f32 %v2307_v18, %v558_v1 }
 0x159   : > { %1774 = vpow2.f32 %v925_v27  ;;  %v1016_v36 = vmul.f32 %v2367_v30, %v1767_v0  ;;  %v1773_v40 = vpop.eup %1772 }
 0x15a   : > { %1776 = vrcp.f32 %v936_v34  ;;  %v836_v7 = vpop.f32.mrf.mxu0  ;;  %v880_v15 = vpop.f32.mrf.mxu1 }
 0x15b   : > { %v900_v3 = vadd.f32 %v836_v7, %v668_v35  ;;  %1038 = vrot.lane.b32.xlu2 %v1016_v36, %s1965_s14  ;;  %1778 = vtanh.f32 %v2374_v32  ;;  %v2385_v13 = vadd.f32 %v880_v15, %v669_v17  ;;  %v671_v36 = vadd.f32 %v2312_v31, %v647_v21 }
 0x15c   : > { %v962_v17 = vsub.f32 0.0, %v2352_v6  ;;  %v963_v21 = vsub.f32 0.0, %v2363_v8  ;;  %v1004_v6 = vmul.f32 0.0, %v2334_v63 }
 0x15d   : > { %v911_v38 = vsub.f32 0.0, %v900_v3  ;;  %v965_v63 = vsub.f32 0.0, %v2385_v13 }
 0x15e   : > { %v975_v39 = vmul.f32 1.442695, %v962_v17 }
 0x15f   : > { %v1775_v48 = vpop.eup %1774  ;;  %v927_v61 = vmul.f32 1.442695, %v911_v38 }
 0x160   : > { %v2378_v11 = vpop.eup %1776  ;;  %v937_v14 = vadd.f32 1.0, %v1775_v48  ;;  %v967_v48 = vmul.f32 1.442695, %v958_v41  ;;  %v1005_v41 = vmul.f32 0.0, %v2345_v29 }
 0x161   : > { %1780 = vpow2.f32 %v927_v61  ;;  %v1017_v16 = vmul.f32 %v2378_v11, %v1773_v40  ;;  %v1779_v20 = vpop.eup %1778  ;;  %v959_v61 = vsub.f32 0.0, %v2321_v25  ;;  %v1008_v17 = vmul.f32 0.0, %v2378_v11 }
 0x162   : > { %1782 = vrcp.f32 %v937_v14  ;;  %v839_v9 = vpop.f32.mrf.mxu0  ;;  %v883_v35 = vpop.f32.mrf.mxu1 }
 0x163   : > { %v902_v23 = vadd.f32 %v839_v9, %v670_v5  ;;  %1040 = vrot.lane.b32.xlu2 %v1017_v16, %s1965_s14  ;;  %1784 = vtanh.f32 %v2385_v13  ;;  %v2394_v12 = vadd.f32 %v883_v35, %v671_v36  ;;  %v969_v14 = vmul.f32 1.442695, %v959_v61 }
 0x164   : > { %v960_v5 = vsub.f32 0.0, %v2330_v2  ;;  %v1003_v9 = vmul.f32 0.0, %v2323_v28 }
 0x165   : > { %v912_v24 = vsub.f32 0.0, %v902_v23 }
 0x167   : > { %v1781_v0 = vpop.eup %1780  ;;  %v929_v22 = vmul.f32 1.442695, %v912_v24  ;;  %v971_v24 = vmul.f32 1.442695, %v960_v5 }
 0x168   : > { %v2388_v26 = vpop.eup %1782  ;;  %v938_v27 = vadd.f32 1.0, %v1781_v0  ;;  %v961_v0 = vsub.f32 0.0, %v2341_v4  ;;  %v977_v4 = vmul.f32 1.442695, %v963_v21 }
 0x169   : > { %1786 = vpow2.f32 %v929_v22  ;;  %v1018_v34 = vmul.f32 %v2388_v26, %v1779_v20  ;;  %v1785_v7 = vpop.eup %1784 }
 0x16a   : > { %1788 = vrcp.f32 %v938_v27  ;;  %v973_v2 = vmul.f32 1.442695, %v961_v0 }
 0x16b   : > { %1042 = vrot.lane.b32.xlu0 %v1018_v34, %s1965_s14  ;;  %1790 = vtanh.f32 %v2394_v12 }
 0x16f   : > { %v1787_v3 = vpop.eup %1786 }
 0x170   : > { %v2396_v18 = vpop.eup %1788  ;;  %v939_v10 = vadd.f32 1.0, %v1787_v3  ;;  %v1007_v3 = vmul.f32 0.0, %v2367_v30 }
 0x171   : > { %v1019_v33 = vmul.f32 %v2396_v18, %v1785_v7  ;;  %v1791_v37 = vpop.eup %1790 }
 0x172   : > { %1792 = vrcp.f32 %v939_v10 }
 0x173   : > { %1044 = vrot.lane.b32.xlu2 %v1019_v33, %s1965_s14  ;;  %1794 = vpow2.f32 %v967_v48 }
 0x174   : > { %1796 = vpow2.f32 %v969_v14 }
 0x178   : > { %v2401_v38 = vpop.eup %1792 }
 0x179   : > { %v1020_v40 = vmul.f32 %v2401_v38, %v1791_v37  ;;  %v1795_v15 = vpop.eup %1794 }
 0x17a   : > { %v985_v16 = vadd.f32 1.0, %v1795_v15  ;;  %v1797_v1 = vpop.eup %1796  ;;  %v981_v15 = vmul.f32 1.442695, %v965_v63 }
 0x17b   : > { %v986_v25 = vadd.f32 1.0, %v1797_v1 }
 0x17c   : > { %1798 = vrcp.f32 %v985_v16 }
 0x182   : > { %v1799_v28 = vpop.eup %1798 }
 0x1ad   : > { %v1031_v23 = vpop.permute.xlu0 %1030 }
 0x1ae   : > { %v2409_v20 = vadd.f32 %v1031_v23, %v1003_v9 }
 0x1b0   : > { %1800 = vtanh.f32 %v2409_v20 }
 0x1b1   : > { %1802 = vpow2.f32 %v971_v24 }
 0x1b2   : > { %1804 = vpow2.f32 %v975_v39  ;;  %v1006_v39 = vmul.f32 0.0, %v2356_v62  ;;  %v964_v62 = vsub.f32 0.0, %v2374_v32 }
 0x1b3   : > { %1806 = vrcp.f32 %v986_v25 }
 0x1b4   : > { %1808 = vpow2.f32 %v973_v2 }
 0x1b5   : > { %v1033_v22 = vpop.permute.xlu0 %1032  ;;  %v1039_v34 = vpop.permute.xlu2 %1038 }
 0x1b6   : > { %v1801_v27 = vpop.eup %1800  ;;  %v2415_v35 = vadd.f32 %v1033_v22, %v1004_v6  ;;  %v2421_v8 = vadd.f32 %v1039_v34, %v1007_v3  ;;  %v1010_v34 = vmul.f32 0.0, %v2396_v18  ;;  %v979_v3 = vmul.f32 1.442695, %v964_v62 }
 0x1b7   : > { %v1075_v36 = vmul.f32 %v1801_v27, %v1799_v28  ;;  %v1803_v7 = vpop.eup %1802 }
 0x1b8   : > { %v1805_v10 = vpop.eup %1804  ;;  %1810 = vtanh.f32 %v2415_v35  ;;  %v987_v33 = vadd.f32 1.0, %v1803_v7 }
 0x1b9   : > { %1093 = vrot.lane.b32.xlu1 %v1075_v36, %s1965_s14  ;;  %v989_v37 = vadd.f32 1.0, %v1805_v10  ;;  %1812 = vpow2.f32 %v977_v4  ;;  %v1807_v48 = vpop.eup %1806 }
 0x1ba   : > { %v1809_v14 = vpop.eup %1808  ;;  %1814 = vtanh.f32 %v2421_v8 }
 0x1bb   : > { %1816 = vrcp.f32 %v987_v33  ;;  %v988_v9 = vadd.f32 1.0, %v1809_v14  ;;  %v1009_v14 = vmul.f32 0.0, %v2388_v26 }
 0x1bc   : > { %1818 = vrcp.f32 %v989_v37 }
 0x1bd   : > { %v1035_v61 = vpop.permute.xlu1 %1034  ;;  %v1041_v16 = vpop.permute.xlu2 %1040 }
 0x1be   : > { %v2425_v30 = vadd.f32 %v1035_v61, %v1005_v41  ;;  %v1811_v5 = vpop.eup %1810  ;;  %v2431_v23 = vadd.f32 %v1041_v16, %v1008_v17 }
 0x1bf   : > { %v1076_v13 = vmul.f32 %v1811_v5, %v1807_v48  ;;  %v1813_v29 = vpop.eup %1812 }
 0x1c0   : > { %1820 = vtanh.f32 %v2425_v30  ;;  %v1815_v24 = vpop.eup %1814  ;;  %v990_v0 = vadd.f32 1.0, %v1813_v29  ;;  %v966_v29 = vsub.f32 0.0, %v2394_v12 }
 0x1c1   : > { %1046 = vrot.lane.b32.xlu1 %v1020_v40, %s1965_s14  ;;  %1822 = vpow2.f32 %v981_v15  ;;  %1095 = vrot.lane.b32.xlu0 %v1076_v13, %s1965_s14  ;;  %v1817_v1 = vpop.eup %1816 }
 0x1c2   : > { %v1819_v2 = vpop.eup %1818  ;;  %1824 = vrcp.f32 %v988_v9  ;;  %v983_v9 = vmul.f32 1.442695, %v966_v29 }
 0x1c3   : > { %1826 = vtanh.f32 %v2431_v23  ;;  %v1079_v40 = vmul.f32 %v1819_v2, %v1815_v24 }
 0x1c5   : > { %v1037_v25 = vpop.permute.xlu1 %1036 }
 0x1c6   : > { %v2434_v11 = vadd.f32 %v1037_v25, %v1006_v39  ;;  %v1821_v21 = vpop.eup %1820 }
 0x1c7   : > { %v1823_v6 = vpop.eup %1822  ;;  %v1077_v28 = vmul.f32 %v1821_v21, %v1817_v1  ;;  %v1011_v1 = vmul.f32 0.0, %v2401_v38 }
 0x1c8   : > { %1828 = vtanh.f32 %v2434_v11  ;;  %v992_v22 = vadd.f32 1.0, %v1823_v6  ;;  %v1825_v27 = vpop.eup %1824 }
 0x1c9   : > { %1830 = vrcp.f32 %v990_v0  ;;  %1101 = vrot.lane.b32.xlu1 %v1079_v40, %s1965_s14  ;;  %1097 = vrot.lane.b32.xlu2 %v1077_v28, %s1965_s14  ;;  %v1827_v36 = vpop.eup %1826 }
 0x1ca   : > { %1832 = vrcp.f32 %v992_v22  ;;  %v689_v22 = vpop.f32.mrf.mxu2 }
 0x1cd   : > { %v1045_v7 = vpop.permute.xlu2 %1044 }
 0x1ce   : > { %v1829_v4 = vpop.eup %1828  ;;  %v2442_v10 = vadd.f32 %v1045_v7, %v1010_v34 }
 0x1cf   : > { %v1831_v63 = vpop.eup %1830  ;;  %v1078_v33 = vmul.f32 %v1829_v4, %v1825_v27  ;;  %v733_v27 = vpop.f32.mrf.mxu3 }
 0x1d0   : > { %1834 = vtanh.f32 %v2442_v10  ;;  %v1080_v37 = vmul.f32 %v1831_v63, %v1827_v36  ;;  %v1833_v32 = vpop.eup %1832 }
 0x1d1   : > { %1099 = vrot.lane.b32.xlu0 %v1078_v33, %s1965_s14  ;;  %1836 = vpow2.f32 %v979_v3 }
 0x1d2   : > { %1103 = vrot.lane.b32.xlu2 %v1080_v37, %s1965_s14  ;;  %v692_v36 = vpop.f32.mrf.mxu2 }
 0x1d6   : > { %v1835_v41 = vpop.eup %1834 }
 0x1d7   : > { %v1082_v18 = vmul.f32 %v1835_v41, %v1833_v32  ;;  %v1837_v48 = vpop.eup %1836  ;;  %v736_v7 = vpop.f32.mrf.mxu3 }
 0x1d8   : > { %v991_v61 = vadd.f32 1.0, %v1837_v48 }
 0x1d9   : > { %1107 = vrot.lane.b32.xlu1 %v1082_v18, %s1965_s14 }
 0x1da   : > { %1838 = vrcp.f32 %v991_v61  ;;  %v695_v3 = vpop.f32.mrf.mxu2 }
 0x1dd   : > { %v1043_v15 = vpop.permute.xlu0 %1042 }
 0x1de   : > { %v2449_v5 = vadd.f32 %v1043_v15, %v1009_v14 }
 0x1df   : > { %v739_v63 = vpop.f32.mrf.mxu3 }
 0x1e0   : > { %1840 = vtanh.f32 %v2449_v5  ;;  %v1839_v16 = vpop.eup %1838 }
 0x1e1   : > { %1842 = vpow2.f32 %v983_v9  ;;  %v690_v9 = vadd.f32 %v689_v22, %v2231_v42  ;;  %v696_v22 = vadd.f32 %v695_v3, %v2255_v46 }
 0x1e2   : > { %v698_v33 = vpop.f32.mrf.mxu2 }
 0x1e6   : > { %v1841_v13 = vpop.eup %1840 }
 0x1e7   : > { %v1081_v17 = vmul.f32 %v1841_v13, %v1839_v16  ;;  %v1843_v26 = vpop.eup %1842  ;;  %v2507_v37 = vpop.f32.mrf.mxu3 }
 0x1e8   : > { %v993_v39 = vadd.f32 1.0, %v1843_v26  ;;  %v760_v26 = vadd.f32 %v690_v9, %v2309_v19 }
 0x1e9   : > { %1105 = vrot.lane.b32.xlu0 %v1081_v17, %s1965_s14 }
 0x1ea   : > { %1844 = vrcp.f32 %v993_v39  ;;  %v2509_v32 = vpop.f32.mrf.mxu2 }
 0x1ef   : > { %v2511_v41 = vpop.f32.mrf.mxu3 }
 0x1f0   : > { %v1845_v12 = vpop.eup %1844 }
 0x1f2   : > { %v2513_v18 = vpop.f32.mrf.mxu2 }
 0x1f7   : > { %v2515_v48 = vpop.f32.mrf.mxu3 }
 0x1fa   : > { %v2517_v61 = vpop.f32.mrf.mxu2 }
 0x1ff   : > { %v2519_v14 = vpop.f32.mrf.mxu3 }
 0x202   : > { %v2527_v16 = vpop.f32.mrf.mxu2 }
 0x207   : > { %v2529_v13 = vpop.f32.mrf.mxu3 }
 0x20a   : > { %v2531_v17 = vpop.f32.mrf.mxu2 }
 0x20f   : > { %v2533_v29 = vpop.f32.mrf.mxu3 }
 0x223   : > { %v2470_v40 = vpop.permute.xlu2 %1097 }
 0x22b   : > { %v2454_v24 = vpop.permute.xlu1 %1093 }
 0x22c   : > { %1697 = vmatmul.msk.f32.vlgmr.msra.gmra.mxu2 %vm794_vm1, %v2454_v24  ;;  %1706 = vmatmul.msk.f32.vlgmr.msra.gmra.mxu3 %vm794_vm1, %v2454_v24  ;;  %v2489_v62 = vpop.permute.xlu2 %1103 }
 0x233   : > { %v1047_v0 = vpop.permute.xlu1 %1046  ;;  %v2461_v25 = vpop.permute.xlu0 %1095 }
 0x234   : > { %2779 = vst [vmem:[#allocation2_spill] sm:$0xff] %v2461_v25  ;;  %v2463_v2 = vadd.f32 %v1047_v0, %v1011_v1  ;;  %1698 = vmatmul.msk.f32.gmra.mxu2 %vm794_vm1, %v2461_v25  ;;  %1707 = vmatmul.msk.f32.gmra.mxu3 %vm794_vm1, %v2461_v25 }
 0x236   : > { %1846 = vtanh.f32 %v2463_v2 }
 0x23b   : > { %v2483_v28 = vpop.permute.xlu1 %1101 }
 0x23c   : > { %v1847_v21 = vpop.eup %1846  ;;  %1699 = vmatmul.msk.f32.gmra.mxu2 %vm794_vm1, %v2470_v40  ;;  %1708 = vmatmul.msk.f32.gmra.mxu3 %vm794_vm1, %v2470_v40  ;;  %2781 = vst [vmem:[#allocation4_spill] sm:$0xff] %v2483_v28 }
 0x23d   : > { %v1083_v38 = vmul.f32 %v1847_v21, %v1845_v12  ;;  %v693_v21 = vadd.f32 %v692_v36, %v2243_v44  ;;  %v764_v44 = vadd.f32 %v696_v22, %v2309_v19 }
 0x23f   : > { %1109 = vrot.lane.b32.xlu2 %v1083_v38, %s1965_s14  ;;  %v734_v38 = vadd.f32 %v733_v27, %v2233_v43  ;;  %v737_v43 = vadd.f32 %v736_v7, %v2245_v45 }
 0x243   : > { %v2477_v6 = vpop.permute.xlu0 %1099 }
 0x244   : > { %2780 = vst [vmem:[#allocation3_spill] sm:$0xff] %v2477_v6  ;;  %1700 = vmatmul.msk.f32.gmra.mxu2 %vm794_vm1, %v2477_v6  ;;  %1709 = vmatmul.msk.f32.gmra.mxu3 %vm794_vm1, %v2477_v6 }
 0x24b   : > { %v2501_v4 = vpop.permute.xlu1 %1107 }
 0x24c   : > { %1701 = vmatmul.msk.f32.gmra.mxu2 %vm794_vm1, %v2483_v28  ;;  %1710 = vmatmul.msk.f32.gmra.mxu3 %vm794_vm1, %v2483_v28  ;;  %2783 = vst [vmem:[#allocation6_spill] sm:$0xff] %v2501_v4 }
 0x254   : > { %1702 = vmatmul.msk.f32.gmra.mxu2 %vm794_vm1, %v2489_v62  ;;  %1711 = vmatmul.msk.f32.gmra.mxu3 %vm794_vm1, %v2489_v62 }
 0x25b   : > { %v2495_v34 = vpop.permute.xlu0 %1105 }
 0x25c   : > { %2782 = vst [vmem:[#allocation5_spill] sm:$0xff] %v2495_v34  ;;  %1703 = vmatmul.msk.f32.gmra.mxu2 %vm794_vm1, %v2495_v34  ;;  %1712 = vmatmul.msk.f32.gmra.mxu3 %vm794_vm1, %v2495_v34  ;;  %v761_v34 = vadd.f32 %v734_v38, %v2312_v31 }
 0x264   : > { %1704 = vmatmul.msk.f32.gmra.mxu2 %vm794_vm1, %v2501_v4  ;;  %1713 = vmatmul.msk.f32.gmra.mxu3 %vm794_vm1, %v2501_v4  ;;  %v762_v4 = vadd.f32 %v693_v21, %v2309_v19 }
 0x299   : > { %v2521_v15 = vpop.permute.xlu2 %1109 }
 0x29a   : > { %2784 = vst [vmem:[#allocation7_spill] sm:$0xff] %v2521_v15  ;;  %1705 = vmatmul.msk.f32.gmra.mxu2 %vm794_vm1, %v2521_v15  ;;  %1714 = vmatmul.msk.f32.gmra.mxu3 %vm794_vm1, %v2521_v15 }
 0x2af   : > { %v1146_v39 = vpop.f32.mrf.mxu2  ;;  %v1190_v1 = vpop.f32.mrf.mxu3 }
 0x2b0   : > { %v1217_v0 = vadd.f32 %v1146_v39, %v760_v26  ;;  %v2541_v42 = vadd.f32 %v1190_v1, %v761_v34  ;;  %v763_v34 = vadd.f32 %v737_v43, %v2312_v31 }
 0x2b2   : > { %v1235_v12 = vsub.f32 0.0, %v1217_v0 }
 0x2b4   : > { %v1244_v15 = vmul.f32 1.442695, %v1235_v12 }
 0x2b6   : > { %1848 = vpow2.f32 %v1244_v15 }
 0x2b7   : > { %v1149_v28 = vpop.f32.mrf.mxu2  ;;  %v1193_v6 = vpop.f32.mrf.mxu3  ;;  %1850 = vtanh.f32 %v2541_v42 }
 0x2b8   : > { %v1219_v25 = vadd.f32 %v1149_v28, %v762_v4  ;;  %v699_v28 = vadd.f32 %v698_v33, %v2259_v49  ;;  %v740_v4 = vadd.f32 %v739_v63, %v2257_v47  ;;  %v2552_v1 = vadd.f32 %v1193_v6, %v763_v34 }
 0x2b9   : > { %v702_v63 = vadd.f32 %v2509_v32, %v2263_v51 }
 0x2ba   : > { %v1236_v9 = vsub.f32 0.0, %v1219_v25  ;;  %v766_v21 = vadd.f32 %v699_v28, %v2309_v19  ;;  %v765_v49 = vadd.f32 %v740_v4, %v2312_v31  ;;  %v746_v4 = vadd.f32 %v2511_v41, %v2265_v52 }
 0x2bb   : > { %v708_v41 = vadd.f32 %v2517_v61, %v2271_v55 }
 0x2bc   : > { %v1849_v26 = vpop.eup %1848  ;;  %v1246_v0 = vmul.f32 1.442695, %v1236_v9 }
 0x2bd   : > { %v1262_v39 = vadd.f32 1.0, %v1849_v26  ;;  %v1851_v25 = vpop.eup %1850  ;;  %v743_v26 = vadd.f32 %v2507_v37, %v2261_v50  ;;  %v705_v37 = vadd.f32 %v2513_v18, %v2267_v53  ;;  %v769_v53 = vadd.f32 %v746_v4, %v2312_v31 }
 0x2bf   : > { %1852 = vrcp.f32 %v1262_v39  ;;  %v1152_v27 = vpop.f32.mrf.mxu2  ;;  %v1196_v36 = vpop.f32.mrf.mxu3 }
 0x2c0   : > { %1854 = vpow2.f32 %v1246_v0  ;;  %v1221_v15 = vadd.f32 %v1152_v27, %v764_v44  ;;  %v2559_v6 = vadd.f32 %v1196_v36, %v765_v49  ;;  %v768_v27 = vadd.f32 %v702_v63, %v2309_v19 }
 0x2c1   : > { %v767_v36 = vadd.f32 %v743_v26, %v2312_v31  ;;  %v749_v63 = vadd.f32 %v2515_v48, %v2269_v54  ;;  %v711_v48 = vadd.f32 %v2527_v16, %v2275_v57 }
 0x2c2   : > { %v1237_v46 = vsub.f32 0.0, %v1221_v15 }
 0x2c3   : > { %v771_v55 = vadd.f32 %v749_v63, %v2312_v31 }
 0x2c4   : > { %v1248_v45 = vmul.f32 1.442695, %v1237_v46 }
 0x2c5   : > { %v2550_v3 = vpop.eup %1852 }
 0x2c6   : > { %v1343_v7 = vmul.f32 %v2550_v3, %v1851_v25  ;;  %v1855_v12 = vpop.eup %1854  ;;  %1856 = vpow2.f32 %v1248_v45 }
 0x2c7   : > { %v1263_v38 = vadd.f32 1.0, %v1855_v12  ;;  %v1155_v33 = vpop.f32.mrf.mxu2  ;;  %v1199_v22 = vpop.f32.mrf.mxu3  ;;  %1858 = vtanh.f32 %v2552_v1 }
 0x2c8   : > { %1361 = vrot.lane.b32.xlu0 %v1343_v7, %s1965_s14  ;;  %v1223_v47 = vadd.f32 %v1155_v33, %v766_v21  ;;  %v2571_v34 = vadd.f32 %v1199_v22, %v767_v36 }
 0x2c9   : > { %1860 = vrcp.f32 %v1263_v38  ;;  %v770_v38 = vadd.f32 %v705_v37, %v2309_v19 }
 0x2ca   : > { %v1238_v9 = vsub.f32 0.0, %v1223_v47  ;;  %1862 = vtanh.f32 %v2559_v6 }
 0x2cc   : > { %v1857_v39 = vpop.eup %1856  ;;  %v1250_v0 = vmul.f32 1.442695, %v1238_v9 }
 0x2cd   : > { %v1264_v43 = vadd.f32 1.0, %v1857_v39  ;;  %v1859_v44 = vpop.eup %1858 }
 0x2ce   : > { %1864 = vpow2.f32 %v1250_v0 }
 0x2cf   : > { %v2567_v15 = vpop.eup %1860  ;;  %1866 = vrcp.f32 %v1264_v43  ;;  %v1158_v28 = vpop.f32.mrf.mxu2 }
 0x2d0   : > { %v1225_v51 = vadd.f32 %v1158_v28, %v768_v27  ;;  %v1344_v32 = vmul.f32 %v2567_v15, %v1859_v44  ;;  %v1202_v50 = vpop.f32.mrf.mxu3  ;;  %v1863_v25 = vpop.eup %1862  ;;  %1868 = vtanh.f32 %v2571_v34  ;;  %v772_v44 = vadd.f32 %v708_v41, %v2309_v19 }
 0x2d1   : > { %v2585_v52 = vadd.f32 %v1202_v50, %v769_v53  ;;  %v755_v53 = vadd.f32 %v2529_v13, %v2277_v58 }
 0x2d2   : > { %v1239_v46 = vsub.f32 0.0, %v1225_v51  ;;  %1363 = vrot.lane.b32.xlu1 %v1344_v32, %s1965_s14  ;;  %v752_v32 = vadd.f32 %v2519_v14, %v2273_v56 }
 0x2d3   : > { %v775_v63 = vadd.f32 %v755_v53, %v2312_v31 }
 0x2d4   : > { %v1865_v45 = vpop.eup %1864  ;;  %v1252_v7 = vmul.f32 1.442695, %v1239_v46  ;;  %v773_v57 = vadd.f32 %v752_v32, %v2312_v31 }
 0x2d5   : > { %v2578_v12 = vpop.eup %1866  ;;  %v1265_v21 = vadd.f32 1.0, %v1865_v45  ;;  %v774_v45 = vadd.f32 %v711_v48, %v2309_v19 }
 0x2d6   : > { %1870 = vpow2.f32 %v1252_v7  ;;  %v1345_v49 = vmul.f32 %v2578_v12, %v1863_v25  ;;  %v1869_v47 = vpop.eup %1868 }
 0x2d7   : > { %1872 = vrcp.f32 %v1265_v21  ;;  %v1161_v18 = vpop.f32.mrf.mxu2 }
 0x2d8   : > { %v1227_v33 = vadd.f32 %v1161_v18, %v770_v38  ;;  %1365 = vrot.lane.b32.xlu2 %v1345_v49, %s1965_s14  ;;  %v1205_v9 = vpop.f32.mrf.mxu3  ;;  %1874 = vtanh.f32 %v2585_v52 }
 0x2d9   : > { %v2598_v54 = vadd.f32 %v1205_v9, %v771_v55 }
 0x2da   : > { %v1240_v22 = vsub.f32 0.0, %v1227_v33 }
 0x2dc   : > { %v1871_v26 = vpop.eup %1870  ;;  %v1254_v39 = vmul.f32 1.442695, %v1240_v22 }
 0x2dd   : > { %v2591_v0 = vpop.eup %1872  ;;  %v1266_v43 = vadd.f32 1.0, %v1871_v26 }
 0x2de   : > { %1876 = vpow2.f32 %v1254_v39  ;;  %v1346_v27 = vmul.f32 %v2591_v0, %v1869_v47  ;;  %v1875_v51 = vpop.eup %1874 }
 0x2df   : > { %1878 = vrcp.f32 %v1266_v43  ;;  %v1164_v61 = vpop.f32.mrf.mxu2 }
 0x2e0   : > { %v1229_v36 = vadd.f32 %v1164_v61, %v772_v44  ;;  %1367 = vrot.lane.b32.xlu0 %v1346_v27, %s1965_s14  ;;  %1880 = vtanh.f32 %v2598_v54  ;;  %v1208_v4 = vpop.f32.mrf.mxu3  ;;  %v714_v61 = vadd.f32 %v2531_v17, %v2279_v59 }
 0x2e1   : > { %v2611_v56 = vadd.f32 %v1208_v4, %v773_v57 }
 0x2e2   : > { %v1241_v28 = vsub.f32 0.0, %v1229_v36  ;;  %v776_v36 = vadd.f32 %v714_v61, %v2309_v19 }
 0x2e4   : > { %v1877_v50 = vpop.eup %1876  ;;  %v1256_v37 = vmul.f32 1.442695, %v1241_v28 }
 0x2e5   : > { %v2604_v46 = vpop.eup %1878  ;;  %v1267_v25 = vadd.f32 1.0, %v1877_v50  ;;  %v758_v50 = vadd.f32 %v2533_v29, %v2281_v60  ;;  %v1290_v60 = vsub.f32 0.0, %v2552_v1  ;;  %v1294_v1 = vsub.f32 0.0, %v2598_v54 }
 0x2e6   : > { %1882 = vpow2.f32 %v1256_v37  ;;  %v1347_v7 = vmul.f32 %v2604_v46, %v1875_v51  ;;  %v1881_v38 = vpop.eup %1880  ;;  %v1291_v51 = vsub.f32 0.0, %v2559_v6 }
 0x2e7   : > { %1884 = vrcp.f32 %v1267_v25  ;;  %v1167_v16 = vpop.f32.mrf.mxu2  ;;  %v1300_v53 = vmul.f32 1.442695, %v1290_v60 }
 0x2e8   : > { %v1231_v21 = vadd.f32 %v1167_v16, %v774_v45  ;;  %1369 = vrot.lane.b32.xlu1 %v1347_v7, %s1965_s14  ;;  %1886 = vtanh.f32 %v2611_v56  ;;  %v1211_v47 = vpop.f32.mrf.mxu3  ;;  %v1302_v25 = vmul.f32 1.442695, %v1291_v51  ;;  %v777_v45 = vadd.f32 %v758_v50, %v2312_v31 }
 0x2e9   : > { %v2621_v9 = vadd.f32 %v1211_v47, %v775_v63  ;;  %v1289_v7 = vsub.f32 0.0, %v2541_v42  ;;  %v1336_v31 = vmul.f32 %v2578_v12, %v2425_v30  ;;  %v1308_v63 = vmul.f32 1.442695, %v1294_v1 }
 0x2ea   : > { %v1242_v14 = vsub.f32 0.0, %v1231_v21 }
 0x2eb   : > { %v1298_v17 = vmul.f32 1.442695, %v1289_v7 }
 0x2ec   : > { %v1883_v49 = vpop.eup %1882  ;;  %v1258_v18 = vmul.f32 1.442695, %v1242_v14 }
 0x2ed   : > { %v2615_v33 = vpop.eup %1884  ;;  %v1268_v41 = vadd.f32 1.0, %v1883_v49 }
 0x2ee   : > { %1888 = vpow2.f32 %v1258_v18  ;;  %v1348_v22 = vmul.f32 %v2615_v33, %v1881_v38  ;;  %v1887_v26 = vpop.eup %1886  ;;  %v1339_v51 = vmul.f32 %v2615_v33, %v2431_v23 }
 0x2ef   : > { %1890 = vrcp.f32 %v1268_v41  ;;  %v1334_v41 = vmul.f32 %v2550_v3, %v2409_v20  ;;  %v1335_v20 = vmul.f32 %v2567_v15, %v2415_v35 }
 0x2f0   : > { %1371 = vrot.lane.b32.xlu2 %v1348_v22, %s1965_s14  ;;  %1892 = vtanh.f32 %v2621_v9 }
 0x2f4   : > { %v1889_v39 = vpop.eup %1888 }
 0x2f5   : > { %v2623_v58 = vpop.eup %1890  ;;  %v1269_v13 = vadd.f32 1.0, %v1889_v39 }
 0x2f6   : > { %v1349_v43 = vmul.f32 %v2623_v58, %v1887_v26  ;;  %v1893_v44 = vpop.eup %1892 }
 0x2f7   : > { %1894 = vrcp.f32 %v1269_v13  ;;  %v1292_v13 = vsub.f32 0.0, %v2571_v34  ;;  %v1293_v34 = vsub.f32 0.0, %v2585_v52  ;;  %v1337_v52 = vmul.f32 %v2591_v0, %v2434_v11 }
 0x2f8   : > { %1373 = vrot.lane.b32.xlu0 %v1349_v43, %s1965_s14 }
 0x2fd   : > { %v2628_v27 = vpop.eup %1894 }
 0x2fe   : > { %v1350_v55 = vmul.f32 %v2628_v27, %v1893_v44 }
 0x300   : > { %1375 = vrot.lane.b32.xlu1 %v1350_v55, %s1965_s14  ;;  %v1304_v55 = vmul.f32 1.442695, %v1292_v13 }
 0x31d   : > { %v1170_v48 = vpop.f32.mrf.mxu2  ;;  %v1214_v4 = vpop.f32.mrf.mxu3 }
 0x31e   : > { %v1233_v28 = vadd.f32 %v1170_v48, %v776_v36  ;;  %v2640_v59 = vadd.f32 %v1214_v4, %v777_v45 }
 0x320   : > { %v1243_v32 = vsub.f32 0.0, %v1233_v28 }
 0x322   : > { %v1260_v37 = vmul.f32 1.442695, %v1243_v32 }
 0x324   : > { %1896 = vpow2.f32 %v1260_v37  ;;  %v1306_v37 = vmul.f32 1.442695, %v1293_v34 }
 0x325   : > { %1898 = vpow2.f32 %v1302_v25 }
 0x326   : > { %1900 = vtanh.f32 %v2640_v59 }
 0x32a   : > { %v1897_v19 = vpop.eup %1896 }
 0x32b   : > { %v1270_v57 = vadd.f32 1.0, %v1897_v19  ;;  %v1899_v6 = vpop.eup %1898 }
 0x32c   : > { %v1318_v29 = vadd.f32 1.0, %v1899_v6  ;;  %v1901_v16 = vpop.eup %1900  ;;  %v1295_v6 = vsub.f32 0.0, %v2611_v56 }
 0x32d   : > { %1902 = vrcp.f32 %v1270_v57 }
 0x32e   : > { %1904 = vpow2.f32 %v1298_v17  ;;  %v1310_v11 = vmul.f32 1.442695, %v1295_v6 }
 0x32f   : > { %1906 = vrcp.f32 %v1318_v29  ;;  %v1338_v29 = vmul.f32 %v2604_v46, %v2421_v8  ;;  %v1340_v46 = vmul.f32 %v2623_v58, %v2449_v5  ;;  %v1297_v58 = vsub.f32 0.0, %v2640_v59 }
 0x332   : > { %v1366_v42 = vpop.permute.xlu2 %1365 }
 0x333   : > { %v2646_v21 = vpop.eup %1902  ;;  %v1390_v14 = vadd.f32 %v1366_v42, %v1336_v31 }
 0x334   : > { %v1351_v38 = vmul.f32 %v2646_v21, %v1901_v16  ;;  %v1905_v49 = vpop.eup %1904 }
 0x335   : > { %1908 = vtanh.f32 %v1390_v14  ;;  %v1316_v18 = vadd.f32 1.0, %v1905_v49  ;;  %v1907_v12 = vpop.eup %1906 }
 0x336   : > { %1377 = vrot.lane.b32.xlu2 %v1351_v38, %s1965_s14  ;;  %1910 = vpow2.f32 %v1300_v53  ;;  %v1296_v38 = vsub.f32 0.0, %v2621_v9  ;;  %v1341_v9 = vmul.f32 %v2628_v27, %v2442_v10 }
 0x337   : > { %1912 = vrcp.f32 %v1316_v18 }
 0x338   : > { %v1312_v56 = vmul.f32 1.442695, %v1296_v38 }
 0x33a   : > { %v1362_v30 = vpop.permute.xlu0 %1361 }
 0x33b   : > { %v1388_v22 = vadd.f32 %v1362_v30, %v1334_v41  ;;  %v1909_v47 = vpop.eup %1908 }
 0x33c   : > { %v1408_v26 = vmul.f32 %v1909_v47, %v1907_v12  ;;  %v1911_v39 = vpop.eup %1910 }
 0x33d   : > { %1914 = vtanh.f32 %v1388_v22  ;;  %v1913_v43 = vpop.eup %1912  ;;  %v1317_v54 = vadd.f32 1.0, %v1911_v39 }
 0x33e   : > { %1437 = vrot.lane.b32.xlu2 %v1408_v26, %s1965_s14  ;;  %1916 = vpow2.f32 %v1308_v63 }
 0x33f   : > { %1918 = vrcp.f32 %v1317_v54 }
 0x340   : > { %1920 = vpow2.f32 %v1304_v55  ;;  %v1342_v55 = vmul.f32 %v2646_v21, %v2463_v2 }
 0x343   : > { %v1915_v44 = vpop.eup %1914 }
 0x344   : > { %v1406_v3 = vmul.f32 %v1915_v44, %v1913_v43  ;;  %v1364_v61 = vpop.permute.xlu1 %1363  ;;  %v1917_v36 = vpop.eup %1916  ;;  %v1314_v44 = vmul.f32 1.442695, %v1297_v58 }
 0x345   : > { %v1389_v48 = vadd.f32 %v1364_v61, %v1335_v20  ;;  %v1321_v28 = vadd.f32 1.0, %v1917_v36  ;;  %v1919_v50 = vpop.eup %1918 }
 0x346   : > { %1433 = vrot.lane.b32.xlu0 %v1406_v3, %s1965_s14  ;;  %v1921_v35 = vpop.eup %1920 }
 0x347   : > { %1922 = vtanh.f32 %v1389_v48  ;;  %v1319_v45 = vadd.f32 1.0, %v1921_v35 }
 0x348   : > { %1924 = vrcp.f32 %v1321_v28 }
 0x34a   : > { %v1372_v32 = vpop.permute.xlu2 %1371 }
 0x34b   : > { %v1393_v25 = vadd.f32 %v1372_v32, %v1339_v51 }
 0x34d   : > { %v1923_v15 = vpop.eup %1922  ;;  %1926 = vtanh.f32 %v1393_v25 }
 0x34e   : > { %v1407_v4 = vmul.f32 %v1923_v15, %v1919_v50  ;;  %1928 = vpow2.f32 %v1306_v37  ;;  %v1925_v7 = vpop.eup %1924  ;;  %v2785_v37 = vld [vmem:[#allocation2_spill] sm:$0xff]  ;;  %v2786_v15 = vld [vmem:[#allocation3_spill] sm:$0xff] }
 0x34f   : > { %1930 = vrcp.f32 %v1319_v45 }
 0x350   : > { %1435 = vrot.lane.b32.xlu1 %v1407_v4, %s1965_s14 }
 0x352   : > { %v1368_v19 = vpop.permute.xlu0 %1367 }
 0x353   : > { %v1927_v17 = vpop.eup %1926  ;;  %v1391_v23 = vadd.f32 %v1368_v19, %v1337_v52 }
 0x354   : > { %v1411_v33 = vmul.f32 %v1927_v17, %v1925_v7  ;;  %v1929_v57 = vpop.eup %1928  ;;  %v2787_v7 = vld [vmem:[#allocation4_spill] sm:$0xff] }
 0x355   : > { %1932 = vtanh.f32 %v1391_v23  ;;  %v1320_v60 = vadd.f32 1.0, %v1929_v57  ;;  %v1931_v16 = vpop.eup %1930 }
 0x356   : > { %1443 = vrot.lane.b32.xlu2 %v1411_v33, %s1965_s14  ;;  %v2788_v33 = vld [vmem:[#allocation5_spill] sm:$0xff] }
 0x357   : > { %1934 = vrcp.f32 %v1320_v60 }
 0x35a   : > { %v1370_v31 = vpop.permute.xlu1 %1369 }
 0x35b   : > { %v1933_v42 = vpop.eup %1932  ;;  %v1392_v0 = vadd.f32 %v1370_v31, %v1338_v29  ;;  %v2789_v29 = vld [vmem:[#allocation6_spill] sm:$0xff] }
 0x35c   : > { %v1409_v14 = vmul.f32 %v1933_v42, %v1931_v16 }
 0x35d   : > { %1936 = vtanh.f32 %v1392_v0  ;;  %v1935_v49 = vpop.eup %1934 }
 0x35e   : > { %1439 = vrot.lane.b32.xlu0 %v1409_v14, %s1965_s14  ;;  %1938 = vpow2.f32 %v1310_v11  ;;  %v2790_v11 = vld [vmem:[#allocation7_spill] sm:$0xff] }
 0x35f   : > { %1940 = vpow2.f32 %v1312_v56 }
 0x363   : > { %v1937_v53 = vpop.eup %1936 }
 0x364   : > { %v1410_v18 = vmul.f32 %v1937_v53, %v1935_v49  ;;  %v1939_v1 = vpop.eup %1938 }
 0x365   : > { %v1322_v8 = vadd.f32 1.0, %v1939_v1  ;;  %v1941_v12 = vpop.eup %1940 }
 0x366   : > { %1441 = vrot.lane.b32.xlu1 %v1410_v18, %s1965_s14  ;;  %v1323_v22 = vadd.f32 1.0, %v1941_v12 }
 0x367   : > { %1942 = vrcp.f32 %v1322_v8 }
 0x36a   : > { %v1374_v41 = vpop.permute.xlu0 %1373 }
 0x36b   : > { %v1394_v30 = vadd.f32 %v1374_v41, %v1340_v46 }
 0x36d   : > { %1944 = vtanh.f32 %v1394_v30  ;;  %v1943_v47 = vpop.eup %1942 }
 0x36e   : > { %1946 = vrcp.f32 %v1323_v22 }
 0x372   : > { %v1376_v63 = vpop.permute.xlu1 %1375 }
 0x373   : > { %v1945_v26 = vpop.eup %1944  ;;  %v1395_v39 = vadd.f32 %v1376_v63, %v1341_v9 }
 0x374   : > { %v1412_v13 = vmul.f32 %v1945_v26, %v1943_v47  ;;  %v1947_v43 = vpop.eup %1946 }
 0x375   : > { %1948 = vtanh.f32 %v1395_v39 }
 0x376   : > { %1445 = vrot.lane.b32.xlu0 %v1412_v13, %s1965_s14  ;;  %1950 = vpow2.f32 %v1314_v44 }
 0x37b   : > { %v1949_v5 = vpop.eup %1948 }
 0x37c   : > { %v1413_v54 = vmul.f32 %v1949_v5, %v1947_v43  ;;  %v1951_v10 = vpop.eup %1950 }
 0x37d   : > { %v1324_v27 = vadd.f32 1.0, %v1951_v10 }
 0x37e   : > { %1447 = vrot.lane.b32.xlu1 %v1413_v54, %s1965_s14 }
 0x37f   : > { %1952 = vrcp.f32 %v1324_v27 }
 0x385   : > { %v1953_v61 = vpop.eup %1952 }
 0x390   : > { %v1378_v20 = vpop.permute.xlu2 %1377 }
 0x391   : > { %v1396_v3 = vadd.f32 %v1378_v20, %v1342_v55 }
 0x393   : > { %1954 = vtanh.f32 %v1396_v3 }
 0x398   : > { %v1438_v36 = vpop.permute.xlu2 %1437 }
 0x399   : > { %v1955_v59 = vpop.eup %1954  ;;  %v1463_v2 = vsel %vm1460_vm2, %v2470_v40, %v1438_v36  ;;  %v1482_v21 = vsel %vm1460_vm2, %v1438_v36, %v2470_v40 }
 0x39a   : > { %v1414_v48 = vmul.f32 %v1955_v59, %v1953_v61  ;;  %1472 = vst.msk [vmem:[%s2685_s17 + $0x10] sm:$0xff] %vm794_vm1, %v1463_v2 }
 0x39b   : > { %1717 = vst.msk [vmem:[%s2685_s17 + $0x58] sm:$0xff] %vm794_vm1, %v1482_v21 }
 0x39c   : > { %1449 = vrot.lane.b32.xlu2 %v1414_v48, %s1965_s14 }
 0x3b0   : > { %v1444_v34 = vpop.permute.xlu2 %1443 }
 0x3b1   : > { %v1466_v28 = vsel %vm1460_vm2, %v2489_v62, %v1444_v34  ;;  %v1485_v51 = vsel %vm1460_vm2, %v1444_v34, %v2489_v62 }
 0x3b2   : > { %1475 = vst.msk [vmem:[%s2685_s17 + $0x28] sm:$0xff] %vm794_vm1, %v1466_v28 }
 0x3b3   : > { %1720 = vst.msk [vmem:[%s2685_s17 + $0x70] sm:$0xff] %vm794_vm1, %v1485_v51 }
 0x3b8   : > { %v1434_v40 = vpop.permute.xlu0 %1433 }
 0x3b9   : > { %v1461_v32 = vsel %vm1460_vm2, %v2454_v24, %v1434_v40  ;;  %v1480_v50 = vsel %vm1460_vm2, %v1434_v40, %v2454_v24 }
 0x3ba   : > { %1470 = vst.msk [vmem:[%s2685_s17] sm:$0xff] %vm794_vm1, %v1461_v32 }
 0x3bb   : > { %1715 = vst.msk [vmem:[%s2685_s17 + $0x48] sm:$0xff] %vm794_vm1, %v1480_v50 }
 0x3c2   : > { %v1436_v62 = vpop.permute.xlu1 %1435 }
 0x3c3   : > { %v1462_v25 = vsel %vm1460_vm2, %v2785_v37, %v1436_v62  ;;  %v1481_v35 = vsel %vm1460_vm2, %v1436_v62, %v2785_v37 }
 0x3c4   : > { %1471 = vst.msk [vmem:[%s2685_s17 + $0x8] sm:$0xff] %vm794_vm1, %v1462_v25 }
 0x3c5   : > { %1716 = vst.msk [vmem:[%s2685_s17 + $0x50] sm:$0xff] %vm794_vm1, %v1481_v35 }
 0x3d0   : > { %v1440_v24 = vpop.permute.xlu0 %1439 }
 0x3d1   : > { %v1464_v4 = vsel %vm1460_vm2, %v2786_v15, %v1440_v24  ;;  %v1483_v45 = vsel %vm1460_vm2, %v1440_v24, %v2786_v15 }
 0x3d2   : > { %1473 = vst.msk [vmem:[%s2685_s17 + $0x18] sm:$0xff] %vm794_vm1, %v1464_v4 }
 0x3d3   : > { %1718 = vst.msk [vmem:[%s2685_s17 + $0x60] sm:$0xff] %vm794_vm1, %v1483_v45 }
 0x3d8   : > { %v1442_v52 = vpop.permute.xlu1 %1441 }
 0x3d9   : > { %v1465_v19 = vsel %vm1460_vm2, %v2787_v7, %v1442_v52  ;;  %v1484_v17 = vsel %vm1460_vm2, %v1442_v52, %v2787_v7 }
 0x3da   : > { %1474 = vst.msk [vmem:[%s2685_s17 + $0x20] sm:$0xff] %vm794_vm1, %v1465_v19 }
 0x3db   : > { %1719 = vst.msk [vmem:[%s2685_s17 + $0x68] sm:$0xff] %vm794_vm1, %v1484_v17 }
 0x3e8   : > { %v1446_v23 = vpop.permute.xlu0 %1445 }
 0x3e9   : > { %v1467_v57 = vsel %vm1460_vm2, %v2788_v33, %v1446_v23  ;;  %v1486_v6 = vsel %vm1460_vm2, %v1446_v23, %v2788_v33 }
 0x3ea   : > { %1476 = vst.msk [vmem:[%s2685_s17 + $0x30] sm:$0xff] %vm794_vm1, %v1467_v57 }
 0x3eb   : > { %1721 = vst.msk [vmem:[%s2685_s17 + $0x78] sm:$0xff] %vm794_vm1, %v1486_v6 }
 0x3f0   : > { %v1448_v60 = vpop.permute.xlu1 %1447 }
 0x3f1   : > { %v1468_v16 = vsel %vm1460_vm2, %v2789_v29, %v1448_v60  ;;  %v1487_v31 = vsel %vm1460_vm2, %v1448_v60, %v2789_v29 }
 0x3f2   : > { %1477 = vst.msk [vmem:[%s2685_s17 + $0x38] sm:$0xff] %vm794_vm1, %v1468_v16 }
 0x3f3   : > { %1722 = vst.msk [vmem:[%s2685_s17 + $0x80] sm:$0xff] %vm794_vm1, %v1487_v31 }
 0x3f6   : > { %v1450_v42 = vpop.permute.xlu2 %1449 }
 0x3f7   : > { %v1469_v0 = vsel %vm1460_vm2, %v2790_v11, %v1450_v42  ;;  %v1488_v14 = vsel %vm1460_vm2, %v1450_v42, %v2790_v11 }
 0x3f8   : > { %1479 = vst.msk [vmem:[%s2685_s17 + $0x40] sm:$0x3f] %vm1478_vm3, %v1469_v0 }
 0x3f9   : > { %1723 = vst.msk [vmem:[%s2685_s17 + $0x88] sm:$0x3f] %vm1478_vm3, %v1488_v14 }
 0x3fa PF: > { %s15_s18 = sadd.s32 1, %s1962_s18  }
 0x3fb   : > { %p12_p4 = scmp.ge.s32.totalorder %s15_s18, 4  }
 0x3fd   :  { %14 = sbr.rel (!%p12_p4) target bundleno = 1 (0x1), region = 84 }

// kernel: bilstm_short_forward.3
= control target key start
LH: loop header
LB: loop body
LE: loop exit
PB: predicated region body
PF: predicated region fallthrough
CT: control target
= control target key end

     0   :  { %vm3595_vm0 = vcmask 523264   ;;  %vm4375_vm1 = vcmask 1024   ;;  %s8069_s1 = inlined_call_operand.vmem [shape: bf16[6720,128], index: 1, kind: input, shape index: {}]   ;;  %s8070_s0 = inlined_call_operand.vmem [shape: f32[2,6720], index: 0, kind: input, shape index: {}]   ;;  %s8071_s2 = inlined_call_operand.vmem [shape: f32[1,128], index: 2, kind: input, shape index: {}]   ;;  %s8072_s4 = inlined_call_operand.vmem [shape: f32[1,128], index: 4, kind: input, shape index: {}]   ;;  %s8073_s3 = inlined_call_operand.vmem [shape: f32[128,128], index: 3, kind: input, shape index: {}]   ;;  %s8074_s5 = inlined_call_operand.vmem [shape: f32[128,1], index: 5, kind: input, shape index: {}]   ;;  %s8075_s6 = inlined_call_operand.<no memory space> [shape: f32[1,1], index: 6, kind: input, shape index: {}]   ;;  %s8076_s7 = inlined_call_operand.vmem [shape: f32[2,1], index: 7, kind: output, shape index: {}]  }
   0x1   :  { %v6069_v0 = vld [vmem:[%s8069_s1 + $0x38] sm:$0xff]  ;;  %v6068_v4 = vld [vmem:[%s8069_s1 + $0x30] sm:$0xff]  ;;  %v6067_v8 = vld [vmem:[%s8069_s1 + $0x28] sm:$0xff] }
   0x2   :  { %v6085_v1 = vld [vmem:[%s8069_s1 + $0xb8] sm:$0xff]  ;;  %3599 = vmatpush.bf16.msra.mxu0 %v6069_v0  ;;  %v6084_v5 = vld [vmem:[%s8069_s1 + $0xb0] sm:$0xff]  ;;  %v6083_v9 = vld [vmem:[%s8069_s1 + $0xa8] sm:$0xff] }
   0x3   :  { %v6093_v2 = vld [vmem:[%s8069_s1 + $0xf8] sm:$0xff]  ;;  %3625 = vmatpush.bf16.msra.mxu2 %v6085_v1  ;;  %v6092_v6 = vld [vmem:[%s8069_s1 + $0xf0] sm:$0xff]  ;;  %v6091_v10 = vld [vmem:[%s8069_s1 + $0xe8] sm:$0xff] }
   0x4   :  { %v6077_v3 = vld [vmem:[%s8069_s1 + $0x78] sm:$0xff]  ;;  %3638 = vmatpush.bf16.msra.mxu3 %v6093_v2  ;;  %v6076_v7 = vld [vmem:[%s8069_s1 + $0x70] sm:$0xff]  ;;  %v6075_v11 = vld [vmem:[%s8069_s1 + $0x68] sm:$0xff] }
   0x5   :  { %3612 = vmatpush.bf16.msra.mxu1 %v6077_v3  ;;  %v6066_v12 = vld [vmem:[%s8069_s1 + $0x20] sm:$0xff]  ;;  %v6065_v16 = vld [vmem:[%s8069_s1 + $0x18] sm:$0xff]  ;;  %v6064_v21 = vld [vmem:[%s8069_s1 + $0x10] sm:$0xff] }
   0x6   :  { %3600 = vmatpush.bf16.msra.mxu0 %v6068_v4  ;;  %v6082_v13 = vld [vmem:[%s8069_s1 + $0xa0] sm:$0xff]  ;;  %v6081_v17 = vld [vmem:[%s8069_s1 + $0x98] sm:$0xff]  ;;  %v6080_v22 = vld [vmem:[%s8069_s1 + $0x90] sm:$0xff] }
   0x7   :  { %3626 = vmatpush.bf16.msra.mxu2 %v6084_v5  ;;  %v6090_v14 = vld [vmem:[%s8069_s1 + $0xe0] sm:$0xff]  ;;  %v6089_v18 = vld [vmem:[%s8069_s1 + $0xd8] sm:$0xff]  ;;  %v6088_v23 = vld [vmem:[%s8069_s1 + $0xd0] sm:$0xff] }
   0x8   :  { %3639 = vmatpush.bf16.msra.mxu3 %v6092_v6  ;;  %v6074_v15 = vld [vmem:[%s8069_s1 + $0x60] sm:$0xff]  ;;  %v6073_v19 = vld [vmem:[%s8069_s1 + $0x58] sm:$0xff]  ;;  %v6072_v24 = vld [vmem:[%s8069_s1 + $0x50] sm:$0xff] }
   0x9   :  { %3613 = vmatpush.bf16.msra.mxu1 %v6076_v7  ;;  %v29_v20 = vld [vmem:[%s8070_s0] sm:$0xff]  ;;  %v6063_v25 = vld [vmem:[%s8069_s1 + $0x8] sm:$0xff]  ;;  %v31_v31 = vld [vmem:[%s8070_s0 + $0x10] sm:$0xff] }
   0xa   :  { %3601 = vmatpush.bf16.msra.mxu0 %v6067_v8  ;;  %57 = vst [vmem:[#allocation1] ss:$4 sm:$0xff] %v29_v20  ;;  %v6079_v26 = vld [vmem:[%s8069_s1 + $0x88] sm:$0xff]  ;;  %v6062_v29 = vld [vmem:[%s8069_s1] sm:$0xff]  ;;  %v6101_v37 = vld [vmem:[%s8069_s1 + $0x138] sm:$0xff] }
   0xb   :  { %3627 = vmatpush.bf16.msra.mxu2 %v6083_v9  ;;  %v6087_v27 = vld [vmem:[%s8069_s1 + $0xc8] sm:$0xff]  ;;  %v6078_v30 = vld [vmem:[%s8069_s1 + $0x80] sm:$0xff]  ;;  %v6117_v38 = vld [vmem:[%s8069_s1 + $0x1b8] sm:$0xff] }
   0xc   :  { %3640 = vmatpush.bf16.msra.mxu3 %v6091_v10  ;;  %v6071_v28 = vld [vmem:[%s8069_s1 + $0x48] sm:$0xff]  ;;  %v6086_v36 = vld [vmem:[%s8069_s1 + $0xc0] sm:$0xff]  ;;  %v6125_v39 = vld [vmem:[%s8069_s1 + $0x1f8] sm:$0xff] }
   0xd   :  { %3614 = vmatpush.bf16.msra.mxu1 %v6075_v11  ;;  %v6070_v40 = vld [vmem:[%s8069_s1 + $0x40] sm:$0xff]  ;;  %v30_v42 = vld [vmem:[%s8070_s0 + $0x8] sm:$0xff]  ;;  %v6109_v43 = vld [vmem:[%s8069_s1 + $0x178] sm:$0xff] }
   0xe   :  { %3602 = vmatpush.bf16.msra.mxu0 %v6066_v12  ;;  %59 = vst [vmem:[#allocation1 + $0x20] ss:$4 sm:$0xff] %v30_v42  ;;  %v6100_v45 = vld [vmem:[%s8069_s1 + $0x130] sm:$0xff]  ;;  %v6099_v51 = vld [vmem:[%s8069_s1 + $0x128] sm:$0xff]  ;;  %v6098_v56 = vld [vmem:[%s8069_s1 + $0x120] sm:$0xff] }
   0xf   :  { %3628 = vmatpush.bf16.msra.mxu2 %v6082_v13  ;;  %v6116_v47 = vld [vmem:[%s8069_s1 + $0x1b0] sm:$0xff]  ;;  %v6115_v52 = vld [vmem:[%s8069_s1 + $0x1a8] sm:$0xff]  ;;  %v32_v58 = vld [vmem:[%s8070_s0 + $0x18] sm:$0xff] }
  0x10   :  { %3641 = vmatpush.bf16.msra.mxu3 %v6090_v14  ;;  %v6124_v48 = vld [vmem:[%s8069_s1 + $0x1f0] sm:$0xff]  ;;  %v6123_v53 = vld [vmem:[%s8069_s1 + $0x1e8] sm:$0xff]  ;;  %v6114_v61 = vld [vmem:[%s8069_s1 + $0x1a0] sm:$0xff] }
  0x11   :  { %3615 = vmatpush.bf16.msra.mxu1 %v6074_v15  ;;  %v62_v32 = vld.sshfl [vmem:[#allocation1 + $0x10] sm:$0xff pattern:$0x73625140]  ;;  %v60_v33 = vld.sshfl [vmem:[#allocation1] sm:$0xff pattern:$0x73625140] }
  0x12   :  { %3603 = vmatpush.bf16.msra.mxu0 %v6065_v16  ;;  %v63_v34 = vld.sshfl [vmem:[#allocation1 + $0x18] sm:$0xff pattern:$0x73625140]  ;;  %v61_v35 = vld.sshfl [vmem:[#allocation1 + $0x8] sm:$0xff pattern:$0x73625140]  ;;  %v180_v41 = vpack.c.bf16 %v62_v32, %v62_v32  ;;  %v178_v44 = vpack.c.bf16 %v60_v33, %v60_v33 }
  0x13   :  { %3629 = vmatpush.bf16.msra.mxu2 %v6081_v17  ;;  %68 = vst [vmem:[#allocation1] ss:$4 sm:$0xff] %v31_v31  ;;  %v181_v46 = vpack.c.bf16 %v63_v34, %v63_v34  ;;  %v179_v49 = vpack.c.bf16 %v61_v35, %v61_v35  ;;  %v6108_v50 = vld [vmem:[%s8069_s1 + $0x170] sm:$0xff]  ;;  %v6107_v54 = vld [vmem:[%s8069_s1 + $0x168] sm:$0xff]  ;;  %v6122_v62 = vld [vmem:[%s8069_s1 + $0x1e0] sm:$0xff] }
  0x14   :  { %3642 = vmatpush.bf16.msra.mxu3 %v6089_v18  ;;  %v6106_v63 = vld [vmem:[%s8069_s1 + $0x160] sm:$0xff]  ;;  %v6097_v0 = vld [vmem:[%s8069_s1 + $0x118] sm:$0xff]  ;;  %v6096_v4 = vld [vmem:[%s8069_s1 + $0x110] sm:$0xff] }
  0x15   :  { %3616 = vmatpush.bf16.msra.mxu1 %v6073_v19  ;;  %v6670_v55 = vld.sshfl [vmem:[#allocation1 + $0x30] sm:$0xff pattern:$0x73625140]  ;;  %v6675_v57 = vld.sshfl [vmem:[#allocation1 + $0x20] sm:$0xff pattern:$0x73625140] }
  0x16   :  { %3604 = vmatpush.bf16.msra.mxu0 %v6064_v21  ;;  %v6680_v59 = vld.sshfl [vmem:[#allocation1 + $0x38] sm:$0xff pattern:$0x73625140]  ;;  %v6682_v60 = vld.sshfl [vmem:[#allocation1 + $0x28] sm:$0xff pattern:$0x73625140]  ;;  %v184_v20 = vpack.c.bf16 %v6670_v55, %v6670_v55 }
  0x17   :  { %3630 = vmatpush.bf16.msra.mxu2 %v6080_v22  ;;  %69 = vst [vmem:[#allocation1 + $0x20] ss:$4 sm:$0xff] %v32_v58  ;;  %v6113_v1 = vld [vmem:[%s8069_s1 + $0x198] sm:$0xff]  ;;  %v6112_v5 = vld [vmem:[%s8069_s1 + $0x190] sm:$0xff]  ;;  %v6095_v8 = vld [vmem:[%s8069_s1 + $0x108] sm:$0xff]  ;;  %v182_v22 = vpack.c.bf16 %v6675_v57, %v6675_v57 }
  0x18   :  { %3643 = vmatpush.bf16.msra.mxu3 %v6088_v23  ;;  %v6121_v2 = vld [vmem:[%s8069_s1 + $0x1d8] sm:$0xff]  ;;  %v6120_v6 = vld [vmem:[%s8069_s1 + $0x1d0] sm:$0xff]  ;;  %v6111_v9 = vld [vmem:[%s8069_s1 + $0x188] sm:$0xff]  ;;  %v185_v23 = vpack.c.bf16 %v6680_v59, %v6680_v59 }
  0x19   :  { %3617 = vmatpush.bf16.msra.mxu1 %v6072_v24  ;;  %v6105_v3 = vld [vmem:[%s8069_s1 + $0x158] sm:$0xff]  ;;  %v6104_v7 = vld [vmem:[%s8069_s1 + $0x150] sm:$0xff]  ;;  %v6119_v10 = vld [vmem:[%s8069_s1 + $0x1c8] sm:$0xff] }
  0x1a   :  { %3605 = vmatpush.bf16.msra.mxu0 %v6063_v25  ;;  %v6103_v11 = vld [vmem:[%s8069_s1 + $0x148] sm:$0xff]  ;;  %v6094_v12 = vld [vmem:[%s8069_s1 + $0x100] sm:$0xff]  ;;  %v6133_v15 = vld [vmem:[%s8069_s1 + $0x238] sm:$0xff] }
  0x1b   :  { %3631 = vmatpush.bf16.msra.mxu2 %v6079_v26  ;;  %v6110_v13 = vld [vmem:[%s8069_s1 + $0x180] sm:$0xff]  ;;  %v6149_v16 = vld [vmem:[%s8069_s1 + $0x2b8] sm:$0xff]  ;;  %v6132_v21 = vld [vmem:[%s8069_s1 + $0x230] sm:$0xff] }
  0x1c   :  { %3644 = vmatpush.bf16.msra.mxu3 %v6087_v27  ;;  %v6118_v14 = vld [vmem:[%s8069_s1 + $0x1c0] sm:$0xff]  ;;  %v6157_v17 = vld [vmem:[%s8069_s1 + $0x2f8] sm:$0xff]  ;;  %v6148_v24 = vld [vmem:[%s8069_s1 + $0x2b0] sm:$0xff]  ;;  %v183_v27 = vpack.c.bf16 %v6682_v60, %v6682_v60 }
  0x1d   :  { %3618 = vmatpush.bf16.msra.mxu1 %v6071_v28  ;;  %v6102_v18 = vld [vmem:[%s8069_s1 + $0x140] sm:$0xff]  ;;  %v6141_v19 = vld [vmem:[%s8069_s1 + $0x278] sm:$0xff]  ;;  %v6156_v25 = vld [vmem:[%s8069_s1 + $0x2f0] sm:$0xff] }
  0x1e   :  { %3606 = vmatpush.bf16.msra.mxu0 %v6062_v29  ;;  %v6768_v26 = vld.sshfl [vmem:[#allocation1] sm:$0xff pattern:$0x73625140]  ;;  %v6772_v28 = vld.sshfl [vmem:[#allocation1 + $0x10] sm:$0xff pattern:$0x73625140] }
  0x1f   :  { %3632 = vmatpush.bf16.msra.mxu2 %v6078_v30  ;;  %v6774_v29 = vld.sshfl [vmem:[#allocation1 + $0x8] sm:$0xff pattern:$0x73625140]  ;;  %v6140_v30 = vld [vmem:[%s8069_s1 + $0x270] sm:$0xff]  ;;  %v33_v31 = vld [vmem:[%s8070_s0 + $0x20] sm:$0xff]  ;;  %v186_v60 = vpack.c.bf16 %v6768_v26, %v6768_v26 }
  0x20   :  { %3645 = vmatpush.bf16.msra.mxu3 %v6086_v36  ;;  %v6782_v32 = vld.sshfl [vmem:[#allocation1 + $0x18] sm:$0xff pattern:$0x73625140]  ;;  %v6131_v33 = vld [vmem:[%s8069_s1 + $0x228] sm:$0xff]  ;;  %v6150_v55 = vld [vmem:[%s8069_s1 + $0x2c0] sm:$0xff] }
  0x21   :  { %3619 = vmatpush.bf16.msra.mxu1 %v6070_v40  ;;  %3607 = vmatmul.bf16.vlgmr.msra.gmra.mxu0 %v178_v44  ;;  %78 = vst [vmem:[#allocation1] ss:$4 sm:$0xff] %v33_v31  ;;  %v6147_v34 = vld [vmem:[%s8069_s1 + $0x2a8] sm:$0xff]  ;;  %v6138_v40 = vld [vmem:[%s8069_s1 + $0x260] sm:$0xff]  ;;  %v6145_v42 = vld [vmem:[%s8069_s1 + $0x298] sm:$0xff] }
  0x22   :  { %3651 = vmatpush.bf16.msrb.mxu0 %v6101_v37  ;;  %3633 = vmatmul.bf16.vlgmr.msra.gmra.mxu2 %v180_v41  ;;  %v6155_v35 = vld [vmem:[%s8069_s1 + $0x2e8] sm:$0xff]  ;;  %v6130_v37 = vld [vmem:[%s8069_s1 + $0x220] sm:$0xff]  ;;  %v6129_v41 = vld [vmem:[%s8069_s1 + $0x218] sm:$0xff] }
  0x23   :  { %3677 = vmatpush.bf16.msrb.mxu2 %v6117_v38  ;;  %3646 = vmatmul.bf16.vlgmr.msra.gmra.mxu3 %v181_v46  ;;  %v6139_v36 = vld [vmem:[%s8069_s1 + $0x268] sm:$0xff]  ;;  %v6146_v38 = vld [vmem:[%s8069_s1 + $0x2a0] sm:$0xff]  ;;  %v6137_v44 = vld [vmem:[%s8069_s1 + $0x258] sm:$0xff] }
  0x24   :  { %3690 = vmatpush.bf16.msrb.mxu3 %v6125_v39  ;;  %3620 = vmatmul.bf16.vlgmr.msra.gmra.mxu1 %v179_v49  ;;  %v6154_v39 = vld [vmem:[%s8069_s1 + $0x2e0] sm:$0xff]  ;;  %v6144_v46 = vld [vmem:[%s8069_s1 + $0x290] sm:$0xff]  ;;  %v6127_v49 = vld [vmem:[%s8069_s1 + $0x208] sm:$0xff] }
  0x25   :  { %3664 = vmatpush.bf16.msrb.mxu1 %v6109_v43  ;;  %v6153_v43 = vld [vmem:[%s8069_s1 + $0x2d8] sm:$0xff]  ;;  %v6134_v59 = vld [vmem:[%s8069_s1 + $0x240] sm:$0xff]  ;;  %v6159_v26 = vld [vmem:[%s8069_s1 + $0x308] sm:$0xff] }
  0x26   :  { %3652 = vmatpush.bf16.msrb.mxu0 %v6100_v45  ;;  %v6128_v45 = vld [vmem:[%s8069_s1 + $0x210] sm:$0xff]  ;;  %v6181_v57 = vld [vmem:[%s8069_s1 + $0x3b8] sm:$0xff]  ;;  %v6174_v31 = vld [vmem:[%s8069_s1 + $0x380] sm:$0xff] }
  0x27   :  { %3678 = vmatpush.bf16.msrb.mxu2 %v6116_v47  ;;  %v6152_v47 = vld [vmem:[%s8069_s1 + $0x2d0] sm:$0xff]  ;;  %v6189_v58 = vld [vmem:[%s8069_s1 + $0x3f8] sm:$0xff] }
  0x28   :  { %3691 = vmatpush.bf16.msrb.mxu3 %v6124_v48  ;;  %v6136_v48 = vld [vmem:[%s8069_s1 + $0x250] sm:$0xff] }
  0x29   :  { %3665 = vmatpush.bf16.msrb.mxu1 %v6108_v50  ;;  %v6143_v50 = vld [vmem:[%s8069_s1 + $0x288] sm:$0xff] }
  0x2a   :  { %3653 = vmatpush.bf16.msrb.mxu0 %v6099_v51  ;;  %v6151_v51 = vld [vmem:[%s8069_s1 + $0x2c8] sm:$0xff] }
  0x2b   :  { %3679 = vmatpush.bf16.msrb.mxu2 %v6115_v52  ;;  %v6135_v52 = vld [vmem:[%s8069_s1 + $0x248] sm:$0xff] }
  0x2c   :  { %3692 = vmatpush.bf16.msrb.mxu3 %v6123_v53  ;;  %v6126_v53 = vld [vmem:[%s8069_s1 + $0x200] sm:$0xff] }
  0x2d   :  { %3666 = vmatpush.bf16.msrb.mxu1 %v6107_v54  ;;  %v6142_v54 = vld [vmem:[%s8069_s1 + $0x280] sm:$0xff] }
  0x2e   :  { %3654 = vmatpush.bf16.msrb.mxu0 %v6098_v56  ;;  %v6165_v56 = vld [vmem:[%s8069_s1 + $0x338] sm:$0xff] }
  0x2f   :  { %3680 = vmatpush.bf16.msrb.mxu2 %v6114_v61  ;;  %v188_v61 = vpack.c.bf16 %v6772_v28, %v6772_v28  ;;  %v6183_v28 = vld [vmem:[%s8069_s1 + $0x3c8] sm:$0xff] }
  0x30   :  { %3693 = vmatpush.bf16.msrb.mxu3 %v6122_v62  ;;  %v6173_v62 = vld [vmem:[%s8069_s1 + $0x378] sm:$0xff] }
  0x31   :  { %3667 = vmatpush.bf16.msrb.mxu1 %v6106_v63  ;;  %v189_v63 = vpack.c.bf16 %v6782_v32, %v6782_v32  ;;  %v6197_v32 = vld [vmem:[%s8069_s1 + $0x438] sm:$0xff] }
  0x32   :  { %3655 = vmatpush.bf16.msrb.mxu0 %v6097_v0  ;;  %v6164_v0 = vld [vmem:[%s8069_s1 + $0x330] sm:$0xff] }
  0x33   :  { %3681 = vmatpush.bf16.msrb.mxu2 %v6113_v1  ;;  %v6180_v1 = vld [vmem:[%s8069_s1 + $0x3b0] sm:$0xff] }
  0x34   :  { %3694 = vmatpush.bf16.msrb.mxu3 %v6121_v2  ;;  %v6880_v2 = vld.sshfl [vmem:[#allocation1 + $0x20] sm:$0xff pattern:$0x73625140] }
  0x35   :  { %3668 = vmatpush.bf16.msrb.mxu1 %v6105_v3  ;;  %v187_v3 = vpack.c.bf16 %v6774_v29, %v6774_v29  ;;  %v6167_v29 = vld [vmem:[%s8069_s1 + $0x348] sm:$0xff] }
  0x36   :  { %3656 = vmatpush.bf16.msrb.mxu0 %v6096_v4  ;;  %v6884_v4 = vld.sshfl [vmem:[#allocation1 + $0x30] sm:$0xff pattern:$0x73625140] }
  0x37   :  { %3682 = vmatpush.bf16.msrb.mxu2 %v6112_v5  ;;  %v6886_v5 = vld.sshfl [vmem:[#allocation1 + $0x28] sm:$0xff pattern:$0x73625140] }
  0x38   :  { %3695 = vmatpush.bf16.msrb.mxu3 %v6120_v6  ;;  %v6188_v6 = vld [vmem:[%s8069_s1 + $0x3f0] sm:$0xff] }
  0x39   :  { %3669 = vmatpush.bf16.msrb.mxu1 %v6104_v7  ;;  %v34_v7 = vld [vmem:[%s8070_s0 + $0x28] sm:$0xff] }
  0x3a   :  { %3657 = vmatpush.bf16.msrb.mxu0 %v6095_v8  ;;  %v6894_v8 = vld.sshfl [vmem:[#allocation1 + $0x38] sm:$0xff pattern:$0x73625140] }
  0x3b   :  { %3683 = vmatpush.bf16.msrb.mxu2 %v6111_v9  ;;  %v6172_v9 = vld [vmem:[%s8069_s1 + $0x370] sm:$0xff]  ;;  %79 = vst [vmem:[#allocation1 + $0x20] ss:$4 sm:$0xff] %v34_v7  ;;  %v6229_v7 = vld [vmem:[%s8069_s1 + $0x538] sm:$0xff] }
  0x3c   :  { %3696 = vmatpush.bf16.msrb.mxu3 %v6119_v10  ;;  %v6163_v10 = vld [vmem:[%s8069_s1 + $0x328] sm:$0xff] }
  0x3d   :  { %3670 = vmatpush.bf16.msrb.mxu1 %v6103_v11  ;;  %v6179_v11 = vld [vmem:[%s8069_s1 + $0x3a8] sm:$0xff] }
  0x3e   :  { %3658 = vmatpush.bf16.msrb.mxu0 %v6094_v12  ;;  %v6187_v12 = vld [vmem:[%s8069_s1 + $0x3e8] sm:$0xff] }
  0x3f   :  { %3684 = vmatpush.bf16.msrb.mxu2 %v6110_v13  ;;  %v6171_v13 = vld [vmem:[%s8069_s1 + $0x368] sm:$0xff] }
  0x40   :  { %3697 = vmatpush.bf16.msrb.mxu3 %v6118_v14  ;;  %v6162_v14 = vld [vmem:[%s8069_s1 + $0x320] sm:$0xff] }
  0x41   :  { %3671 = vmatpush.bf16.msrb.mxu1 %v6102_v18  ;;  %3659 = vmatmul.bf16.vlgmr.msrb.gmra.mxu0 %v182_v22  ;;  %v6161_v18 = vld [vmem:[%s8069_s1 + $0x318] sm:$0xff]  ;;  %v6160_v22 = vld [vmem:[%s8069_s1 + $0x310] sm:$0xff] }
  0x42   :  { %3703 = vmatpush.bf16.msra.mxu0 %v6133_v15  ;;  %3685 = vmatmul.bf16.vlgmr.msrb.gmra.mxu2 %v184_v20  ;;  %v6178_v15 = vld [vmem:[%s8069_s1 + $0x3a0] sm:$0xff]  ;;  %v6185_v20 = vld [vmem:[%s8069_s1 + $0x3d8] sm:$0xff] }
  0x43   :  { %3729 = vmatpush.bf16.msra.mxu2 %v6149_v16  ;;  %3698 = vmatmul.bf16.vlgmr.msrb.gmra.mxu3 %v185_v23  ;;  %v6186_v16 = vld [vmem:[%s8069_s1 + $0x3e0] sm:$0xff]  ;;  %v6176_v23 = vld [vmem:[%s8069_s1 + $0x390] sm:$0xff] }
  0x44   :  { %3742 = vmatpush.bf16.msra.mxu3 %v6157_v17  ;;  %3672 = vmatmul.bf16.vlgmr.msrb.gmra.mxu1 %v183_v27  ;;  %v6170_v17 = vld [vmem:[%s8069_s1 + $0x360] sm:$0xff]  ;;  %v6175_v27 = vld [vmem:[%s8069_s1 + $0x388] sm:$0xff] }
  0x45   :  { %3716 = vmatpush.bf16.msra.mxu1 %v6141_v19  ;;  %v6177_v19 = vld [vmem:[%s8069_s1 + $0x398] sm:$0xff] }
  0x46   :  { %3704 = vmatpush.bf16.msra.mxu0 %v6132_v21  ;;  %v6169_v21 = vld [vmem:[%s8069_s1 + $0x358] sm:$0xff] }
  0x47   :  { %3730 = vmatpush.bf16.msra.mxu2 %v6148_v24  ;;  %v6184_v24 = vld [vmem:[%s8069_s1 + $0x3d0] sm:$0xff] }
  0x48   :  { %3743 = vmatpush.bf16.msra.mxu3 %v6156_v25  ;;  %v6168_v25 = vld [vmem:[%s8069_s1 + $0x350] sm:$0xff] }
  0x49   :  { %3717 = vmatpush.bf16.msra.mxu1 %v6140_v30  ;;  %v6158_v30 = vld [vmem:[%s8069_s1 + $0x300] sm:$0xff] }
  0x4a   :  { %3705 = vmatpush.bf16.msra.mxu0 %v6131_v33  ;;  %v6182_v33 = vld [vmem:[%s8069_s1 + $0x3c0] sm:$0xff] }
  0x4b   :  { %3731 = vmatpush.bf16.msra.mxu2 %v6147_v34  ;;  %v6213_v34 = vld [vmem:[%s8069_s1 + $0x4b8] sm:$0xff] }
  0x4c   :  { %3744 = vmatpush.bf16.msra.mxu3 %v6155_v35  ;;  %v6221_v35 = vld [vmem:[%s8069_s1 + $0x4f8] sm:$0xff] }
  0x4d   :  { %3718 = vmatpush.bf16.msra.mxu1 %v6139_v36  ;;  %v6166_v36 = vld [vmem:[%s8069_s1 + $0x340] sm:$0xff] }
  0x4e   :  { %3706 = vmatpush.bf16.msra.mxu0 %v6130_v37  ;;  %v190_v37 = vpack.c.bf16 %v6880_v2, %v6880_v2  ;;  %v6190_v2 = vld [vmem:[%s8069_s1 + $0x400] sm:$0xff] }
  0x4f   :  { %3732 = vmatpush.bf16.msra.mxu2 %v6146_v38  ;;  %v192_v38 = vpack.c.bf16 %v6884_v4, %v6884_v4  ;;  %v6214_v4 = vld [vmem:[%s8069_s1 + $0x4c0] sm:$0xff] }
  0x50   :  { %3745 = vmatpush.bf16.msra.mxu3 %v6154_v39  ;;  %v6205_v39 = vld [vmem:[%s8069_s1 + $0x478] sm:$0xff] }
  0x51   :  { %3719 = vmatpush.bf16.msra.mxu1 %v6138_v40  ;;  %v193_v40 = vpack.c.bf16 %v6894_v8, %v6894_v8  ;;  %v6245_v8 = vld [vmem:[%s8069_s1 + $0x5b8] sm:$0xff] }
  0x52   :  { %3707 = vmatpush.bf16.msra.mxu0 %v6129_v41  ;;  %v191_v41 = vpack.c.bf16 %v6886_v5, %v6886_v5  ;;  %v80_v5 = vld.sshfl [vmem:[#allocation1] sm:$0xff pattern:$0x73625140] }
  0x53   :  { %3733 = vmatpush.bf16.msra.mxu2 %v6145_v42  ;;  %v6196_v42 = vld [vmem:[%s8069_s1 + $0x430] sm:$0xff] }
  0x54   :  { %3746 = vmatpush.bf16.msra.mxu3 %v6153_v43  ;;  %v6212_v43 = vld [vmem:[%s8069_s1 + $0x4b0] sm:$0xff] }
  0x55   :  { %3720 = vmatpush.bf16.msra.mxu1 %v6137_v44  ;;  %v6220_v44 = vld [vmem:[%s8069_s1 + $0x4f0] sm:$0xff] }
  0x56   :  { %3708 = vmatpush.bf16.msra.mxu0 %v6128_v45  ;;  %v6204_v45 = vld [vmem:[%s8069_s1 + $0x470] sm:$0xff] }
  0x57   :  { %3734 = vmatpush.bf16.msra.mxu2 %v6144_v46  ;;  %v6195_v46 = vld [vmem:[%s8069_s1 + $0x428] sm:$0xff] }
  0x58   :  { %3747 = vmatpush.bf16.msra.mxu3 %v6152_v47  ;;  %v6211_v47 = vld [vmem:[%s8069_s1 + $0x4a8] sm:$0xff] }
  0x59   :  { %3721 = vmatpush.bf16.msra.mxu1 %v6136_v48  ;;  %v6219_v48 = vld [vmem:[%s8069_s1 + $0x4e8] sm:$0xff] }
  0x5a   :  { %3709 = vmatpush.bf16.msra.mxu0 %v6127_v49  ;;  %v6203_v49 = vld [vmem:[%s8069_s1 + $0x468] sm:$0xff] }
  0x5b   :  { %3735 = vmatpush.bf16.msra.mxu2 %v6143_v50  ;;  %v6194_v50 = vld [vmem:[%s8069_s1 + $0x420] sm:$0xff] }
  0x5c   :  { %3748 = vmatpush.bf16.msra.mxu3 %v6151_v51  ;;  %v6210_v51 = vld [vmem:[%s8069_s1 + $0x4a0] sm:$0xff] }
  0x5d   :  { %3722 = vmatpush.bf16.msra.mxu1 %v6135_v52  ;;  %v6218_v52 = vld [vmem:[%s8069_s1 + $0x4e0] sm:$0xff] }
  0x5e   :  { %3710 = vmatpush.bf16.msra.mxu0 %v6126_v53  ;;  %v6202_v53 = vld [vmem:[%s8069_s1 + $0x460] sm:$0xff] }
  0x5f   :  { %3736 = vmatpush.bf16.msra.mxu2 %v6142_v54  ;;  %v6193_v54 = vld [vmem:[%s8069_s1 + $0x418] sm:$0xff] }
  0x60   :  { %3749 = vmatpush.bf16.msra.mxu3 %v6150_v55  ;;  %v6209_v55 = vld [vmem:[%s8069_s1 + $0x498] sm:$0xff] }
  0x61   :  { %3723 = vmatpush.bf16.msra.mxu1 %v6134_v59  ;;  %3711 = vmatmul.bf16.vlgmr.msra.gmra.mxu0 %v186_v60  ;;  %v6208_v59 = vld [vmem:[%s8069_s1 + $0x490] sm:$0xff] }
  0x62   :  { %3755 = vmatpush.bf16.msrb.mxu0 %v6165_v56  ;;  %3737 = vmatmul.bf16.vlgmr.msra.gmra.mxu2 %v188_v61  ;;  %v6217_v56 = vld [vmem:[%s8069_s1 + $0x4d8] sm:$0xff]  ;;  %v6216_v60 = vld [vmem:[%s8069_s1 + $0x4d0] sm:$0xff] }
  0x63   :  { %3781 = vmatpush.bf16.msrb.mxu2 %v6181_v57  ;;  %3750 = vmatmul.bf16.vlgmr.msra.gmra.mxu3 %v189_v63  ;;  %v6201_v57 = vld [vmem:[%s8069_s1 + $0x458] sm:$0xff]  ;;  %v6200_v61 = vld [vmem:[%s8069_s1 + $0x450] sm:$0xff]  ;;  %v6207_v63 = vld [vmem:[%s8069_s1 + $0x488] sm:$0xff] }
  0x64   :  { %3794 = vmatpush.bf16.msrb.mxu3 %v6189_v58  ;;  %3724 = vmatmul.bf16.vlgmr.msra.gmra.mxu1 %v187_v3  ;;  %v6192_v58 = vld [vmem:[%s8069_s1 + $0x410] sm:$0xff]  ;;  %v6206_v3 = vld [vmem:[%s8069_s1 + $0x480] sm:$0xff] }
  0x65   :  { %3768 = vmatpush.bf16.msrb.mxu1 %v6173_v62  ;;  %v6191_v62 = vld [vmem:[%s8069_s1 + $0x408] sm:$0xff] }
  0x66   :  { %3756 = vmatpush.bf16.msrb.mxu0 %v6164_v0  ;;  %v6215_v0 = vld [vmem:[%s8069_s1 + $0x4c8] sm:$0xff] }
  0x67   :  { %3782 = vmatpush.bf16.msrb.mxu2 %v6180_v1  ;;  %v6199_v1 = vld [vmem:[%s8069_s1 + $0x448] sm:$0xff] }
  0x68   :  { %3795 = vmatpush.bf16.msrb.mxu3 %v6188_v6  ;;  %v82_v6 = vld.sshfl [vmem:[#allocation1 + $0x10] sm:$0xff pattern:$0x73625140] }
  0x69   :  { %3769 = vmatpush.bf16.msrb.mxu1 %v6172_v9  ;;  %v83_v9 = vld.sshfl [vmem:[#allocation1 + $0x18] sm:$0xff pattern:$0x73625140] }
  0x6a   :  { %3757 = vmatpush.bf16.msrb.mxu0 %v6163_v10  ;;  %v6253_v10 = vld [vmem:[%s8069_s1 + $0x5f8] sm:$0xff] }
  0x6b   :  { %3783 = vmatpush.bf16.msrb.mxu2 %v6179_v11  ;;  %v6198_v11 = vld [vmem:[%s8069_s1 + $0x440] sm:$0xff] }
  0x6c   :  { %3796 = vmatpush.bf16.msrb.mxu3 %v6187_v12  ;;  %v81_v12 = vld.sshfl [vmem:[#allocation1 + $0x8] sm:$0xff pattern:$0x73625140] }
  0x6d   :  { %3770 = vmatpush.bf16.msrb.mxu1 %v6171_v13  ;;  %v194_v13 = vpack.c.bf16 %v80_v5, %v80_v5  ;;  %v6269_v5 = vld [vmem:[%s8069_s1 + $0x678] sm:$0xff] }
  0x6e   :  { %3758 = vmatpush.bf16.msrb.mxu0 %v6162_v14  ;;  %v196_v14 = vpack.c.bf16 %v82_v6, %v82_v6 }
  0x6f   :  { %3784 = vmatpush.bf16.msrb.mxu2 %v6178_v15  ;;  %v6237_v15 = vld [vmem:[%s8069_s1 + $0x578] sm:$0xff] }
  0x70   :  { %3797 = vmatpush.bf16.msrb.mxu3 %v6186_v16  ;;  %v197_v16 = vpack.c.bf16 %v83_v9, %v83_v9  ;;  %v6276_v9 = vld [vmem:[%s8069_s1 + $0x6b0] sm:$0xff] }
  0x71   :  { %3771 = vmatpush.bf16.msrb.mxu1 %v6170_v17  ;;  %v195_v17 = vpack.c.bf16 %v81_v12, %v81_v12  ;;  %v6259_v12 = vld [vmem:[%s8069_s1 + $0x628] sm:$0xff] }
  0x72   :  { %3759 = vmatpush.bf16.msrb.mxu0 %v6161_v18  ;;  %v6228_v18 = vld [vmem:[%s8069_s1 + $0x530] sm:$0xff] }
  0x73   :  { %3785 = vmatpush.bf16.msrb.mxu2 %v6177_v19  ;;  %v6244_v19 = vld [vmem:[%s8069_s1 + $0x5b0] sm:$0xff] }
  0x74   :  { %3798 = vmatpush.bf16.msrb.mxu3 %v6185_v20  ;;  %v6252_v20 = vld [vmem:[%s8069_s1 + $0x5f0] sm:$0xff] }
  0x75   :  { %3772 = vmatpush.bf16.msrb.mxu1 %v6169_v21  ;;  %v6236_v21 = vld [vmem:[%s8069_s1 + $0x570] sm:$0xff] }
  0x76   :  { %3760 = vmatpush.bf16.msrb.mxu0 %v6160_v22  ;;  %v6227_v22 = vld [vmem:[%s8069_s1 + $0x528] sm:$0xff] }
  0x77   :  { %3786 = vmatpush.bf16.msrb.mxu2 %v6176_v23  ;;  %v6243_v23 = vld [vmem:[%s8069_s1 + $0x5a8] sm:$0xff] }
  0x78   :  { %3799 = vmatpush.bf16.msrb.mxu3 %v6184_v24  ;;  %v6251_v24 = vld [vmem:[%s8069_s1 + $0x5e8] sm:$0xff] }
  0x79   :  { %3773 = vmatpush.bf16.msrb.mxu1 %v6168_v25  ;;  %v6482_v25 = vld [vmem:[%s8071_s2] ss:$0 sm:$0xff] }
  0x7a   :  { %3761 = vmatpush.bf16.msrb.mxu0 %v6159_v26  ;;  %v6235_v26 = vld [vmem:[%s8069_s1 + $0x568] sm:$0xff] }
  0x7b   :  { %3787 = vmatpush.bf16.msrb.mxu2 %v6175_v27  ;;  %v6226_v27 = vld [vmem:[%s8069_s1 + $0x520] sm:$0xff] }
  0x7c   :  { %3800 = vmatpush.bf16.msrb.mxu3 %v6183_v28  ;;  %v6242_v28 = vld [vmem:[%s8069_s1 + $0x5a0] sm:$0xff] }
  0x7d   :  { %3774 = vmatpush.bf16.msrb.mxu1 %v6167_v29  ;;  %v6250_v29 = vld [vmem:[%s8069_s1 + $0x5e0] sm:$0xff] }
  0x7e   :  { %3762 = vmatpush.bf16.msrb.mxu0 %v6158_v30 }
  0x7f   :  { %3788 = vmatpush.bf16.msrb.mxu2 %v6174_v31 }
  0x80   :  { %3801 = vmatpush.bf16.msrb.mxu3 %v6182_v33  ;;  %v6225_v33 = vld [vmem:[%s8069_s1 + $0x518] sm:$0xff] }
  0x81   :  { %3775 = vmatpush.bf16.msrb.mxu1 %v6166_v36  ;;  %3763 = vmatmul.bf16.vlgmr.msrb.gmra.mxu0 %v190_v37  ;;  %v6249_v36 = vld [vmem:[%s8069_s1 + $0x5d8] sm:$0xff] }
  0x82   :  { %3807 = vmatpush.bf16.msra.mxu0 %v6197_v32  ;;  %3789 = vmatmul.bf16.vlgmr.msrb.gmra.mxu2 %v192_v38  ;;  %v6234_v32 = vld [vmem:[%s8069_s1 + $0x560] sm:$0xff] }
  0x83   :  { %3833 = vmatpush.bf16.msra.mxu2 %v6213_v34  ;;  %3802 = vmatmul.bf16.vlgmr.msrb.gmra.mxu3 %v193_v40 }
  0x84   :  { %3846 = vmatpush.bf16.msra.mxu3 %v6221_v35  ;;  %3776 = vmatmul.bf16.vlgmr.msrb.gmra.mxu1 %v191_v41  ;;  %v6241_v35 = vld [vmem:[%s8069_s1 + $0x598] sm:$0xff]  ;;  %v6224_v41 = vld [vmem:[%s8069_s1 + $0x510] sm:$0xff] }
  0x85   :  { %3820 = vmatpush.bf16.msra.mxu1 %v6205_v39  ;;  %v6233_v39 = vld [vmem:[%s8069_s1 + $0x558] sm:$0xff] }
  0x86   :  { %3808 = vmatpush.bf16.msra.mxu0 %v6196_v42 }
  0x87   :  { %3834 = vmatpush.bf16.msra.mxu2 %v6212_v43  ;;  %v6240_v43 = vld [vmem:[%s8069_s1 + $0x590] sm:$0xff] }
  0x88   :  { %3847 = vmatpush.bf16.msra.mxu3 %v6220_v44  ;;  %v6248_v44 = vld [vmem:[%s8069_s1 + $0x5d0] sm:$0xff] }
  0x89   :  { %3821 = vmatpush.bf16.msra.mxu1 %v6204_v45 }
  0x8a   :  { %3809 = vmatpush.bf16.msra.mxu0 %v6195_v46 }
  0x8b   :  { %3835 = vmatpush.bf16.msra.mxu2 %v6211_v47  ;;  %v6232_v47 = vld [vmem:[%s8069_s1 + $0x550] sm:$0xff] }
  0x8c   :  { %3848 = vmatpush.bf16.msra.mxu3 %v6219_v48  ;;  %v6223_v48 = vld [vmem:[%s8069_s1 + $0x508] sm:$0xff] }
  0x8d   :  { %3822 = vmatpush.bf16.msra.mxu1 %v6203_v49 }
  0x8e   :  { %3810 = vmatpush.bf16.msra.mxu0 %v6194_v50  ;;  %v35_v50 = vld [vmem:[%s8070_s0 + $0x30] sm:$0xff] }
  0x8f   :  { %3836 = vmatpush.bf16.msra.mxu2 %v6210_v51  ;;  %v6239_v51 = vld [vmem:[%s8069_s1 + $0x588] sm:$0xff]  ;;  %88 = vst [vmem:[#allocation1] ss:$4 sm:$0xff] %v35_v50  ;;  %v6293_v50 = vld [vmem:[%s8069_s1 + $0x738] sm:$0xff] }
  0x90   :  { %3849 = vmatpush.bf16.msra.mxu3 %v6218_v52  ;;  %v6247_v52 = vld [vmem:[%s8069_s1 + $0x5c8] sm:$0xff] }
  0x91   :  { %3823 = vmatpush.bf16.msra.mxu1 %v6202_v53 }
  0x92   :  { %3811 = vmatpush.bf16.msra.mxu0 %v6193_v54  ;;  %v6231_v54 = vld [vmem:[%s8069_s1 + $0x548] sm:$0xff] }
  0x93   :  { %3837 = vmatpush.bf16.msra.mxu2 %v6209_v55  ;;  %v6222_v55 = vld [vmem:[%s8069_s1 + $0x500] sm:$0xff] }
  0x94   :  { %3850 = vmatpush.bf16.msra.mxu3 %v6217_v56  ;;  %v6238_v56 = vld [vmem:[%s8069_s1 + $0x580] sm:$0xff] }
  0x95   :  { %3824 = vmatpush.bf16.msra.mxu1 %v6201_v57  ;;  %v6246_v57 = vld [vmem:[%s8069_s1 + $0x5c0] sm:$0xff] }
  0x96   :  { %3812 = vmatpush.bf16.msra.mxu0 %v6192_v58 }
  0x97   :  { %3838 = vmatpush.bf16.msra.mxu2 %v6208_v59  ;;  %v84_v59 = vld.sshfl [vmem:[#allocation1 + $0x20] sm:$0xff pattern:$0x73625140] }
  0x98   :  { %3851 = vmatpush.bf16.msra.mxu3 %v6216_v60  ;;  %v86_v60 = vld.sshfl [vmem:[#allocation1 + $0x30] sm:$0xff pattern:$0x73625140] }
  0x99   :  { %3825 = vmatpush.bf16.msra.mxu1 %v6200_v61  ;;  %v6261_v61 = vld [vmem:[%s8069_s1 + $0x638] sm:$0xff] }
  0x9a   :  { %3813 = vmatpush.bf16.msra.mxu0 %v6191_v62  ;;  %v6277_v62 = vld [vmem:[%s8069_s1 + $0x6b8] sm:$0xff] }
  0x9b   :  { %3839 = vmatpush.bf16.msra.mxu2 %v6207_v63  ;;  %v87_v63 = vld.sshfl [vmem:[#allocation1 + $0x38] sm:$0xff pattern:$0x73625140] }
  0x9c   :  { %3852 = vmatpush.bf16.msra.mxu3 %v6215_v0  ;;  %v6285_v0 = vld [vmem:[%s8069_s1 + $0x6f8] sm:$0xff]  ;;  %v201_v6 = vpack.c.bf16 %v87_v63, %v87_v63  ;;  %v6316_v63 = vld [vmem:[%s8069_s1 + $0x7f0] sm:$0xff] }
  0x9d   :  { %3826 = vmatpush.bf16.msra.mxu1 %v6199_v1  ;;  %v6230_v1 = vld [vmem:[%s8069_s1 + $0x540] sm:$0xff] }
  0x9e   :  { %3814 = vmatpush.bf16.msra.mxu0 %v6190_v2  ;;  %v3608_v30 = vpop.f32.mrf.mxu0  ;;  %v85_v2 = vld.sshfl [vmem:[#allocation1 + $0x28] sm:$0xff pattern:$0x73625140] }
  0x9f   :  { %3840 = vmatpush.bf16.msra.mxu2 %v6206_v3  ;;  %v3609_v31 = vadd.f32 %v6482_v25, %v3608_v30  ;;  %v198_v3 = vpack.c.bf16 %v84_v59, %v84_v59  ;;  %v6273_v25 = vld [vmem:[%s8069_s1 + $0x698] sm:$0xff] }
  0xa0   :  { %3853 = vmatpush.bf16.msra.mxu3 %v6214_v4  ;;  %v200_v4 = vpack.c.bf16 %v86_v60, %v86_v60 }
  0xa1   :  { %3827 = vmatpush.bf16.msra.mxu1 %v6198_v11  ;;  %3815 = vmatmul.bf16.vlgmr.msra.gmra.mxu0 %v194_v13  ;;  %v3621_v34 = vpop.f32.mrf.mxu1  ;;  %v6268_v11 = vld [vmem:[%s8069_s1 + $0x670] sm:$0xff]  ;;  %v6275_v13 = vld [vmem:[%s8069_s1 + $0x6a8] sm:$0xff] }
  0xa2   :  { %3859 = vmatpush.bf16.msrb.mxu0 %v6229_v7  ;;  %3841 = vmatmul.bf16.vlgmr.msra.gmra.mxu2 %v196_v14  ;;  %v3622_v37 = vadd.f32 %v3621_v34, %v3609_v31  ;;  %v199_v7 = vpack.c.bf16 %v85_v2, %v85_v2  ;;  %v6283_v14 = vld [vmem:[%s8069_s1 + $0x6e8] sm:$0xff]  ;;  %v6256_v31 = vld [vmem:[%s8069_s1 + $0x610] sm:$0xff] }
  0xa3   :  { %3885 = vmatpush.bf16.msrb.mxu2 %v6245_v8  ;;  %3854 = vmatmul.bf16.vlgmr.msra.gmra.mxu3 %v197_v16  ;;  %v6260_v8 = vld [vmem:[%s8069_s1 + $0x630] sm:$0xff]  ;;  %v6258_v16 = vld [vmem:[%s8069_s1 + $0x620] sm:$0xff]  ;;  %v6307_v2 = vld [vmem:[%s8069_s1 + $0x7a8] sm:$0xff] }
  0xa4   :  { %3898 = vmatpush.bf16.msrb.mxu3 %v6253_v10  ;;  %3828 = vmatmul.bf16.vlgmr.msra.gmra.mxu1 %v195_v17  ;;  %v6284_v10 = vld [vmem:[%s8069_s1 + $0x6f0] sm:$0xff]  ;;  %v6274_v17 = vld [vmem:[%s8069_s1 + $0x6a0] sm:$0xff] }
  0xa5   :  { %3872 = vmatpush.bf16.msrb.mxu1 %v6237_v15  ;;  %v3634_v38 = vpop.f32.mrf.mxu2  ;;  %v6267_v15 = vld [vmem:[%s8069_s1 + $0x668] sm:$0xff] }
  0xa6   :  { %3860 = vmatpush.bf16.msrb.mxu0 %v6228_v18  ;;  %v3635_v40 = vadd.f32 %v3634_v38, %v3622_v37  ;;  %v3647_v42 = vpop.f32.mrf.mxu3  ;;  %v3610_v46 = vpop.f32.mrf.mxu0  ;;  %v6282_v18 = vld [vmem:[%s8069_s1 + $0x6e0] sm:$0xff]  ;;  %v6255_v38 = vld [vmem:[%s8069_s1 + $0x608] sm:$0xff] }
  0xa7   :  { %3886 = vmatpush.bf16.msrb.mxu2 %v6244_v19  ;;  %v6270_v46 = vld [vmem:[%s8069_s1 + $0x680] sm:$0xff] }
  0xa8   :  { %3899 = vmatpush.bf16.msrb.mxu3 %v6252_v20  ;;  %v7147_v45 = vadd.f32 %v3647_v42, %v3635_v40  ;;  %v6271_v40 = vld [vmem:[%s8069_s1 + $0x688] sm:$0xff] }
  0xa9   :  { %3873 = vmatpush.bf16.msrb.mxu1 %v6236_v21  ;;  %v3623_v49 = vpop.f32.mrf.mxu1  ;;  %v6266_v21 = vld [vmem:[%s8069_s1 + $0x660] sm:$0xff] }
  0xaa   :  { %3861 = vmatpush.bf16.msrb.mxu0 %v6227_v22  ;;  %v92_v49 = vld.sshfl [vmem:[#allocation1 + $0x10] sm:$0xff pattern:$0x73625140] }
  0xab   :  { %3887 = vmatpush.bf16.msrb.mxu2 %v6243_v23  ;;  %v6257_v23 = vld [vmem:[%s8069_s1 + $0x618] sm:$0xff] }
  0xac   :  { %3900 = vmatpush.bf16.msrb.mxu3 %v6251_v24 }
  0xad   :  { %3874 = vmatpush.bf16.msrb.mxu1 %v6235_v26  ;;  %v3636_v53 = vpop.f32.mrf.mxu2  ;;  %v6281_v26 = vld [vmem:[%s8069_s1 + $0x6d8] sm:$0xff] }
  0xae   :  { %3862 = vmatpush.bf16.msrb.mxu0 %v6226_v27  ;;  %v3649_v58 = vpop.f32.mrf.mxu3  ;;  %v6317_v53 = vld [vmem:[%s8069_s1 + $0x7f8] sm:$0xff] }
  0xaf   :  { %3888 = vmatpush.bf16.msrb.mxu2 %v6242_v28  ;;  %v6265_v28 = vld [vmem:[%s8069_s1 + $0x658] sm:$0xff] }
  0xb0   :  { %3901 = vmatpush.bf16.msrb.mxu3 %v6250_v29  ;;  %v6301_v58 = vld [vmem:[%s8069_s1 + $0x778] sm:$0xff] }
  0xb1   :  { %3875 = vmatpush.bf16.msrb.mxu1 %v6234_v32  ;;  %v6272_v32 = vld [vmem:[%s8069_s1 + $0x690] sm:$0xff] }
  0xb2   :  { %3863 = vmatpush.bf16.msrb.mxu0 %v6225_v33  ;;  %v6280_v33 = vld [vmem:[%s8069_s1 + $0x6d0] sm:$0xff] }
  0xb3   :  { %3889 = vmatpush.bf16.msrb.mxu2 %v6241_v35 }
  0xb4   :  { %3902 = vmatpush.bf16.msrb.mxu3 %v6249_v36  ;;  %v6264_v36 = vld [vmem:[%s8069_s1 + $0x650] sm:$0xff] }
  0xb5   :  { %3876 = vmatpush.bf16.msrb.mxu1 %v6233_v39  ;;  %v36_v39 = vld [vmem:[%s8070_s0 + $0x38] sm:$0xff] }
  0xb6   :  { %3864 = vmatpush.bf16.msrb.mxu0 %v6224_v41  ;;  %v6279_v41 = vld [vmem:[%s8069_s1 + $0x6c8] sm:$0xff]  ;;  %89 = vst [vmem:[#allocation1 + $0x20] ss:$4 sm:$0xff] %v36_v39  ;;  %v6325_v39 = vld [vmem:[%s8069_s1 + $0x838] sm:$0xff] }
  0xb7   :  { %3890 = vmatpush.bf16.msrb.mxu2 %v6240_v43  ;;  %v6263_v43 = vld [vmem:[%s8069_s1 + $0x648] sm:$0xff] }
  0xb8   :  { %3903 = vmatpush.bf16.msrb.mxu3 %v6248_v44 }
  0xb9   :  { %3877 = vmatpush.bf16.msrb.mxu1 %v6232_v47  ;;  %v6278_v47 = vld [vmem:[%s8069_s1 + $0x6c0] sm:$0xff] }
  0xba   :  { %3865 = vmatpush.bf16.msrb.mxu0 %v6223_v48  ;;  %v90_v48 = vld.sshfl [vmem:[#allocation1] sm:$0xff pattern:$0x73625140] }
  0xbb   :  { %3891 = vmatpush.bf16.msrb.mxu2 %v6239_v51  ;;  %v6309_v51 = vld [vmem:[%s8069_s1 + $0x7b8] sm:$0xff] }
  0xbc   :  { %3904 = vmatpush.bf16.msrb.mxu3 %v6247_v52  ;;  %v93_v52 = vld.sshfl [vmem:[#allocation1 + $0x18] sm:$0xff pattern:$0x73625140] }
  0xbd   :  { %3878 = vmatpush.bf16.msrb.mxu1 %v6231_v54  ;;  %v6262_v54 = vld [vmem:[%s8069_s1 + $0x640] sm:$0xff]  ;;  %v205_v59 = vpack.c.bf16 %v93_v52, %v93_v52 }
  0xbe   :  { %3866 = vmatpush.bf16.msrb.mxu0 %v6222_v55  ;;  %v3660_v19 = vpop.f32.mrf.mxu0  ;;  %v91_v55 = vld.sshfl [vmem:[#allocation1 + $0x8] sm:$0xff pattern:$0x73625140] }
  0xbf   :  { %3892 = vmatpush.bf16.msrb.mxu2 %v6238_v56  ;;  %v3661_v20 = vadd.f32 %v3660_v19, %v7147_v45  ;;  %v6254_v45 = vld [vmem:[%s8069_s1 + $0x600] sm:$0xff]  ;;  %v202_v56 = vpack.c.bf16 %v90_v48, %v90_v48  ;;  %v203_v60 = vpack.c.bf16 %v91_v55, %v91_v55  ;;  %v6333_v48 = vld [vmem:[%s8069_s1 + $0x878] sm:$0xff] }
  0xc0   :  { %3905 = vmatpush.bf16.msrb.mxu3 %v6246_v57  ;;  %v204_v57 = vpack.c.bf16 %v92_v49, %v92_v49  ;;  %v6324_v49 = vld [vmem:[%s8069_s1 + $0x830] sm:$0xff] }
  0xc1   :  { %3879 = vmatpush.bf16.msrb.mxu1 %v6230_v1  ;;  %3867 = vmatmul.bf16.vlgmr.msrb.gmra.mxu0 %v198_v3  ;;  %v3673_v22 = vpop.f32.mrf.mxu1  ;;  %v6291_v1 = vld [vmem:[%s8069_s1 + $0x728] sm:$0xff] }
  0xc2   :  { %3911 = vmatpush.bf16.msra.mxu0 %v6261_v61  ;;  %3893 = vmatmul.bf16.vlgmr.msrb.gmra.mxu2 %v200_v4  ;;  %v3674_v24 = vadd.f32 %v3673_v22, %v3661_v20  ;;  %v6292_v61 = vld [vmem:[%s8069_s1 + $0x730] sm:$0xff]  ;;  %v6315_v3 = vld [vmem:[%s8069_s1 + $0x7e8] sm:$0xff] }
  0xc3   :  { %3937 = vmatpush.bf16.msra.mxu2 %v6277_v62  ;;  %3906 = vmatmul.bf16.vlgmr.msrb.gmra.mxu3 %v201_v6  ;;  %v6308_v62 = vld [vmem:[%s8069_s1 + $0x7b0] sm:$0xff]  ;;  %v6299_v4 = vld [vmem:[%s8069_s1 + $0x768] sm:$0xff] }
  0xc4   :  { %3950 = vmatpush.bf16.msra.mxu3 %v6285_v0  ;;  %3880 = vmatmul.bf16.vlgmr.msrb.gmra.mxu1 %v199_v7  ;;  %v6300_v0 = vld [vmem:[%s8069_s1 + $0x770] sm:$0xff]  ;;  %v6290_v7 = vld [vmem:[%s8069_s1 + $0x720] sm:$0xff] }
  0xc5   :  { %3924 = vmatpush.bf16.msra.mxu1 %v6269_v5  ;;  %v3686_v27 = vpop.f32.mrf.mxu2 }
  0xc6   :  { %3912 = vmatpush.bf16.msra.mxu0 %v6260_v8  ;;  %v3687_v29 = vadd.f32 %v3686_v27, %v3674_v24  ;;  %v3699_v30 = vpop.f32.mrf.mxu3  ;;  %v3662_v35 = vpop.f32.mrf.mxu0  ;;  %v6306_v8 = vld [vmem:[%s8069_s1 + $0x7a0] sm:$0xff]  ;;  %v6312_v24 = vld [vmem:[%s8069_s1 + $0x7d0] sm:$0xff]  ;;  %v6287_v27 = vld [vmem:[%s8069_s1 + $0x708] sm:$0xff] }
  0xc7   :  { %3938 = vmatpush.bf16.msra.mxu2 %v6276_v9  ;;  %v6314_v9 = vld [vmem:[%s8069_s1 + $0x7e0] sm:$0xff] }
  0xc8   :  { %3951 = vmatpush.bf16.msra.mxu3 %v6284_v10  ;;  %v7249_v34 = vadd.f32 %v3699_v30, %v3687_v29  ;;  %v6303_v29 = vld [vmem:[%s8069_s1 + $0x788] sm:$0xff]  ;;  %v6302_v35 = vld [vmem:[%s8069_s1 + $0x780] sm:$0xff] }
  0xc9   :  { %3925 = vmatpush.bf16.msra.mxu1 %v6268_v11  ;;  %v3675_v37 = vpop.f32.mrf.mxu1  ;;  %v6311_v30 = vld [vmem:[%s8069_s1 + $0x7c8] sm:$0xff] }
  0xca   :  { %3913 = vmatpush.bf16.msra.mxu0 %v6259_v12  ;;  %v6298_v12 = vld [vmem:[%s8069_s1 + $0x760] sm:$0xff] }
  0xcb   :  { %3939 = vmatpush.bf16.msra.mxu2 %v6275_v13  ;;  %v6289_v13 = vld [vmem:[%s8069_s1 + $0x718] sm:$0xff]  ;;  %v94_v37 = vld.sshfl [vmem:[#allocation1 + $0x20] sm:$0xff pattern:$0x73625140] }
  0xcc   :  { %3952 = vmatpush.bf16.msra.mxu3 %v6283_v14  ;;  %v6305_v14 = vld [vmem:[%s8069_s1 + $0x798] sm:$0xff] }
  0xcd   :  { %3926 = vmatpush.bf16.msra.mxu1 %v6267_v15  ;;  %v3688_v42 = vpop.f32.mrf.mxu2  ;;  %v6313_v15 = vld [vmem:[%s8069_s1 + $0x7d8] sm:$0xff] }
  0xce   :  { %3914 = vmatpush.bf16.msra.mxu0 %v6258_v16  ;;  %v3701_v44 = vpop.f32.mrf.mxu3  ;;  %v6349_v42 = vld [vmem:[%s8069_s1 + $0x8f8] sm:$0xff] }
  0xcf   :  { %3940 = vmatpush.bf16.msra.mxu2 %v6274_v17  ;;  %v95_v44 = vld.sshfl [vmem:[#allocation1 + $0x28] sm:$0xff pattern:$0x73625140] }
  0xd0   :  { %3953 = vmatpush.bf16.msra.mxu3 %v6282_v18  ;;  %v6297_v18 = vld [vmem:[%s8069_s1 + $0x758] sm:$0xff] }
  0xd1   :  { %3927 = vmatpush.bf16.msra.mxu1 %v6266_v21  ;;  %v6288_v21 = vld [vmem:[%s8069_s1 + $0x710] sm:$0xff] }
  0xd2   :  { %3915 = vmatpush.bf16.msra.mxu0 %v6257_v23  ;;  %v6304_v23 = vld [vmem:[%s8069_s1 + $0x790] sm:$0xff] }
  0xd3   :  { %3941 = vmatpush.bf16.msra.mxu2 %v6273_v25 }
  0xd4   :  { %3954 = vmatpush.bf16.msra.mxu3 %v6281_v26  ;;  %v6296_v26 = vld [vmem:[%s8069_s1 + $0x750] sm:$0xff] }
  0xd5   :  { %3928 = vmatpush.bf16.msra.mxu1 %v6265_v28  ;;  %v37_v28 = vld [vmem:[%s8070_s0 + $0x40] sm:$0xff] }
  0xd6   :  { %3916 = vmatpush.bf16.msra.mxu0 %v6256_v31  ;;  %98 = vst [vmem:[#allocation1] ss:$4 sm:$0xff] %v37_v28  ;;  %v6318_v28 = vld [vmem:[%s8069_s1 + $0x800] sm:$0xff] }
  0xd7   :  { %3942 = vmatpush.bf16.msra.mxu2 %v6272_v32  ;;  %v6295_v32 = vld [vmem:[%s8069_s1 + $0x748] sm:$0xff] }
  0xd8   :  { %3955 = vmatpush.bf16.msra.mxu3 %v6280_v33 }
  0xd9   :  { %3929 = vmatpush.bf16.msra.mxu1 %v6264_v36  ;;  %v6310_v36 = vld [vmem:[%s8069_s1 + $0x7c0] sm:$0xff] }
  0xda   :  { %3917 = vmatpush.bf16.msra.mxu0 %v6255_v38  ;;  %v96_v38 = vld.sshfl [vmem:[#allocation1 + $0x30] sm:$0xff pattern:$0x73625140] }
  0xdb   :  { %3943 = vmatpush.bf16.msra.mxu2 %v6271_v40  ;;  %v6341_v40 = vld [vmem:[%s8069_s1 + $0x8b8] sm:$0xff] }
  0xdc   :  { %3956 = vmatpush.bf16.msra.mxu3 %v6279_v41  ;;  %v97_v41 = vld.sshfl [vmem:[#allocation1 + $0x38] sm:$0xff pattern:$0x73625140] }
  0xdd   :  { %3930 = vmatpush.bf16.msra.mxu1 %v6263_v43  ;;  %v6294_v43 = vld [vmem:[%s8069_s1 + $0x740] sm:$0xff]  ;;  %v7403_v52 = vld.sshfl [vmem:[#allocation1 + $0x10] sm:$0xff pattern:$0x73625140] }
  0xde   :  { %3918 = vmatpush.bf16.msra.mxu0 %v6254_v45  ;;  %v3712_v5 = vpop.f32.mrf.mxu0  ;;  %v39_v45 = vld [vmem:[%s8070_s0 + $0x50] sm:$0xff]  ;;  %v7407_v55 = vld.sshfl [vmem:[#allocation1 + $0x18] sm:$0xff pattern:$0x73625140] }
  0xdf   :  { %3944 = vmatpush.bf16.msra.mxu2 %v6270_v46  ;;  %v3713_v6 = vadd.f32 %v3712_v5, %v7249_v34  ;;  %v6286_v34 = vld [vmem:[%s8069_s1 + $0x700] sm:$0xff]  ;;  %v206_v46 = vpack.c.bf16 %v94_v37, %v94_v37  ;;  %v212_v37 = vpack.c.bf16 %v7403_v52, %v7403_v52  ;;  %v6363_v52 = vld [vmem:[%s8069_s1 + $0x968] sm:$0xff] }
  0xe0   :  { %3957 = vmatpush.bf16.msra.mxu3 %v6278_v47  ;;  %v208_v47 = vpack.c.bf16 %v96_v38, %v96_v38  ;;  %v6365_v38 = vld [vmem:[%s8069_s1 + $0x978] sm:$0xff] }
  0xe1   :  { %3931 = vmatpush.bf16.msra.mxu1 %v6262_v54  ;;  %3919 = vmatmul.bf16.vlgmr.msra.gmra.mxu0 %v202_v56  ;;  %v3725_v10 = vpop.f32.mrf.mxu1  ;;  %v7405_v54 = vld.sshfl [vmem:[#allocation1 + $0x8] sm:$0xff pattern:$0x73625140]  ;;  %v6340_v56 = vld [vmem:[%s8069_s1 + $0x8b0] sm:$0xff] }
  0xe2   :  { %3963 = vmatpush.bf16.msrb.mxu0 %v6293_v50  ;;  %3945 = vmatmul.bf16.vlgmr.msra.gmra.mxu2 %v204_v57  ;;  %v3726_v11 = vadd.f32 %v3725_v10, %v3713_v6  ;;  %v209_v50 = vpack.c.bf16 %v97_v41, %v97_v41  ;;  %v6348_v57 = vld [vmem:[%s8069_s1 + $0x8f0] sm:$0xff]  ;;  %v6330_v6 = vld [vmem:[%s8069_s1 + $0x860] sm:$0xff] }
  0xe3   :  { %3989 = vmatpush.bf16.msrb.mxu2 %v6309_v51  ;;  %3958 = vmatmul.bf16.vlgmr.msra.gmra.mxu3 %v205_v59  ;;  %v7401_v51 = vld.sshfl [vmem:[#allocation1] sm:$0xff pattern:$0x73625140]  ;;  %v6323_v59 = vld [vmem:[%s8069_s1 + $0x828] sm:$0xff] }
  0xe4   :  { %4002 = vmatpush.bf16.msrb.mxu3 %v6317_v53  ;;  %3932 = vmatmul.bf16.vlgmr.msra.gmra.mxu1 %v203_v60  ;;  %v207_v53 = vpack.c.bf16 %v95_v44, %v95_v44  ;;  %108 = vst [vmem:[#allocation1] ss:$4 sm:$0xff] %v39_v45  ;;  %v6339_v60 = vld [vmem:[%s8069_s1 + $0x8a8] sm:$0xff] }
  0xe5   :  { %3976 = vmatpush.bf16.msrb.mxu1 %v6301_v58  ;;  %v3738_v16 = vpop.f32.mrf.mxu2  ;;  %v6332_v58 = vld [vmem:[%s8069_s1 + $0x870] sm:$0xff] }
  0xe6   :  { %3964 = vmatpush.bf16.msrb.mxu0 %v6292_v61  ;;  %v3739_v17 = vadd.f32 %v3738_v16, %v3726_v11  ;;  %v3751_v19 = vpop.f32.mrf.mxu3  ;;  %v3714_v20 = vpop.f32.mrf.mxu0  ;;  %v6347_v61 = vld [vmem:[%s8069_s1 + $0x8e8] sm:$0xff]  ;;  %v6320_v16 = vld [vmem:[%s8069_s1 + $0x810] sm:$0xff] }
  0xe7   :  { %3990 = vmatpush.bf16.msrb.mxu2 %v6308_v62  ;;  %v6331_v62 = vld [vmem:[%s8069_s1 + $0x868] sm:$0xff]  ;;  %v6328_v20 = vld [vmem:[%s8069_s1 + $0x850] sm:$0xff] }
  0xe8   :  { %4003 = vmatpush.bf16.msrb.mxu3 %v6316_v63  ;;  %v7345_v22 = vadd.f32 %v3751_v19, %v3739_v17  ;;  %v6336_v17 = vld [vmem:[%s8069_s1 + $0x890] sm:$0xff] }
  0xe9   :  { %3977 = vmatpush.bf16.msrb.mxu1 %v6300_v0  ;;  %v3727_v25 = vpop.f32.mrf.mxu1 }
  0xea   :  { %3965 = vmatpush.bf16.msrb.mxu0 %v6291_v1  ;;  %v6322_v1 = vld [vmem:[%s8069_s1 + $0x820] sm:$0xff] }
  0xeb   :  { %3991 = vmatpush.bf16.msrb.mxu2 %v6307_v2  ;;  %v6338_v2 = vld [vmem:[%s8069_s1 + $0x8a0] sm:$0xff] }
  0xec   :  { %4004 = vmatpush.bf16.msrb.mxu3 %v6315_v3  ;;  %v6346_v3 = vld [vmem:[%s8069_s1 + $0x8e0] sm:$0xff] }
  0xed   :  { %3978 = vmatpush.bf16.msrb.mxu1 %v6299_v4  ;;  %v3740_v31 = vpop.f32.mrf.mxu2 }
  0xee   :  { %3966 = vmatpush.bf16.msrb.mxu0 %v6290_v7  ;;  %v3753_v33 = vpop.f32.mrf.mxu3  ;;  %v6321_v7 = vld [vmem:[%s8069_s1 + $0x818] sm:$0xff] }
  0xef   :  { %3992 = vmatpush.bf16.msrb.mxu2 %v6306_v8  ;;  %v6337_v8 = vld [vmem:[%s8069_s1 + $0x898] sm:$0xff] }
  0xf0   :  { %4005 = vmatpush.bf16.msrb.mxu3 %v6314_v9  ;;  %v6345_v9 = vld [vmem:[%s8069_s1 + $0x8d8] sm:$0xff] }
  0xf1   :  { %3979 = vmatpush.bf16.msrb.mxu1 %v6298_v12  ;;  %v6357_v31 = vld [vmem:[%s8069_s1 + $0x938] sm:$0xff] }
  0xf2   :  { %3967 = vmatpush.bf16.msrb.mxu0 %v6289_v13  ;;  %v6329_v13 = vld [vmem:[%s8069_s1 + $0x858] sm:$0xff] }
  0xf3   :  { %3993 = vmatpush.bf16.msrb.mxu2 %v6305_v14  ;;  %v6381_v33 = vld [vmem:[%s8069_s1 + $0x9f8] sm:$0xff] }
  0xf4   :  { %4006 = vmatpush.bf16.msrb.mxu3 %v6313_v15 }
  0xf5   :  { %3980 = vmatpush.bf16.msrb.mxu1 %v6297_v18  ;;  %v6344_v18 = vld [vmem:[%s8069_s1 + $0x8d0] sm:$0xff] }
  0xf6   :  { %3968 = vmatpush.bf16.msrb.mxu0 %v6288_v21  ;;  %v6319_v21 = vld [vmem:[%s8069_s1 + $0x808] sm:$0xff] }
  0xf7   :  { %3994 = vmatpush.bf16.msrb.mxu2 %v6304_v23  ;;  %v6335_v23 = vld [vmem:[%s8069_s1 + $0x888] sm:$0xff] }
  0xf8   :  { %4007 = vmatpush.bf16.msrb.mxu3 %v6312_v24  ;;  %v6343_v24 = vld [vmem:[%s8069_s1 + $0x8c8] sm:$0xff] }
  0xf9   :  { %3981 = vmatpush.bf16.msrb.mxu1 %v6296_v26 }
  0xfa   :  { %3969 = vmatpush.bf16.msrb.mxu0 %v6287_v27  ;;  %v6327_v27 = vld [vmem:[%s8069_s1 + $0x848] sm:$0xff] }
  0xfb   :  { %3995 = vmatpush.bf16.msrb.mxu2 %v6303_v29  ;;  %v6334_v29 = vld [vmem:[%s8069_s1 + $0x880] sm:$0xff] }
  0xfc   :  { %4008 = vmatpush.bf16.msrb.mxu3 %v6311_v30  ;;  %v6342_v30 = vld [vmem:[%s8069_s1 + $0x8c0] sm:$0xff] }
  0xfd   :  { %3982 = vmatpush.bf16.msrb.mxu1 %v6295_v32  ;;  %v6373_v32 = vld [vmem:[%s8069_s1 + $0x9b8] sm:$0xff] }
  0xfe   :  { %3970 = vmatpush.bf16.msrb.mxu0 %v6286_v34  ;;  %v3764_v63 = vpop.f32.mrf.mxu0  ;;  %v6326_v34 = vld [vmem:[%s8069_s1 + $0x840] sm:$0xff] }
  0xff   :  { %3996 = vmatpush.bf16.msrb.mxu2 %v6302_v35  ;;  %v3765_v0 = vadd.f32 %v3764_v63, %v7345_v22  ;;  %v38_v22 = vld [vmem:[%s8070_s0 + $0x48] sm:$0xff]  ;;  %v40_v35 = vld [vmem:[%s8070_s0 + $0x58] sm:$0xff] }
 0x100   :  { %4009 = vmatpush.bf16.msrb.mxu3 %v6310_v36  ;;  %99 = vst [vmem:[#allocation1 + $0x20] ss:$4 sm:$0xff] %v38_v22  ;;  %v210_v36 = vpack.c.bf16 %v7401_v51, %v7401_v51  ;;  %v6379_v51 = vld [vmem:[%s8069_s1 + $0x9e8] sm:$0xff]  ;;  %v6377_v63 = vld [vmem:[%s8069_s1 + $0x9d8] sm:$0xff] }
 0x101   :  { %3983 = vmatpush.bf16.msrb.mxu1 %v6294_v43  ;;  %3971 = vmatmul.bf16.vlgmr.msrb.gmra.mxu0 %v206_v46  ;;  %v3777_v4 = vpop.f32.mrf.mxu1  ;;  %v211_v43 = vpack.c.bf16 %v7405_v54, %v7405_v54  ;;  %v6372_v46 = vld [vmem:[%s8069_s1 + $0x9b0] sm:$0xff]  ;;  %v6413_v22 = vld [vmem:[%s8069_s1 + $0xaf8] sm:$0xff] }
 0x102   :  { %4015 = vmatpush.bf16.msra.mxu0 %v6325_v39  ;;  %3997 = vmatmul.bf16.vlgmr.msrb.gmra.mxu2 %v208_v47  ;;  %v3778_v5 = vadd.f32 %v3777_v4, %v3765_v0  ;;  %v6356_v39 = vld [vmem:[%s8069_s1 + $0x930] sm:$0xff] }
 0x103   :  { %4041 = vmatpush.bf16.msra.mxu2 %v6341_v40  ;;  %4010 = vmatmul.bf16.vlgmr.msrb.gmra.mxu3 %v209_v50  ;;  %v213_v40 = vpack.c.bf16 %v7407_v55, %v7407_v55  ;;  %v6380_v47 = vld [vmem:[%s8069_s1 + $0x9f0] sm:$0xff]  ;;  %v6371_v50 = vld [vmem:[%s8069_s1 + $0x9a8] sm:$0xff]  ;;  %v6354_v55 = vld [vmem:[%s8069_s1 + $0x920] sm:$0xff] }
 0x104   :  { %4054 = vmatpush.bf16.msra.mxu3 %v6349_v42  ;;  %3984 = vmatmul.bf16.vlgmr.msrb.gmra.mxu1 %v207_v53 }
 0x105   :  { %4028 = vmatpush.bf16.msra.mxu1 %v6333_v48  ;;  %v3790_v10 = vpop.f32.mrf.mxu2  ;;  %v6364_v48 = vld [vmem:[%s8069_s1 + $0x970] sm:$0xff] }
 0x106   :  { %4016 = vmatpush.bf16.msra.mxu0 %v6324_v49  ;;  %v3791_v11 = vadd.f32 %v3790_v10, %v3778_v5  ;;  %v3803_v12 = vpop.f32.mrf.mxu3  ;;  %v3766_v14 = vpop.f32.mrf.mxu0  ;;  %v6355_v49 = vld [vmem:[%s8069_s1 + $0x928] sm:$0xff]  ;;  %v6360_v10 = vld [vmem:[%s8069_s1 + $0x950] sm:$0xff] }
 0x107   :  { %4042 = vmatpush.bf16.msra.mxu2 %v6340_v56  ;;  %v7520_v41 = vld.sshfl [vmem:[#allocation1 + $0x20] sm:$0xff pattern:$0x73625140]  ;;  %v7522_v42 = vld.sshfl [vmem:[#allocation1 + $0x30] sm:$0xff pattern:$0x73625140] }
 0x108   :  { %4055 = vmatpush.bf16.msra.mxu3 %v6348_v57  ;;  %v7455_v15 = vadd.f32 %v3803_v12, %v3791_v11  ;;  %v7526_v44 = vld.sshfl [vmem:[#allocation1 + $0x28] sm:$0xff pattern:$0x73625140]  ;;  %v7528_v45 = vld.sshfl [vmem:[#allocation1 + $0x38] sm:$0xff pattern:$0x73625140] }
 0x109   :  { %4029 = vmatpush.bf16.msra.mxu1 %v6332_v58  ;;  %v3779_v19 = vpop.f32.mrf.mxu1  ;;  %109 = vst [vmem:[#allocation1 + $0x20] ss:$4 sm:$0xff] %v40_v35  ;;  %v6370_v56 = vld [vmem:[%s8069_s1 + $0x9a0] sm:$0xff]  ;;  %v6351_v11 = vld [vmem:[%s8069_s1 + $0x908] sm:$0xff]  ;;  %v6404_v35 = vld [vmem:[%s8069_s1 + $0xab0] sm:$0xff] }
 0x10a   :  { %4017 = vmatpush.bf16.msra.mxu0 %v6323_v59  ;;  %v6378_v57 = vld [vmem:[%s8069_s1 + $0x9e0] sm:$0xff]  ;;  %v6367_v12 = vld [vmem:[%s8069_s1 + $0x988] sm:$0xff] }
 0x10b   :  { %4043 = vmatpush.bf16.msra.mxu2 %v6339_v60  ;;  %v6362_v60 = vld [vmem:[%s8069_s1 + $0x960] sm:$0xff] }
 0x10c   :  { %4056 = vmatpush.bf16.msra.mxu3 %v6347_v61  ;;  %v6353_v61 = vld [vmem:[%s8069_s1 + $0x918] sm:$0xff]  ;;  %v6374_v19 = vld [vmem:[%s8069_s1 + $0x9c0] sm:$0xff] }
 0x10d   :  { %4030 = vmatpush.bf16.msra.mxu1 %v6331_v62  ;;  %v3792_v25 = vpop.f32.mrf.mxu2  ;;  %v6369_v62 = vld [vmem:[%s8069_s1 + $0x998] sm:$0xff] }
 0x10e   :  { %4018 = vmatpush.bf16.msra.mxu0 %v6322_v1  ;;  %v3805_v26 = vpop.f32.mrf.mxu3  ;;  %v214_v25 = vpack.c.bf16 %v7520_v41, %v7520_v41  ;;  %v6395_v41 = vld [vmem:[%s8069_s1 + $0xa68] sm:$0xff] }
 0x10f   :  { %4044 = vmatpush.bf16.msra.mxu2 %v6338_v2  ;;  %v216_v26 = vpack.c.bf16 %v7522_v42, %v7522_v42 }
 0x110   :  { %4057 = vmatpush.bf16.msra.mxu3 %v6346_v3  ;;  %v6361_v3 = vld [vmem:[%s8069_s1 + $0x958] sm:$0xff] }
 0x111   :  { %4031 = vmatpush.bf16.msra.mxu1 %v6330_v6  ;;  %v6352_v6 = vld [vmem:[%s8069_s1 + $0x910] sm:$0xff] }
 0x112   :  { %4019 = vmatpush.bf16.msra.mxu0 %v6321_v7  ;;  %v6368_v7 = vld [vmem:[%s8069_s1 + $0x990] sm:$0xff] }
 0x113   :  { %4045 = vmatpush.bf16.msra.mxu2 %v6337_v8  ;;  %v6376_v8 = vld [vmem:[%s8069_s1 + $0x9d0] sm:$0xff] }
 0x114   :  { %4058 = vmatpush.bf16.msra.mxu3 %v6345_v9 }
 0x115   :  { %4032 = vmatpush.bf16.msra.mxu1 %v6329_v13  ;;  %v6375_v13 = vld [vmem:[%s8069_s1 + $0x9c8] sm:$0xff] }
 0x116   :  { %4020 = vmatpush.bf16.msra.mxu0 %v6320_v16  ;;  %v6359_v16 = vld [vmem:[%s8069_s1 + $0x948] sm:$0xff] }
 0x117   :  { %4046 = vmatpush.bf16.msra.mxu2 %v6336_v17  ;;  %v6350_v17 = vld [vmem:[%s8069_s1 + $0x900] sm:$0xff] }
 0x118   :  { %4059 = vmatpush.bf16.msra.mxu3 %v6344_v18  ;;  %v6366_v18 = vld [vmem:[%s8069_s1 + $0x980] sm:$0xff] }
 0x119   :  { %4033 = vmatpush.bf16.msra.mxu1 %v6328_v20  ;;  %v6389_v20 = vld [vmem:[%s8069_s1 + $0xa38] sm:$0xff] }
 0x11a   :  { %4021 = vmatpush.bf16.msra.mxu0 %v6319_v21  ;;  %v6405_v21 = vld [vmem:[%s8069_s1 + $0xab8] sm:$0xff] }
 0x11b   :  { %4047 = vmatpush.bf16.msra.mxu2 %v6335_v23  ;;  %v6358_v23 = vld [vmem:[%s8069_s1 + $0x940] sm:$0xff] }
 0x11c   :  { %4060 = vmatpush.bf16.msra.mxu3 %v6343_v24  ;;  %v41_v24 = vld [vmem:[%s8070_s0 + $0x60] sm:$0xff] }
 0x11d   :  { %4034 = vmatpush.bf16.msra.mxu1 %v6327_v27  ;;  %v6397_v27 = vld [vmem:[%s8069_s1 + $0xa78] sm:$0xff] }
 0x11e   :  { %4022 = vmatpush.bf16.msra.mxu0 %v6318_v28  ;;  %v3816_v53 = vpop.f32.mrf.mxu0  ;;  %v6388_v28 = vld [vmem:[%s8069_s1 + $0xa30] sm:$0xff] }
 0x11f   :  { %4048 = vmatpush.bf16.msra.mxu2 %v6334_v29  ;;  %v3817_v54 = vadd.f32 %v3816_v53, %v7455_v15  ;;  %v217_v29 = vpack.c.bf16 %v7528_v45, %v7528_v45  ;;  %v6402_v45 = vld [vmem:[%s8069_s1 + $0xaa0] sm:$0xff] }
 0x120   :  { %4061 = vmatpush.bf16.msra.mxu3 %v6342_v30  ;;  %v7638_v30 = vld.sshfl [vmem:[#allocation1] sm:$0xff pattern:$0x73625140] }
 0x121   :  { %4035 = vmatpush.bf16.msra.mxu1 %v6326_v34  ;;  %4023 = vmatmul.bf16.vlgmr.msra.gmra.mxu0 %v210_v36  ;;  %v3829_v58 = vpop.f32.mrf.mxu1  ;;  %v7646_v34 = vld.sshfl [vmem:[#allocation1 + $0x18] sm:$0xff pattern:$0x73625140]  ;;  %v6412_v36 = vld [vmem:[%s8069_s1 + $0xaf0] sm:$0xff] }
 0x122   :  { %4067 = vmatpush.bf16.msrb.mxu0 %v6357_v31  ;;  %4049 = vmatmul.bf16.vlgmr.msra.gmra.mxu2 %v212_v37  ;;  %v3830_v59 = vadd.f32 %v3829_v58, %v3817_v54  ;;  %v7640_v31 = vld.sshfl [vmem:[#allocation1 + $0x10] sm:$0xff pattern:$0x73625140] }
 0x123   :  { %4093 = vmatpush.bf16.msrb.mxu2 %v6373_v32  ;;  %4062 = vmatmul.bf16.vlgmr.msra.gmra.mxu3 %v213_v40  ;;  %v215_v32 = vpack.c.bf16 %v7526_v44, %v7526_v44  ;;  %v6396_v37 = vld [vmem:[%s8069_s1 + $0xa70] sm:$0xff]  ;;  %v6411_v40 = vld [vmem:[%s8069_s1 + $0xae8] sm:$0xff]  ;;  %v6386_v44 = vld [vmem:[%s8069_s1 + $0xa20] sm:$0xff] }
 0x124   :  { %4106 = vmatpush.bf16.msrb.mxu3 %v6381_v33  ;;  %4036 = vmatmul.bf16.vlgmr.msra.gmra.mxu1 %v211_v43  ;;  %v7644_v33 = vld.sshfl [vmem:[#allocation1 + $0x8] sm:$0xff pattern:$0x73625140] }
 0x125   :  { %4080 = vmatpush.bf16.msrb.mxu1 %v6365_v38  ;;  %v3842_v0 = vpop.f32.mrf.mxu2  ;;  %118 = vst [vmem:[#allocation1] ss:$4 sm:$0xff] %v41_v24  ;;  %v6387_v38 = vld [vmem:[%s8069_s1 + $0xa28] sm:$0xff]  ;;  %v6436_v24 = vld [vmem:[%s8069_s1 + $0xbb0] sm:$0xff] }
 0x126   :  { %4068 = vmatpush.bf16.msrb.mxu0 %v6356_v39  ;;  %v3843_v1 = vadd.f32 %v3842_v0, %v3830_v59  ;;  %v3855_v2 = vpop.f32.mrf.mxu3  ;;  %v3818_v4 = vpop.f32.mrf.mxu0  ;;  %v6403_v39 = vld [vmem:[%s8069_s1 + $0xaa8] sm:$0xff]  ;;  %v6384_v59 = vld [vmem:[%s8069_s1 + $0xa10] sm:$0xff] }
 0x127   :  { %4094 = vmatpush.bf16.msrb.mxu2 %v6372_v46  ;;  %v6410_v46 = vld [vmem:[%s8069_s1 + $0xae0] sm:$0xff]  ;;  %v6383_v0 = vld [vmem:[%s8069_s1 + $0xa08] sm:$0xff] }
 0x128   :  { %4107 = vmatpush.bf16.msrb.mxu3 %v6380_v47  ;;  %v7576_v5 = vadd.f32 %v3855_v2, %v3843_v1  ;;  %v6399_v1 = vld [vmem:[%s8069_s1 + $0xa88] sm:$0xff] }
 0x129   :  { %4081 = vmatpush.bf16.msrb.mxu1 %v6364_v48  ;;  %v3831_v9 = vpop.f32.mrf.mxu1  ;;  %v6407_v2 = vld [vmem:[%s8069_s1 + $0xac8] sm:$0xff] }
 0x12a   :  { %4069 = vmatpush.bf16.msrb.mxu0 %v6355_v49  ;;  %v6394_v49 = vld [vmem:[%s8069_s1 + $0xa60] sm:$0xff]  ;;  %v6421_v9 = vld [vmem:[%s8069_s1 + $0xb38] sm:$0xff] }
 0x12b   :  { %4095 = vmatpush.bf16.msrb.mxu2 %v6371_v50  ;;  %v6385_v50 = vld [vmem:[%s8069_s1 + $0xa18] sm:$0xff] }
 0x12c   :  { %4108 = vmatpush.bf16.msrb.mxu3 %v6379_v51  ;;  %v6401_v51 = vld [vmem:[%s8069_s1 + $0xa98] sm:$0xff] }
 0x12d   :  { %4082 = vmatpush.bf16.msrb.mxu1 %v6363_v52  ;;  %v3844_v14 = vpop.f32.mrf.mxu2  ;;  %v6409_v52 = vld [vmem:[%s8069_s1 + $0xad8] sm:$0xff] }
 0x12e   :  { %4070 = vmatpush.bf16.msrb.mxu0 %v6354_v55  ;;  %v3857_v15 = vpop.f32.mrf.mxu3  ;;  %v218_v14 = vpack.c.bf16 %v7638_v30, %v7638_v30  ;;  %v6427_v30 = vld [vmem:[%s8069_s1 + $0xb68] sm:$0xff] }
 0x12f   :  { %4096 = vmatpush.bf16.msrb.mxu2 %v6370_v56  ;;  %v6393_v56 = vld [vmem:[%s8069_s1 + $0xa58] sm:$0xff]  ;;  %v220_v15 = vpack.c.bf16 %v7640_v31, %v7640_v31 }
 0x130   :  { %4109 = vmatpush.bf16.msrb.mxu3 %v6378_v57 }
 0x131   :  { %4083 = vmatpush.bf16.msrb.mxu1 %v6362_v60  ;;  %v6400_v60 = vld [vmem:[%s8069_s1 + $0xa90] sm:$0xff] }
 0x132   :  { %4071 = vmatpush.bf16.msrb.mxu0 %v6353_v61  ;;  %v6408_v61 = vld [vmem:[%s8069_s1 + $0xad0] sm:$0xff] }
 0x133   :  { %4097 = vmatpush.bf16.msrb.mxu2 %v6369_v62 }
 0x134   :  { %4110 = vmatpush.bf16.msrb.mxu3 %v6377_v63  ;;  %v6392_v63 = vld [vmem:[%s8069_s1 + $0xa50] sm:$0xff] }
 0x135   :  { %4084 = vmatpush.bf16.msrb.mxu1 %v6361_v3 }
 0x136   :  { %4072 = vmatpush.bf16.msrb.mxu0 %v6352_v6  ;;  %v6382_v6 = vld [vmem:[%s8069_s1 + $0xa00] sm:$0xff] }
 0x137   :  { %4098 = vmatpush.bf16.msrb.mxu2 %v6368_v7  ;;  %v6398_v7 = vld [vmem:[%s8069_s1 + $0xa80] sm:$0xff] }
 0x138   :  { %4111 = vmatpush.bf16.msrb.mxu3 %v6376_v8  ;;  %v6406_v8 = vld [vmem:[%s8069_s1 + $0xac0] sm:$0xff] }
 0x139   :  { %4085 = vmatpush.bf16.msrb.mxu1 %v6360_v10  ;;  %v6437_v10 = vld [vmem:[%s8069_s1 + $0xbb8] sm:$0xff] }
 0x13a   :  { %4073 = vmatpush.bf16.msrb.mxu0 %v6351_v11  ;;  %v6445_v11 = vld [vmem:[%s8069_s1 + $0xbf8] sm:$0xff] }
 0x13b   :  { %4099 = vmatpush.bf16.msrb.mxu2 %v6367_v12  ;;  %v6390_v12 = vld [vmem:[%s8069_s1 + $0xa40] sm:$0xff] }
 0x13c   :  { %4112 = vmatpush.bf16.msrb.mxu3 %v6375_v13  ;;  %v42_v13 = vld [vmem:[%s8070_s0 + $0x68] sm:$0x3] }
 0x13d   :  { %4086 = vmatpush.bf16.msrb.mxu1 %v6359_v16  ;;  %v6429_v16 = vld [vmem:[%s8069_s1 + $0xb78] sm:$0xff] }
 0x13e   :  { %4074 = vmatpush.bf16.msrb.mxu0 %v6350_v17  ;;  %v3868_v42 = vpop.f32.mrf.mxu0  ;;  %v6420_v17 = vld [vmem:[%s8069_s1 + $0xb30] sm:$0xff] }
 0x13f   :  { %4100 = vmatpush.bf16.msrb.mxu2 %v6366_v18  ;;  %v3869_v43 = vadd.f32 %v3868_v42, %v7576_v5  ;;  %v6391_v5 = vld [vmem:[%s8069_s1 + $0xa48] sm:$0xff]  ;;  %v221_v18 = vpack.c.bf16 %v7646_v34, %v7646_v34  ;;  %v6434_v34 = vld [vmem:[%s8069_s1 + $0xba0] sm:$0xff] }
 0x140   :  { %4113 = vmatpush.bf16.msrb.mxu3 %v6374_v19  ;;  %v7756_v19 = vld.sshfl [vmem:[#allocation1 + $0x20] sm:$0xff pattern:$0x73625140] }
 0x141   :  { %4087 = vmatpush.bf16.msrb.mxu1 %v6358_v23  ;;  %4075 = vmatmul.bf16.vlgmr.msrb.gmra.mxu0 %v214_v25  ;;  %v3881_v47 = vpop.f32.mrf.mxu1  ;;  %v7764_v23 = vld.sshfl [vmem:[#allocation1 + $0x38] sm:$0xff pattern:$0x73625140]  ;;  %v6444_v25 = vld [vmem:[%s8069_s1 + $0xbf0] sm:$0xff] }
 0x142   :  { %4119 = vmatpush.bf16.msra.mxu0 %v6389_v20  ;;  %4101 = vmatmul.bf16.vlgmr.msrb.gmra.mxu2 %v216_v26  ;;  %v3882_v48 = vadd.f32 %v3881_v47, %v3869_v43  ;;  %v7758_v20 = vld.sshfl [vmem:[#allocation1 + $0x30] sm:$0xff pattern:$0x73625140] }
 0x143   :  { %4145 = vmatpush.bf16.msra.mxu2 %v6405_v21  ;;  %4114 = vmatmul.bf16.vlgmr.msrb.gmra.mxu3 %v217_v29  ;;  %v219_v21 = vpack.c.bf16 %v7644_v33, %v7644_v33  ;;  %v6428_v26 = vld [vmem:[%s8069_s1 + $0xb70] sm:$0xff]  ;;  %v6443_v29 = vld [vmem:[%s8069_s1 + $0xbe8] sm:$0xff]  ;;  %v6418_v33 = vld [vmem:[%s8069_s1 + $0xb20] sm:$0xff] }
 0x144   :  { %4158 = vmatpush.bf16.msra.mxu3 %v6413_v22  ;;  %4088 = vmatmul.bf16.vlgmr.msrb.gmra.mxu1 %v215_v32  ;;  %v7762_v22 = vld.sshfl [vmem:[#allocation1 + $0x28] sm:$0xff pattern:$0x73625140] }
 0x145   :  { %4132 = vmatpush.bf16.msra.mxu1 %v6397_v27  ;;  %v3894_v53 = vpop.f32.mrf.mxu2  ;;  %119 = vst [vmem:[#allocation1 + $0x20] ss:$4 sm:$0xff] %v42_v13  ;;  %v6419_v27 = vld [vmem:[%s8069_s1 + $0xb28] sm:$0xff] }
 0x146   :  { %4120 = vmatpush.bf16.msra.mxu0 %v6388_v28  ;;  %v3895_v54 = vadd.f32 %v3894_v53, %v3882_v48  ;;  %v3907_v55 = vpop.f32.mrf.mxu3  ;;  %v3870_v57 = vpop.f32.mrf.mxu0  ;;  %v6435_v28 = vld [vmem:[%s8069_s1 + $0xba8] sm:$0xff]  ;;  %v6416_v48 = vld [vmem:[%s8069_s1 + $0xb10] sm:$0xff] }
 0x147   :  { %4146 = vmatpush.bf16.msra.mxu2 %v6404_v35  ;;  %v6442_v35 = vld [vmem:[%s8069_s1 + $0xbe0] sm:$0xff]  ;;  %v6415_v53 = vld [vmem:[%s8069_s1 + $0xb08] sm:$0xff] }
 0x148   :  { %4159 = vmatpush.bf16.msra.mxu3 %v6412_v36  ;;  %v7694_v58 = vadd.f32 %v3907_v55, %v3895_v54  ;;  %v6431_v54 = vld [vmem:[%s8069_s1 + $0xb88] sm:$0xff] }
 0x149   :  { %4133 = vmatpush.bf16.msra.mxu1 %v6396_v37  ;;  %v3883_v62 = vpop.f32.mrf.mxu1  ;;  %v6439_v55 = vld [vmem:[%s8069_s1 + $0xbc8] sm:$0xff] }
 0x14a   :  { %4121 = vmatpush.bf16.msra.mxu0 %v6387_v38  ;;  %v6426_v38 = vld [vmem:[%s8069_s1 + $0xb60] sm:$0xff]  ;;  %v6453_v62 = vld [vmem:[%s8069_s1 + $0xc38] sm:$0xff]  ;;  %v6475_v13 = vld [vmem:[%s8069_s1 + $0xce8] sm:$0xff] }
 0x14b   :  { %4147 = vmatpush.bf16.msra.mxu2 %v6403_v39  ;;  %v6417_v39 = vld [vmem:[%s8069_s1 + $0xb18] sm:$0xff] }
 0x14c   :  { %4160 = vmatpush.bf16.msra.mxu3 %v6411_v40  ;;  %v6433_v40 = vld [vmem:[%s8069_s1 + $0xb98] sm:$0xff] }
 0x14d   :  { %4134 = vmatpush.bf16.msra.mxu1 %v6395_v41  ;;  %v3896_v3 = vpop.f32.mrf.mxu2  ;;  %v6441_v41 = vld [vmem:[%s8069_s1 + $0xbd8] sm:$0xff] }
 0x14e   :  { %4122 = vmatpush.bf16.msra.mxu0 %v6386_v44  ;;  %v3909_v4 = vpop.f32.mrf.mxu3  ;;  %v224_v3 = vpack.c.bf16 %v7758_v20, %v7758_v20 }
 0x14f   :  { %4148 = vmatpush.bf16.msra.mxu2 %v6402_v45  ;;  %v6425_v45 = vld [vmem:[%s8069_s1 + $0xb58] sm:$0xff] }
 0x150   :  { %4161 = vmatpush.bf16.msra.mxu3 %v6410_v46  ;;  %v6461_v4 = vld [vmem:[%s8069_s1 + $0xc78] sm:$0xff] }
 0x151   :  { %4135 = vmatpush.bf16.msra.mxu1 %v6394_v49  ;;  %v6432_v49 = vld [vmem:[%s8069_s1 + $0xb90] sm:$0xff] }
 0x152   :  { %4123 = vmatpush.bf16.msra.mxu0 %v6385_v50  ;;  %v6440_v50 = vld [vmem:[%s8069_s1 + $0xbd0] sm:$0xff] }
 0x153   :  { %4149 = vmatpush.bf16.msra.mxu2 %v6401_v51 }
 0x154   :  { %4162 = vmatpush.bf16.msra.mxu3 %v6409_v52  ;;  %v6424_v52 = vld [vmem:[%s8069_s1 + $0xb50] sm:$0xff] }
 0x155   :  { %4136 = vmatpush.bf16.msra.mxu1 %v6393_v56 }
 0x156   :  { %4124 = vmatpush.bf16.msra.mxu0 %v6384_v59  ;;  %v6414_v59 = vld [vmem:[%s8069_s1 + $0xb00] sm:$0xff] }
 0x157   :  { %4150 = vmatpush.bf16.msra.mxu2 %v6400_v60  ;;  %v6430_v60 = vld [vmem:[%s8069_s1 + $0xb80] sm:$0xff] }
 0x158   :  { %4163 = vmatpush.bf16.msra.mxu3 %v6408_v61  ;;  %v6438_v61 = vld [vmem:[%s8069_s1 + $0xbc0] sm:$0xff] }
 0x159   :  { %4137 = vmatpush.bf16.msra.mxu1 %v6392_v63  ;;  %v6469_v63 = vld [vmem:[%s8069_s1 + $0xcb8] sm:$0xff] }
 0x15a   :  { %4125 = vmatpush.bf16.msra.mxu0 %v6383_v0  ;;  %v6477_v0 = vld [vmem:[%s8069_s1 + $0xcf8] sm:$0xff] }
 0x15b   :  { %4151 = vmatpush.bf16.msra.mxu2 %v6399_v1  ;;  %v6422_v1 = vld [vmem:[%s8069_s1 + $0xb40] sm:$0xff] }
 0x15c   :  { %4164 = vmatpush.bf16.msra.mxu3 %v6407_v2  ;;  %v222_v2 = vpack.c.bf16 %v7756_v19, %v7756_v19  ;;  %v6474_v19 = vld [vmem:[%s8069_s1 + $0xce0] sm:$0xff] }
 0x15d   :  { %4138 = vmatpush.bf16.msra.mxu1 %v6391_v5  ;;  %v225_v5 = vpack.c.bf16 %v7764_v23, %v7764_v23  ;;  %v6449_v23 = vld [vmem:[%s8069_s1 + $0xc18] sm:$0xff] }
 0x15e   :  { %4126 = vmatpush.bf16.msra.mxu0 %v6382_v6  ;;  %v3920_v31 = vpop.f32.mrf.mxu0  ;;  %v223_v6 = vpack.c.bf16 %v7762_v22, %v7762_v22  ;;  %v6458_v22 = vld [vmem:[%s8069_s1 + $0xc60] sm:$0xff] }
 0x15f   :  { %4152 = vmatpush.bf16.msra.mxu2 %v6398_v7  ;;  %v3921_v32 = vadd.f32 %v3920_v31, %v7694_v58  ;;  %v6423_v58 = vld [vmem:[%s8069_s1 + $0xb48] sm:$0xff]  ;;  %v6452_v7 = vld [vmem:[%s8069_s1 + $0xc30] sm:$0xff] }
 0x160   :  { %4165 = vmatpush.bf16.msra.mxu3 %v6406_v8  ;;  %v6468_v8 = vld [vmem:[%s8069_s1 + $0xcb0] sm:$0xff] }
 0x161   :  { %4139 = vmatpush.bf16.msra.mxu1 %v6390_v12  ;;  %4127 = vmatmul.bf16.vlgmr.msra.gmra.mxu0 %v218_v14  ;;  %v3933_v36 = vpop.f32.mrf.mxu1  ;;  %v6467_v12 = vld [vmem:[%s8069_s1 + $0xca8] sm:$0xff] }
 0x162   :  { %4171 = vmatpush.bf16.msrb.mxu0 %v6421_v9  ;;  %4153 = vmatmul.bf16.vlgmr.msra.gmra.mxu2 %v220_v15  ;;  %v3934_v37 = vadd.f32 %v3933_v36, %v3921_v32  ;;  %v6476_v9 = vld [vmem:[%s8069_s1 + $0xcf0] sm:$0xff]  ;;  %v6459_v14 = vld [vmem:[%s8069_s1 + $0xc68] sm:$0xff] }
 0x163   :  { %4197 = vmatpush.bf16.msrb.mxu2 %v6437_v10  ;;  %4166 = vmatmul.bf16.vlgmr.msra.gmra.mxu3 %v221_v18  ;;  %v6460_v10 = vld [vmem:[%s8069_s1 + $0xc70] sm:$0xff]  ;;  %v6466_v18 = vld [vmem:[%s8069_s1 + $0xca0] sm:$0xff] }
 0x164   :  { %4210 = vmatpush.bf16.msrb.mxu3 %v6445_v11  ;;  %4140 = vmatmul.bf16.vlgmr.msra.gmra.mxu1 %v219_v21  ;;  %v6451_v11 = vld [vmem:[%s8069_s1 + $0xc28] sm:$0xff]  ;;  %v6448_v32 = vld [vmem:[%s8069_s1 + $0xc10] sm:$0xff] }
 0x165   :  { %4184 = vmatpush.bf16.msrb.mxu1 %v6429_v16  ;;  %v3946_v42 = vpop.f32.mrf.mxu2  ;;  %v6456_v36 = vld [vmem:[%s8069_s1 + $0xc50] sm:$0xff] }
 0x166   :  { %4172 = vmatpush.bf16.msrb.mxu0 %v6420_v17  ;;  %v3947_v43 = vadd.f32 %v3946_v42, %v3934_v37  ;;  %v3959_v44 = vpop.f32.mrf.mxu3  ;;  %v3922_v46 = vpop.f32.mrf.mxu0  ;;  %v6450_v17 = vld [vmem:[%s8069_s1 + $0xc20] sm:$0xff]  ;;  %v6447_v37 = vld [vmem:[%s8069_s1 + $0xc08] sm:$0xff] }
 0x167   :  { %4198 = vmatpush.bf16.msrb.mxu2 %v6436_v24  ;;  %v6465_v24 = vld [vmem:[%s8069_s1 + $0xc98] sm:$0xff]  ;;  %v6455_v42 = vld [vmem:[%s8069_s1 + $0xc48] sm:$0xff]  ;;  %v120_v46 = vld.sshfl [vmem:[#allocation1] sm:$0xff pattern:$0x73625140] }
 0x168   :  { %4211 = vmatpush.bf16.msrb.mxu3 %v6444_v25  ;;  %v3960_v47 = vadd.f32 %v3959_v44, %v3947_v43  ;;  %v6473_v25 = vld [vmem:[%s8069_s1 + $0xcd8] sm:$0xff]  ;;  %v6446_v43 = vld [vmem:[%s8069_s1 + $0xc00] sm:$0xff] }
 0x169   :  { %4185 = vmatpush.bf16.msrb.mxu1 %v6428_v26  ;;  %v3935_v51 = vpop.f32.mrf.mxu1  ;;  %v6462_v44 = vld [vmem:[%s8069_s1 + $0xc80] sm:$0xff] }
 0x16a   :  { %4173 = vmatpush.bf16.msrb.mxu0 %v6419_v27  ;;  %v226_v51 = vpack.c.bf16 %v120_v46, %v120_v46 }
 0x16b   :  { %4199 = vmatpush.bf16.msrb.mxu2 %v6435_v28 }
 0x16c   :  { %4212 = vmatpush.bf16.msrb.mxu3 %v6443_v29  ;;  %v6457_v29 = vld [vmem:[%s8069_s1 + $0xc58] sm:$0xff] }
 0x16d   :  { %4186 = vmatpush.bf16.msrb.mxu1 %v6427_v30  ;;  %v3948_v56 = vpop.f32.mrf.mxu2 }
 0x16e   :  { %4174 = vmatpush.bf16.msrb.mxu0 %v6418_v33  ;;  %v3961_v57 = vpop.f32.mrf.mxu3  ;;  %v6464_v33 = vld [vmem:[%s8069_s1 + $0xc90] sm:$0xff] }
 0x16f   :  { %4200 = vmatpush.bf16.msrb.mxu2 %v6434_v34  ;;  %v6472_v34 = vld [vmem:[%s8069_s1 + $0xcd0] sm:$0xff]  ;;  %v6479_v57 = vld [vmem:[%s8069_s1 + $0xd08] sm:$0xff] }
 0x170   :  { %4213 = vmatpush.bf16.msrb.mxu3 %v6442_v35  ;;  %v6480_v56 = vld [vmem:[%s8069_s1 + $0xd10] sm:$0xff] }
 0x171   :  { %4187 = vmatpush.bf16.msrb.mxu1 %v6426_v38  ;;  %v6463_v38 = vld [vmem:[%s8069_s1 + $0xc88] sm:$0xff] }
 0x172   :  { %4175 = vmatpush.bf16.msrb.mxu0 %v6417_v39  ;;  %v6471_v39 = vld [vmem:[%s8069_s1 + $0xcc8] sm:$0xff] }
 0x173   :  { %4201 = vmatpush.bf16.msrb.mxu2 %v6433_v40 }
 0x174   :  { %4214 = vmatpush.bf16.msrb.mxu3 %v6441_v41 }
 0x175   :  { %4188 = vmatpush.bf16.msrb.mxu1 %v6425_v45  ;;  %v6470_v45 = vld [vmem:[%s8069_s1 + $0xcc0] sm:$0xff] }
 0x176   :  { %4176 = vmatpush.bf16.msrb.mxu0 %v6416_v48  ;;  %v123_v48 = vld.sshfl [vmem:[#allocation1 + $0x18] sm:$0xff pattern:$0x73625140] }
 0x177   :  { %4202 = vmatpush.bf16.msrb.mxu2 %v6432_v49  ;;  %v6481_v49 = vld [vmem:[%s8069_s1 + $0xd18] sm:$0xff] }
 0x178   :  { %4215 = vmatpush.bf16.msrb.mxu3 %v6440_v50  ;;  %v6454_v50 = vld [vmem:[%s8069_s1 + $0xc40] sm:$0xff] }
 0x179   :  { %4189 = vmatpush.bf16.msrb.mxu1 %v6424_v52  ;;  %v121_v52 = vld.sshfl [vmem:[#allocation1 + $0x8] sm:$0xff pattern:$0x73625140] }
 0x17a   :  { %4177 = vmatpush.bf16.msrb.mxu0 %v6415_v53 }
 0x17b   :  { %4203 = vmatpush.bf16.msrb.mxu2 %v6431_v54  ;;  %v229_v54 = vpack.c.bf16 %v123_v48, %v123_v48  ;;  %v4292_v48 = vld [vmem:[%s8073_s3 + $0x18] sm:$0xff] }
 0x17c   :  { %4216 = vmatpush.bf16.msrb.mxu3 %v6439_v55  ;;  %v227_v55 = vpack.c.bf16 %v121_v52, %v121_v52 }
 0x17d   :  { %4190 = vmatpush.bf16.msrb.mxu1 %v6423_v58 }
 0x17e   :  { %4178 = vmatpush.bf16.msrb.mxu0 %v6414_v59  ;;  %v3972_v15 = vpop.f32.mrf.mxu0 }
 0x17f   :  { %4204 = vmatpush.bf16.msrb.mxu2 %v6430_v60  ;;  %v3973_v16 = vadd.f32 %v3972_v15, %v3960_v47  ;;  %v122_v47 = vld.sshfl [vmem:[#allocation1 + $0x10] sm:$0xff pattern:$0x73625140]  ;;  %v6478_v60 = vld [vmem:[%s8069_s1 + $0xd00] sm:$0xff] }
 0x180   :  { %4217 = vmatpush.bf16.msrb.mxu3 %v6438_v61  ;;  %v228_v53 = vpack.c.bf16 %v122_v47, %v122_v47 }
 0x181   :  { %4191 = vmatpush.bf16.msrb.mxu1 %v6422_v1  ;;  %4179 = vmatmul.bf16.vlgmr.msrb.gmra.mxu0 %v222_v2  ;;  %v3985_v20 = vpop.f32.mrf.mxu1 }
 0x182   :  { %4223 = vmatpush.bf16.msra.mxu0 %v6453_v62  ;;  %4205 = vmatmul.bf16.vlgmr.msrb.gmra.mxu2 %v224_v3  ;;  %v3986_v21 = vadd.f32 %v3985_v20, %v3973_v16 }
 0x183   :  { %4249 = vmatpush.bf16.msra.mxu2 %v6469_v63  ;;  %4218 = vmatmul.bf16.vlgmr.msrb.gmra.mxu3 %v225_v5  ;;  %v124_v63 = vld.sshfl [vmem:[#allocation1 + $0x20] sm:$0xff pattern:$0x73625140] }
 0x184   :  { %4262 = vmatpush.bf16.msra.mxu3 %v6477_v0  ;;  %4192 = vmatmul.bf16.vlgmr.msrb.gmra.mxu1 %v223_v6  ;;  %v230_v1 = vpack.c.bf16 %v124_v63, %v124_v63  ;;  %v4341_v63 = vld [vmem:[%s8074_s5 + $0x58] sm:$0xff] }
 0x185   :  { %4236 = vmatpush.bf16.msra.mxu1 %v6461_v4  ;;  %v3998_v26 = vpop.f32.mrf.mxu2 }
 0x186   :  { %4224 = vmatpush.bf16.msra.mxu0 %v6452_v7  ;;  %v3999_v27 = vadd.f32 %v3998_v26, %v3986_v21  ;;  %v4011_v28 = vpop.f32.mrf.mxu3  ;;  %v3974_v30 = vpop.f32.mrf.mxu0  ;;  %v4303_v26 = vld [vmem:[%s8073_s3 + $0x70] sm:$0xff] }
 0x187   :  { %4250 = vmatpush.bf16.msra.mxu2 %v6468_v8  ;;  %v4301_v30 = vld [vmem:[%s8073_s3 + $0x60] sm:$0xff] }
 0x188   :  { %4263 = vmatpush.bf16.msra.mxu3 %v6476_v9  ;;  %v4012_v31 = vadd.f32 %v4011_v28, %v3999_v27  ;;  %v4302_v28 = vld [vmem:[%s8073_s3 + $0x68] sm:$0xff] }
 0x189   :  { %4237 = vmatpush.bf16.msra.mxu1 %v6460_v10  ;;  %v3987_v35 = vpop.f32.mrf.mxu1 }
 0x18a   :  { %4225 = vmatpush.bf16.msra.mxu0 %v6451_v11  ;;  %v4298_v35 = vld [vmem:[%s8073_s3 + $0x48] sm:$0xff] }
 0x18b   :  { %4251 = vmatpush.bf16.msra.mxu2 %v6467_v12 }
 0x18c   :  { %4264 = vmatpush.bf16.msra.mxu3 %v6475_v13 }
 0x18d   :  { %4238 = vmatpush.bf16.msra.mxu1 %v6459_v14  ;;  %v4000_v40 = vpop.f32.mrf.mxu2 }
 0x18e   :  { %4226 = vmatpush.bf16.msra.mxu0 %v6450_v17  ;;  %v4013_v41 = vpop.f32.mrf.mxu3  ;;  %v4295_v40 = vld [vmem:[%s8073_s3 + $0x30] sm:$0xff] }
 0x18f   :  { %4252 = vmatpush.bf16.msra.mxu2 %v6466_v18 }
 0x190   :  { %4265 = vmatpush.bf16.msra.mxu3 %v6474_v19 }
 0x191   :  { %4239 = vmatpush.bf16.msra.mxu1 %v6458_v22 }
 0x192   :  { %4227 = vmatpush.bf16.msra.mxu0 %v6449_v23 }
 0x193   :  { %4253 = vmatpush.bf16.msra.mxu2 %v6465_v24 }
 0x194   :  { %4266 = vmatpush.bf16.msra.mxu3 %v6473_v25  ;;  %v4304_v25 = vld [vmem:[%s8073_s3 + $0x78] sm:$0xff] }
 0x195   :  { %4240 = vmatpush.bf16.msra.mxu1 %v6457_v29 }
 0x196   :  { %4228 = vmatpush.bf16.msra.mxu0 %v6448_v32 }
 0x197   :  { %4254 = vmatpush.bf16.msra.mxu2 %v6464_v33 }
 0x198   :  { %4267 = vmatpush.bf16.msra.mxu3 %v6472_v34  ;;  %v4299_v34 = vld [vmem:[%s8073_s3 + $0x50] sm:$0xff] }
 0x199   :  { %4241 = vmatpush.bf16.msra.mxu1 %v6456_v36 }
 0x19a   :  { %4229 = vmatpush.bf16.msra.mxu0 %v6447_v37  ;;  %v4297_v37 = vld [vmem:[%s8073_s3 + $0x40] sm:$0xff] }
 0x19b   :  { %4255 = vmatpush.bf16.msra.mxu2 %v6463_v38 }
 0x19c   :  { %4268 = vmatpush.bf16.msra.mxu3 %v6471_v39  ;;  %v4296_v39 = vld [vmem:[%s8073_s3 + $0x38] sm:$0xff] }
 0x19d   :  { %4242 = vmatpush.bf16.msra.mxu1 %v6455_v42 }
 0x19e   :  { %4230 = vmatpush.bf16.msra.mxu0 %v6446_v43  ;;  %v4024_v58 = vpop.f32.mrf.mxu0  ;;  %v4294_v43 = vld [vmem:[%s8073_s3 + $0x28] sm:$0xff] }
 0x19f   :  { %4256 = vmatpush.bf16.msra.mxu2 %v6462_v44  ;;  %v4025_v59 = vadd.f32 %v4024_v58, %v4012_v31  ;;  %v4300_v31 = vld [vmem:[%s8073_s3 + $0x58] sm:$0xff]  ;;  %v4344_v58 = vld [vmem:[%s8074_s5 + $0x70] sm:$0xff] }
 0x1a0   :  { %4269 = vmatpush.bf16.msra.mxu3 %v6470_v45  ;;  %v4293_v45 = vld [vmem:[%s8073_s3 + $0x20] sm:$0xff] }
 0x1a1   :  { %4243 = vmatpush.bf16.msra.mxu1 %v6454_v50  ;;  %4231 = vmatmul.bf16.vlgmr.msra.gmra.mxu0 %v226_v51  ;;  %v4037_v61 = vpop.f32.mrf.mxu1 }
 0x1a2   :  { %4279 = vmatpush.bf16.msrb.mxu0 %v6481_v49  ;;  %4257 = vmatmul.bf16.vlgmr.msra.gmra.mxu2 %v228_v53  ;;  %v4038_v62 = vadd.f32 %v4037_v61, %v4025_v59  ;;  %v4291_v49 = vld [vmem:[%s8073_s3 + $0x10] sm:$0xff]  ;;  %v4290_v53 = vld [vmem:[%s8073_s3 + $0x8] sm:$0xff]  ;;  %v4342_v61 = vld [vmem:[%s8074_s5 + $0x60] sm:$0xff] }
 0x1a3   :  { %4270 = vmatmul.bf16.vlgmr.msra.gmra.mxu3 %v229_v54 }
 0x1a4   :  { %4244 = vmatmul.bf16.vlgmr.msra.gmra.mxu1 %v227_v55  ;;  %v4289_v55 = vld [vmem:[%s8073_s3] sm:$0xff] }
 0x1a5   :  { %v4050_v0 = vpop.f32.mrf.mxu2  ;;  %4309 = vmatpush.msrb.mxu1 %v4304_v25 }
 0x1a6   :  { %4280 = vmatpush.bf16.msrb.mxu0 %v6480_v56  ;;  %v4051_v2 = vadd.f32 %v4050_v0, %v4038_v62  ;;  %v4063_v3 = vpop.f32.mrf.mxu3  ;;  %v4026_v4 = vpop.f32.mrf.mxu0 }
 0x1a7   :  { %4310 = vmatpush.msrb.mxu1 %v4303_v26  ;;  %v4332_v26 = vld [vmem:[%s8074_s5 + $0x10] sm:$0xff] }
 0x1a8   :  { %v4064_v5 = vadd.f32 %v4063_v3, %v4051_v2  ;;  %v4340_v2 = vld [vmem:[%s8074_s5 + $0x50] sm:$0xff]  ;;  %v4339_v3 = vld [vmem:[%s8074_s5 + $0x48] sm:$0xff] }
 0x1a9   :  { %v4039_v6 = vpop.f32.mrf.mxu1  ;;  %4311 = vmatpush.msrb.mxu1 %v4302_v28  ;;  %v4330_v28 = vld [vmem:[%s8074_s5] sm:$0xff] }
 0x1aa   :  { %4281 = vmatpush.bf16.msrb.mxu0 %v6479_v57  ;;  %v4345_v57 = vld [vmem:[%s8074_s5 + $0x78] sm:$0xff]  ;;  %v4338_v6 = vld [vmem:[%s8074_s5 + $0x40] sm:$0xff] }
 0x1ab   :  { %4312 = vmatpush.msrb.mxu1 %v4301_v30  ;;  %4350 = vmatpush.msrb.mxu2 %v4345_v57  ;;  %v6483_v30 = vld [vmem:[%s8072_s4] ss:$0 sm:$0xff] }
 0x1ad   :  { %v4052_v7 = vpop.f32.mrf.mxu2  ;;  %4313 = vmatpush.msrb.mxu1 %v4300_v31  ;;  %4351 = vmatpush.msrb.mxu2 %v4344_v58 }
 0x1ae   :  { %4282 = vmatpush.bf16.msrb.mxu0 %v6478_v60  ;;  %v4065_v8 = vpop.f32.mrf.mxu3  ;;  %v4343_v60 = vld [vmem:[%s8074_s5 + $0x68] sm:$0xff] }
 0x1af   :  { %4314 = vmatpush.msrb.mxu1 %v4299_v34  ;;  %4352 = vmatpush.msrb.mxu2 %v4343_v60  ;;  %v4337_v8 = vld [vmem:[%s8074_s5 + $0x38] sm:$0xff] }
 0x1b1   :  { %6061 = vmatmul.msk.bf16.vlgmr.msrb.gmra.mxu0 %vm3595_vm0, %v230_v1  ;;  %4315 = vmatpush.msrb.mxu1 %v4298_v35 }
 0x1b2   :  { %4353 = vmatpush.msrb.mxu2 %v4342_v61 }
 0x1b3   :  { %4316 = vmatpush.msrb.mxu1 %v4297_v37 }
 0x1b4   :  { %4354 = vmatpush.msrb.mxu2 %v4341_v63 }
 0x1b5   :  { %4317 = vmatpush.msrb.mxu1 %v4296_v39 }
 0x1b6   :  { %4355 = vmatpush.msrb.mxu2 %v4340_v2 }
 0x1b7   :  { %4318 = vmatpush.msrb.mxu1 %v4295_v40 }
 0x1b8   :  { %4356 = vmatpush.msrb.mxu2 %v4339_v3 }
 0x1b9   :  { %4319 = vmatpush.msrb.mxu1 %v4294_v43 }
 0x1ba   :  { %4357 = vmatpush.msrb.mxu2 %v4338_v6 }
 0x1bb   :  { %4320 = vmatpush.msrb.mxu1 %v4293_v45 }
 0x1bc   :  { %4358 = vmatpush.msrb.mxu2 %v4337_v8 }
 0x1bd   :  { %4321 = vmatpush.msrb.mxu1 %v4292_v48 }
 0x1be   :  { %v4076_v9 = vpop.f32.mrf.mxu0 }
 0x1bf   :  { %v4077_v10 = vadd.f32 %v4076_v9, %v4064_v5  ;;  %4322 = vmatpush.msrb.mxu1 %v4291_v49 }
 0x1c1   :  { %v4089_v11 = vpop.f32.mrf.mxu1  ;;  %4323 = vmatpush.msrb.mxu1 %v4290_v53 }
 0x1c2   :  { %v4090_v12 = vadd.f32 %v4089_v11, %v4077_v10 }
 0x1c3   :  { %4324 = vmatpush.msrb.mxu1 %v4289_v55 }
 0x1c5   :  { %v4102_v13 = vpop.f32.mrf.mxu2 }
 0x1c6   :  { %v4103_v14 = vadd.f32 %v4102_v13, %v4090_v12  ;;  %v4115_v15 = vpop.f32.mrf.mxu3  ;;  %v4078_v16 = vpop.f32.mrf.mxu0  ;;  %v4336_v12 = vld [vmem:[%s8074_s5 + $0x30] sm:$0xff] }
 0x1c7   :  { %4359 = vmatpush.msrb.mxu2 %v4336_v12 }
 0x1c8   :  { %v4116_v17 = vadd.f32 %v4115_v15, %v4103_v14  ;;  %v4335_v14 = vld [vmem:[%s8074_s5 + $0x28] sm:$0xff] }
 0x1c9   :  { %v4091_v18 = vpop.f32.mrf.mxu1  ;;  %4360 = vmatpush.msrb.mxu2 %v4335_v14 }
 0x1ca   :  { %v4333_v18 = vld [vmem:[%s8074_s5 + $0x18] sm:$0xff] }
 0x1cd   :  { %v4104_v19 = vpop.f32.mrf.mxu2 }
 0x1ce   :  { %v4117_v20 = vpop.f32.mrf.mxu3 }
 0x1de   :  { %v4128_v21 = vpop.f32.mrf.mxu0 }
 0x1df   :  { %v4129_v46 = vadd.f32 %v4128_v21, %v4116_v17  ;;  %v4334_v17 = vld [vmem:[%s8074_s5 + $0x20] sm:$0xff] }
 0x1e0   :  { %4361 = vmatpush.msrb.mxu2 %v4334_v17 }
 0x1e1   :  { %v4141_v22 = vpop.f32.mrf.mxu1 }
 0x1e2   :  { %v4142_v50 = vadd.f32 %v4141_v22, %v4129_v46  ;;  %4362 = vmatpush.msrb.mxu2 %v4333_v18 }
 0x1e4   :  { %4363 = vmatpush.msrb.mxu2 %v4332_v26 }
 0x1e5   :  { %v4154_v23 = vpop.f32.mrf.mxu2 }
 0x1e6   :  { %v4167_v24 = vpop.f32.mrf.mxu3  ;;  %v4130_v27 = vpop.f32.mrf.mxu0  ;;  %v4155_v54 = vadd.f32 %v4154_v23, %v4142_v50 }
 0x1e7   :  { %v4331_v27 = vld [vmem:[%s8074_s5 + $0x8] sm:$0xff] }
 0x1e8   :  { %v4168_v56 = vadd.f32 %v4167_v24, %v4155_v54  ;;  %4364 = vmatpush.msrb.mxu2 %v4331_v27 }
 0x1e9   :  { %v4143_v29 = vpop.f32.mrf.mxu1 }
 0x1ea   :  { %4365 = vmatpush.msrb.mxu2 %v4330_v28  ;;  %v12_v29 = vstv %s8075_s6 }
 0x1eb   :  { %13 = vst [vmem:[#allocation2] sm:$0x1] %v12_v29 }
 0x1ed   :  { %v4156_v32 = vpop.f32.mrf.mxu2 }
 0x1ee   :  { %v4169_v33 = vpop.f32.mrf.mxu3 }
 0x1f2   :  { %v6484_v34 = vld [vmem:[#allocation2] ss:$0 sm:$0xff] }
 0x1fe   :  { %v4180_v36 = vpop.f32.mrf.mxu0 }
 0x1ff   :  { %v4181_v59 = vadd.f32 %v4180_v36, %v4168_v56 }
 0x201   :  { %v4193_v38 = vpop.f32.mrf.mxu1 }
 0x202   :  { %v4194_v62 = vadd.f32 %v4193_v38, %v4181_v59 }
 0x205   :  { %v4206_v41 = vpop.f32.mrf.mxu2 }
 0x206   :  { %v4219_v42 = vpop.f32.mrf.mxu3  ;;  %v4182_v44 = vpop.f32.mrf.mxu0  ;;  %v4207_v0 = vadd.f32 %v4206_v41, %v4194_v62 }
 0x208   :  { %v4220_v4 = vadd.f32 %v4219_v42, %v4207_v0 }
 0x209   :  { %v4195_v47 = vpop.f32.mrf.mxu1 }
 0x20d   :  { %v4208_v51 = vpop.f32.mrf.mxu2 }
 0x20e   :  { %v4221_v52 = vpop.f32.mrf.mxu3 }
 0x21e   :  { %v4232_v1 = vpop.f32.mrf.mxu0 }
 0x21f   :  { %v4233_v7 = vadd.f32 %v4232_v1, %v4220_v4 }
 0x221   :  { %v4245_v5 = vpop.f32.mrf.mxu1 }
 0x222   :  { %v4246_v13 = vadd.f32 %v4245_v5, %v4233_v7 }
 0x225   :  { %v4258_v9 = vpop.f32.mrf.mxu2 }
 0x226   :  { %v4271_v10 = vpop.f32.mrf.mxu3  ;;  %v4234_v11 = vpop.f32.mrf.mxu0  ;;  %v4259_v15 = vadd.f32 %v4258_v9, %v4246_v13 }
 0x228   :  { %v4272_v19 = vadd.f32 %v4271_v10, %v4259_v15 }
 0x229   :  { %v4247_v16 = vpop.f32.mrf.mxu1 }
 0x22d   :  { %v4260_v20 = vpop.f32.mrf.mxu2 }
 0x22e   :  { %v4273_v21 = vpop.f32.mrf.mxu3  ;;  %v4284_v22 = vpop.f32.mrf.mxu0 }
 0x22f   :  { %v4285_v23 = vadd.f32 %v4284_v22, %v4272_v19 }
 0x231   :  { %v4288_v24 = vmax.f32 %v4285_v23, 0.0 }
 0x233   :  { %4325 = vmatmul.f32.vlgmr.msrb.gmra.mxu1 %v4288_v24 }
 0x236   :  { %v4286_v25 = vpop.f32.mrf.mxu0 }
 0x2b0   :  { %v4326_v31 = vpop.f32.mrf.mxu1 }
 0x2b1   :  { %v4327_v32 = vadd.f32 %v6483_v30, %v4326_v31 }
 0x2b3   :  { %v4329_v33 = vmax.f32 %v4327_v32, 0.0 }
 0x2b5   :  { %4366 = vmatmul.f32.vlgmr.msrb.gmra.mxu2 %v4329_v33 }
 0x338   :  { %v4367_v35 = vpop.f32.mrf.mxu2 }
 0x339   :  { %v4368_v36 = vadd.f32 %v6484_v34, %v4367_v35 }
 0x33b   :  { %v4370_v37 = vsub.f32 0.0, %v4368_v36 }
 0x33d   :  { %v4371_v38 = vmul.f32 1.442695, %v4370_v37 }
 0x33f   :  { %6485 = vpow2.f32 %v4371_v38 }
 0x345   :  { %v6486_v39 = vpop.eup %6485 }
 0x346   :  { %v4373_v40 = vadd.f32 1.0, %v6486_v39 }
 0x348   :  { %6487 = vrcp.f32 %v4373_v40 }
 0x34e   :  { %v6488_v41 = vpop.eup %6487 }
 0x34f   :  { %4376 = vst.msk [vmem:[%s8076_s7] sm:$0x3] %vm4375_vm1, %v6488_v41 }

</bundles_post_ra>
